<compile_context>
chip_gen: v5e
topology: v5e:2x2
jax: 0.10.0
libtpu: 0.0.40
codegen_flags: <defaults>
</compile_context>

<pallas_src>
import functools

import jax
import jax.numpy as jnp
import numpy as np
from jax import lax
from jax.experimental import pallas as pl
from jax.experimental.pallas import tpu as pltpu

_TS_MAX = 8  # max timesteps processed per grid step


def _pick_ts(T):
    """Largest TS <= _TS_MAX dividing T (no padded timesteps, no masking).
    Falls back to a padded + masked tail only when T has no usable divisor."""
    if T <= _TS_MAX:
        return T, False
    best = max(d for d in range(1, _TS_MAX + 1) if T % d == 0)
    if best >= 4:
        return best, False
    return _TS_MAX, True  # awkward T (e.g. large prime): pad + mask tail


@functools.lru_cache(maxsize=None)
def _num_tensorcores():
    """Core count per chip (v7x=2, v5e/v6e=1).  Batch is only split across >1 TC."""
    try:
        info = pltpu.get_tpu_info()
    except Exception:
        return 1
    for attr in ("num_cores", "num_tensorcores", "tensorcores_per_chip",
                 "cores_per_chip", "core_count"):
        n = getattr(info, attr, None)
        if isinstance(n, int) and n >= 1:
            return n
    return 1


# ----------------------------- Pallas kernel -------------------------------
def _lstm_kernel(T, TS, mask_tail,
                 gin0_ref, hinit_ref, cinit_ref,
                 whh0_ref, wih1_ref, whh1_ref, b1_ref,
                 wfc_ref, bfc_ref,
                 sig_ref, hn_ref, cn_ref,
                 h0s, c0s, h1s, c1s):
    t_blk = pl.program_id(1)
    BT, H = h0s.shape

    @pl.when(t_blk == 0)
    def _():
        h0s[...] = hinit_ref[0]
        c0s[...] = cinit_ref[0]
        h1s[...] = hinit_ref[1]
        c1s[...] = cinit_ref[1]

    # loop-invariant weight loads / bias broadcast hoisted out of the unrolled loop
    whh0 = whh0_ref[...]
    wih1 = wih1_ref[...]
    whh1 = whh1_ref[...]
    b1b = jnp.broadcast_to(b1_ref[...], (BT, 4 * H))  # JAX does not CSE broadcasts

    def apply_gates(gates, c):
        # in-kernel gate order [i, f, o, g]: one wide sigmoid (3H lanes), one tanh (H)
        sg = jax.nn.sigmoid(gates[:, : 3 * H])
        i_g = sg[:, 0 * H:1 * H]
        f_g = sg[:, 1 * H:2 * H]
        o_g = sg[:, 2 * H:3 * H]
        g_g = jnp.tanh(gates[:, 3 * H:4 * H])
        c_new = f_g * c + i_g * g_g
        h_new = o_g * jnp.tanh(c_new)
        return h_new, c_new

    def step(s, carry):
        h0, c0, h1, c1 = carry
        # Layer-1 h-projection depends only on the PREVIOUS h1: its MXU push can
        # hide under layer-0's EUP/VPU gate math (no concat, no h0n serialization).
        g1h = jnp.dot(h1, whh1, preferred_element_type=jnp.float32)
        # layer 0: input projection already hoisted; only h @ W_hh in the loop.
        gates0 = gin0_ref[s] + jnp.dot(h0, whh0,
                                       preferred_element_type=jnp.float32)
        h0n, c0n = apply_gates(gates0, c0)
        # (inter-layer dropout is identity at inference)
        gates1 = g1h + jnp.dot(h0n, wih1, preferred_element_type=jnp.float32) + b1b
        h1n, c1n = apply_gates(gates1, c1)
        if mask_tail:  # trace-time branch: only emitted when the time axis was padded
            valid = (t_blk * TS + s) < T
            h0n = jnp.where(valid, h0n, h0)
            c0n = jnp.where(valid, c0n, c0)
            h1n = jnp.where(valid, h1n, h1)
            c1n = jnp.where(valid, c1n, c1)
        return h0n, c0n, h1n, c1n

    h0, c0, h1, c1 = lax.fori_loop(
        0, TS, step, (h0s[...], c0s[...], h1s[...], c1s[...]), unroll=True)

    h0s[...] = h0
    c0s[...] = c0
    h1s[...] = h1
    c1s[...] = c1

    @pl.when(t_blk == pl.num_programs(1) - 1)
    def _():
        # fc(hidden -> 1) as elementwise-mul + lane reduction, then sigmoid.
        logits = jnp.sum(h1 * wfc_ref[...], axis=-1, keepdims=True) + bfc_ref[0, 0]
        sig_ref[...] = jax.nn.sigmoid(logits)
        hn_ref[0] = h0
        hn_ref[1] = h1
        cn_ref[0] = c0
        cn_ref[1] = c1


def _permute_ifgo_to_ifog(w, H):
    """Reorder gate columns from PyTorch [i, f, g, o] to kernel [i, f, o, g]."""
    return jnp.concatenate(
        [w[..., 0 * H:1 * H], w[..., 1 * H:2 * H],
         w[..., 3 * H:4 * H], w[..., 2 * H:3 * H]], axis=-1)


# ------------------------------- wrapper ------------------------------------
@jax.jit
def sentiment_lstm_forward(x_ids, h0, c0, params):
    """x_ids: (B, T) int32 token ids; (h0, c0): (2, B, H) float32 each."""
    B, T = x_ids.shape
    E = params["emb"].shape[1]
    H = params["whh0"].shape[0]

    # One-time weight prep: gate-column permutation (layer-1 weights kept separate
    # so the two layer-1 matmuls can be issued independently in the kernel).
    wih0 = _permute_ifgo_to_ifog(params["wih0"], H)
    whh0 = _permute_ifgo_to_ifog(params["whh0"], H)
    b0 = _permute_ifgo_to_ifog(params["b0"], H)
    wih1 = _permute_ifgo_to_ifog(params["wih1"], H)
    whh1 = _permute_ifgo_to_ifog(params["whh1"], H)
    b1 = _permute_ifgo_to_ifog(params["b1"], H)

    # Hoisted layer-0 input projection, gathered TIME-MAJOR -> no big transpose.
    embeds = params["emb"][x_ids.T]                                  # (T, B, E)
    gin0 = jnp.dot(embeds.reshape(T * B, E), wih0,
                   preferred_element_type=jnp.float32) + b0          # (T*B, 4H)
    gin0 = gin0.reshape(T, B, 4 * H)                                 # (T, B, 4H)

    TS, mask_tail = _pick_ts(T)
    n_t = pl.cdiv(T, TS)
    T_pad = n_t * TS
    if T_pad != T:
        gin0 = jnp.pad(gin0, ((0, T_pad - T), (0, 0), (0, 0)))       # masked in-kernel

    # Batch tiling: one tile per real TensorCore, only if tiles stay 8-row aligned.
    ncores = _num_tensorcores()
    nb = ncores if (ncores > 1 and B % ncores == 0
                    and (B // ncores) % 8 == 0 and (B // ncores) >= 8) else 1
    BT = B // nb

    # VMEM budget from actual footprint (double-buffered) + headroom; stays well
    # under v7x's 64 MiB.
    f32 = 4
    footprint = f32 * (
        2 * TS * BT * 4 * H                         # gin0 stream (2 buffers)
        + 2 * 2 * (2 * BT * H)                      # h / c init tiles
        + 2 * (3 * H * 4 * H + 8 * 4 * H + 8 * H)   # weights + sublane-padded biases
        + 2 * (BT * 128 + 2 * 2 * BT * H)           # outputs (sig padded to a lane)
        + 4 * BT * H)                               # persistent h/c scratch
    vmem_limit = int(min(max(2 * footprint, 8 << 20), 40 << 20))

    grid_spec = pltpu.PrefetchScalarGridSpec(
        num_scalar_prefetch=0,
        grid=(nb, n_t),
        in_specs=[
            pl.BlockSpec((TS, BT, 4 * H), lambda b, t: (t, b, 0)),   # gates_in0
            pl.BlockSpec((2, BT, H), lambda b, t: (0, b, 0)),        # h init
            pl.BlockSpec((2, BT, H), lambda b, t: (0, b, 0)),        # c init
            pl.BlockSpec((H, 4 * H), lambda b, t: (0, 0)),           # W_hh layer0
            pl.BlockSpec((H, 4 * H), lambda b, t: (0, 0)),           # W_ih layer1
            pl.BlockSpec((H, 4 * H), lambda b, t: (0, 0)),           # W_hh layer1
            pl.BlockSpec((1, 4 * H), lambda b, t: (0, 0)),           # bias layer1
            pl.BlockSpec((1, H), lambda b, t: (0, 0)),               # fc weight
            pl.BlockSpec(memory_space=pltpu.MemorySpace.SMEM),       # fc bias (1,1)
        ],
        out_specs=[
            pl.BlockSpec((BT, 1), lambda b, t: (b, 0)),              # sigmoid(fc(h_T))
            pl.BlockSpec((2, BT, H), lambda b, t: (0, b, 0)),        # h_n
            pl.BlockSpec((2, BT, H), lambda b, t: (0, b, 0)),        # c_n
        ],
        scratch_shapes=[pltpu.VMEM((BT, H), jnp.float32) for _ in range(4)],
    )

    sig, h_n, c_n = pl.pallas_call(
        functools.partial(_lstm_kernel, T, TS, mask_tail),
        out_shape=(
            jax.ShapeDtypeStruct((B, 1), jnp.float32),
            jax.ShapeDtypeStruct((2, B, H), jnp.float32),
            jax.ShapeDtypeStruct((2, B, H), jnp.float32),
        ),
        grid_spec=grid_spec,
        compiler_params=pltpu.CompilerParams(
            dimension_semantics=("parallel", "arbitrary"),
            vmem_limit_bytes=vmem_limit),
    )(gin0, h0, c0, whh0, wih1, whh1, b1, params["wfc"], params["bfc"])

    return sig[:, 0], (h_n, c_n)


# ----------------------------- pure-JAX reference ----------------------------
def reference_forward(x_ids, h0, c0, params):
    B, T = x_ids.shape
    H = params["whh0"].shape[0]
    emb = params["emb"][x_ids]
    h = [h0[0], h0[1]]
    c = [c0[0], c0[1]]
    for t in range(T):
        x = emb[:, t, :]
        for l in range(2):
            wih = params[f"wih{l}"]
            whh = params[f"whh{l}"]
            b = params[f"b{l}"]
            gates = x @ wih + h[l] @ whh + b          # PyTorch gate order [i,f,g,o]
            i_g = jax.nn.sigmoid(gates[:, 0 * H:1 * H])
            f_g = jax.nn.sigmoid(gates[:, 1 * H:2 * H])
            g_g = jnp.tanh(gates[:, 2 * H:3 * H])
            o_g = jax.nn.sigmoid(gates[:, 3 * H:4 * H])
            c[l] = f_g * c[l] + i_g * g_g
            h[l] = o_g * jnp.tanh(c[l])
            x = h[l]
    logits = jnp.sum(h[1] * params["wfc"], axis=-1) + params["bfc"][0, 0]
    sig = jax.nn.sigmoid(logits)
    return sig, (jnp.stack(h), jnp.stack(c))


# --------------------------------- main --------------------------------------
if __name__ == "__main__":
    # Small but (8,128)-aligned shapes consistent with the module's forward
    # (scaled down from vocab~N, E=400, H=256, B=50).
    B, T = 16, 10          # batch (mult of 8), sequence length (TS=5, no padding)
    VOCAB = 50
    E, H = 128, 128        # embedding_dim, hidden_dim (lane-aligned)
    N_LAYERS = 2

    key = jax.random.PRNGKey(0)
    keys = jax.random.split(key, 12)
    k = 1.0 / np.sqrt(H)

    def uni(kk, shape):
        return jax.random.uniform(kk, shape, jnp.float32, minval=-k, maxval=k)

    params = {
        "emb": jax.random.normal(keys[0], (VOCAB, E), jnp.float32),
        # layer 0: input E -> 4H   (stored transposed: (in, 4H), PyTorch order i,f,g,o)
        "wih0": uni(keys[1], (E, 4 * H)),
        "whh0": uni(keys[2], (H, 4 * H)),
        "b0": uni(keys[3], (1, 4 * H)) + uni(keys[4], (1, 4 * H)),   # b_ih + b_hh
        # layer 1: input H -> 4H
        "wih1": uni(keys[5], (H, 4 * H)),
        "whh1": uni(keys[6], (H, 4 * H)),
        "b1": uni(keys[7], (1, 4 * H)) + uni(keys[8], (1, 4 * H)),
        # fc: hidden -> 1  (stored as (1, H) row)
        "wfc": uni(keys[9], (1, H)),
        "bfc": uni(keys[10], (1, 1)),
    }

    x_ids = jax.random.randint(keys[11], (B, T), 0, VOCAB, dtype=jnp.int32)
    h0 = jnp.zeros((N_LAYERS, B, H), jnp.float32)   # init_hidden(batch_size)
    c0 = jnp.zeros((N_LAYERS, B, H), jnp.float32)

    sig_out, (h_n, c_n) = sentiment_lstm_forward(x_ids, h0, c0, params)
    jax.block_until_ready((sig_out, h_n, c_n))

    sig_ref, (h_ref, c_ref) = reference_forward(x_ids, h0, c0, params)
    np.testing.assert_allclose(np.asarray(sig_out), np.asarray(sig_ref), atol=1e-4, rtol=1e-4)
    np.testing.assert_allclose(np.asarray(h_n), np.asarray(h_ref), atol=1e-4, rtol=1e-4)
    np.testing.assert_allclose(np.asarray(c_n), np.asarray(c_ref), atol=1e-4, rtol=1e-4)

    print("KERNEL_OK")
</pallas_src>

<mosaic_0001>
module attributes {stable_mosaic.version = 11 : i64} {
  func.func @_lstm_kernel(%arg0: i32, %arg1: i32, %arg2: memref<5x16x512xf32, #tpu.memory_space<vmem>>, %arg3: memref<2x16x128xf32, #tpu.memory_space<vmem>>, %arg4: memref<2x16x128xf32, #tpu.memory_space<vmem>>, %arg5: memref<128x512xf32, #tpu.memory_space<vmem>>, %arg6: memref<128x512xf32, #tpu.memory_space<vmem>>, %arg7: memref<128x512xf32, #tpu.memory_space<vmem>>, %arg8: memref<1x512xf32, #tpu.memory_space<vmem>>, %arg9: memref<1x128xf32, #tpu.memory_space<vmem>>, %arg10: memref<1x1xf32, #tpu.memory_space<smem>>, %arg11: memref<16x1xf32, #tpu.memory_space<vmem>>, %arg12: memref<2x16x128xf32, #tpu.memory_space<vmem>>, %arg13: memref<2x16x128xf32, #tpu.memory_space<vmem>>, %arg14: memref<16x128xf32, #tpu.memory_space<vmem>>, %arg15: memref<16x128xf32, #tpu.memory_space<vmem>>, %arg16: memref<16x128xf32, #tpu.memory_space<vmem>>, %arg17: memref<16x128xf32, #tpu.memory_space<vmem>>) attributes {dimension_semantics = [#tpu.dimension_semantics<parallel>, #tpu.dimension_semantics<arbitrary>], iteration_bounds = array<i64: 1, 2>, scalar_prefetch = 0 : i64, scratch_operands = 4 : i64, tpu.core_type = #tpu.core_type<tc>, window_params = [{transform_indices = @transform_0, window_bounds = array<i64: 5, 16, 512>}, {transform_indices = @transform_1, window_bounds = array<i64: 2, 16, 128>}, {transform_indices = @transform_2, window_bounds = array<i64: 2, 16, 128>}, {pipeline_mode = #tpu.pipeline_mode<synchronous>, transform_indices = @transform_3, window_bounds = array<i64: 128, 512>}, {pipeline_mode = #tpu.pipeline_mode<synchronous>, transform_indices = @transform_4, window_bounds = array<i64: 128, 512>}, {pipeline_mode = #tpu.pipeline_mode<synchronous>, transform_indices = @transform_5, window_bounds = array<i64: 128, 512>}, {pipeline_mode = #tpu.pipeline_mode<synchronous>, transform_indices = @transform_6, window_bounds = array<i64: 1, 512>}, {pipeline_mode = #tpu.pipeline_mode<synchronous>, transform_indices = @transform_7, window_bounds = array<i64: 1, 128>}, {transform_indices = @transform_8, window_bounds = array<i64: 1, 1>}, {transform_indices = @transform_9, window_bounds = array<i64: 16, 1>}, {transform_indices = @transform_10, window_bounds = array<i64: 2, 16, 128>}, {transform_indices = @transform_11, window_bounds = array<i64: 2, 16, 128>}]} {
    %c0_i32 = arith.constant 0 : i32
    %0 = arith.cmpi eq, %arg1, %c0_i32 : i32
    %1 = arith.extui %0 : i1 to i32
    %c0_i32_0 = arith.constant 0 : i32
    %2 = arith.cmpi ne, %1, %c0_i32_0 : i32
    scf.if %2 {
      %c0_61 = arith.constant 0 : index
      %c0_62 = arith.constant 0 : index
      %c0_63 = arith.constant 0 : index
      %225 = vector.load %arg3[%c0_61, %c0_62, %c0_63] : memref<2x16x128xf32, #tpu.memory_space<vmem>>, vector<1x16x128xf32>
      %226 = vector.shape_cast %225 : vector<1x16x128xf32> to vector<16x128xf32>
      %c0_64 = arith.constant 0 : index
      %c0_65 = arith.constant 0 : index
      %227 = vector.load %arg14[%c0_64, %c0_65] : memref<16x128xf32, #tpu.memory_space<vmem>>, vector<16x128xf32>
      tpu.vector_store %arg14[%c0_64, %c0_65], %226 {strides = array<i32>} : memref<16x128xf32, #tpu.memory_space<vmem>>, vector<16x128xf32>,
      %c0_66 = arith.constant 0 : index
      %c0_67 = arith.constant 0 : index
      %c0_68 = arith.constant 0 : index
      %228 = vector.load %arg4[%c0_66, %c0_67, %c0_68] : memref<2x16x128xf32, #tpu.memory_space<vmem>>, vector<1x16x128xf32>
      %229 = vector.shape_cast %228 : vector<1x16x128xf32> to vector<16x128xf32>
      %c0_69 = arith.constant 0 : index
      %c0_70 = arith.constant 0 : index
      %230 = vector.load %arg15[%c0_69, %c0_70] : memref<16x128xf32, #tpu.memory_space<vmem>>, vector<16x128xf32>
      tpu.vector_store %arg15[%c0_69, %c0_70], %229 {strides = array<i32>} : memref<16x128xf32, #tpu.memory_space<vmem>>, vector<16x128xf32>,
      %c1 = arith.constant 1 : index
      %c0_71 = arith.constant 0 : index
      %c0_72 = arith.constant 0 : index
      %231 = vector.load %arg3[%c1, %c0_71, %c0_72] : memref<2x16x128xf32, #tpu.memory_space<vmem>>, vector<1x16x128xf32>
      %232 = vector.shape_cast %231 : vector<1x16x128xf32> to vector<16x128xf32>
      %c0_73 = arith.constant 0 : index
      %c0_74 = arith.constant 0 : index
      %233 = vector.load %arg16[%c0_73, %c0_74] : memref<16x128xf32, #tpu.memory_space<vmem>>, vector<16x128xf32>
      tpu.vector_store %arg16[%c0_73, %c0_74], %232 {strides = array<i32>} : memref<16x128xf32, #tpu.memory_space<vmem>>, vector<16x128xf32>,
      %c1_75 = arith.constant 1 : index
      %c0_76 = arith.constant 0 : index
      %c0_77 = arith.constant 0 : index
      %234 = vector.load %arg4[%c1_75, %c0_76, %c0_77] : memref<2x16x128xf32, #tpu.memory_space<vmem>>, vector<1x16x128xf32>
      %235 = vector.shape_cast %234 : vector<1x16x128xf32> to vector<16x128xf32>
      %c0_78 = arith.constant 0 : index
      %c0_79 = arith.constant 0 : index
      %236 = vector.load %arg17[%c0_78, %c0_79] : memref<16x128xf32, #tpu.memory_space<vmem>>, vector<16x128xf32>
      tpu.vector_store %arg17[%c0_78, %c0_79], %235 {strides = array<i32>} : memref<16x128xf32, #tpu.memory_space<vmem>>, vector<16x128xf32>,
    } else {
    }
    %c0 = arith.constant 0 : index
    %c0_1 = arith.constant 0 : index
    %3 = vector.load %arg5[%c0, %c0_1] : memref<128x512xf32, #tpu.memory_space<vmem>>, vector<128x512xf32>
    %c0_2 = arith.constant 0 : index
    %c0_3 = arith.constant 0 : index
    %4 = vector.load %arg6[%c0_2, %c0_3] : memref<128x512xf32, #tpu.memory_space<vmem>>, vector<128x512xf32>
    %c0_4 = arith.constant 0 : index
    %c0_5 = arith.constant 0 : index
    %5 = vector.load %arg7[%c0_4, %c0_5] : memref<128x512xf32, #tpu.memory_space<vmem>>, vector<128x512xf32>
    %c0_6 = arith.constant 0 : index
    %c0_7 = arith.constant 0 : index
    %6 = vector.load %arg8[%c0_6, %c0_7] : memref<1x512xf32, #tpu.memory_space<vmem>>, vector<1x512xf32>
    %7 = vector.shape_cast %6 : vector<1x512xf32> to vector<1x512xf32>
    %8 = vector.broadcast %7 : vector<1x512xf32> to vector<16x512xf32>
    %c0_8 = arith.constant 0 : index
    %c0_9 = arith.constant 0 : index
    %9 = vector.load %arg14[%c0_8, %c0_9] : memref<16x128xf32, #tpu.memory_space<vmem>>, vector<16x128xf32>
    %c0_10 = arith.constant 0 : index
    %c0_11 = arith.constant 0 : index
    %10 = vector.load %arg15[%c0_10, %c0_11] : memref<16x128xf32, #tpu.memory_space<vmem>>, vector<16x128xf32>
    %c0_12 = arith.constant 0 : index
    %c0_13 = arith.constant 0 : index
    %11 = vector.load %arg16[%c0_12, %c0_13] : memref<16x128xf32, #tpu.memory_space<vmem>>, vector<16x128xf32>
    %c0_14 = arith.constant 0 : index
    %c0_15 = arith.constant 0 : index
    %12 = vector.load %arg17[%c0_14, %c0_15] : memref<16x128xf32, #tpu.memory_space<vmem>>, vector<16x128xf32>
    %c0_i32_16 = arith.constant 0 : i32
    %cst = arith.constant dense<0.000000e+00> : vector<16x512xf32>
    %13 = tpu.matmul %11, %5, %cst {dimension_numbers = #tpu.dot_dimension_numbers<[1], [0], [0], [1], [0, 0, 1, 1], [], []>} : vector<16x128xf32>, vector<128x512xf32>, vector<16x512xf32> -> vector<16x512xf32>
    %14 = arith.index_cast %c0_i32_16 : i32 to index
    %c0_17 = arith.constant 0 : index
    %c0_18 = arith.constant 0 : index
    %15 = vector.load %arg2[%14, %c0_17, %c0_18] : memref<5x16x512xf32, #tpu.memory_space<vmem>>, vector<1x16x512xf32>
    %16 = vector.shape_cast %15 : vector<1x16x512xf32> to vector<16x512xf32>
    %cst_19 = arith.constant dense<0.000000e+00> : vector<16x512xf32>
    %17 = tpu.matmul %9, %3, %cst_19 {dimension_numbers = #tpu.dot_dimension_numbers<[1], [0], [0], [1], [0, 0, 1, 1], [], []>} : vector<16x128xf32>, vector<128x512xf32>, vector<16x512xf32> -> vector<16x512xf32>
    %18 = arith.addf %16, %17 : vector<16x512xf32>
    %19 = vector.extract_strided_slice %18 {offsets = [0, 0], sizes = [16, 384], strides = [1, 1]} : vector<16x512xf32> to vector<16x384xf32>
    %20 = arith.negf %19 : vector<16x384xf32>
    %21 = math.exp %20 : vector<16x384xf32>
    %cst_20 = arith.constant 1.000000e+00 : f32
    %22 = vector.broadcast %cst_20 : f32 to vector<16x384xf32>
    %23 = arith.addf %22, %21 : vector<16x384xf32>
    %24 = arith.divf %22, %23 : vector<16x384xf32>
    %25 = vector.extract_strided_slice %24 {offsets = [0, 0], sizes = [16, 128], strides = [1, 1]} : vector<16x384xf32> to vector<16x128xf32>
    %26 = vector.extract_strided_slice %24 {offsets = [0, 128], sizes = [16, 128], strides = [1, 1]} : vector<16x384xf32> to vector<16x128xf32>
    %27 = vector.extract_strided_slice %24 {offsets = [0, 256], sizes = [16, 128], strides = [1, 1]} : vector<16x384xf32> to vector<16x128xf32>
    %28 = vector.extract_strided_slice %18 {offsets = [0, 384], sizes = [16, 128], strides = [1, 1]} : vector<16x512xf32> to vector<16x128xf32>
    %29 = math.tanh %28 : vector<16x128xf32>
    %30 = arith.mulf %26, %10 : vector<16x128xf32>
    %31 = arith.mulf %25, %29 : vector<16x128xf32>
    %32 = arith.addf %30, %31 : vector<16x128xf32>
    %33 = math.tanh %32 : vector<16x128xf32>
    %34 = arith.mulf %27, %33 : vector<16x128xf32>
    %cst_21 = arith.constant dense<0.000000e+00> : vector<16x512xf32>
    %35 = tpu.matmul %34, %4, %cst_21 {dimension_numbers = #tpu.dot_dimension_numbers<[1], [0], [0], [1], [0, 0, 1, 1], [], []>} : vector<16x128xf32>, vector<128x512xf32>, vector<16x512xf32> -> vector<16x512xf32>
    %36 = arith.addf %13, %35 : vector<16x512xf32>
    %37 = arith.addf %36, %8 : vector<16x512xf32>
    %38 = vector.extract_strided_slice %37 {offsets = [0, 0], sizes = [16, 384], strides = [1, 1]} : vector<16x512xf32> to vector<16x384xf32>
    %39 = arith.negf %38 : vector<16x384xf32>
    %40 = math.exp %39 : vector<16x384xf32>
    %cst_22 = arith.constant 1.000000e+00 : f32
    %41 = vector.broadcast %cst_22 : f32 to vector<16x384xf32>
    %42 = arith.addf %41, %40 : vector<16x384xf32>
    %43 = arith.divf %41, %42 : vector<16x384xf32>
    %44 = vector.extract_strided_slice %43 {offsets = [0, 0], sizes = [16, 128], strides = [1, 1]} : vector<16x384xf32> to vector<16x128xf32>
    %45 = vector.extract_strided_slice %43 {offsets = [0, 128], sizes = [16, 128], strides = [1, 1]} : vector<16x384xf32> to vector<16x128xf32>
    %46 = vector.extract_strided_slice %43 {offsets = [0, 256], sizes = [16, 128], strides = [1, 1]} : vector<16x384xf32> to vector<16x128xf32>
    %47 = vector.extract_strided_slice %37 {offsets = [0, 384], sizes = [16, 128], strides = [1, 1]} : vector<16x512xf32> to vector<16x128xf32>
    %48 = math.tanh %47 : vector<16x128xf32>
    %49 = arith.mulf %45, %12 : vector<16x128xf32>
    %50 = arith.mulf %44, %48 : vector<16x128xf32>
    %51 = arith.addf %49, %50 : vector<16x128xf32>
    %52 = math.tanh %51 : vector<16x128xf32>
    %53 = arith.mulf %46, %52 : vector<16x128xf32>
    %c1_i32 = arith.constant 1 : i32
    %cst_23 = arith.constant dense<0.000000e+00> : vector<16x512xf32>
    %54 = tpu.matmul %53, %5, %cst_23 {dimension_numbers = #tpu.dot_dimension_numbers<[1], [0], [0], [1], [0, 0, 1, 1], [], []>} : vector<16x128xf32>, vector<128x512xf32>, vector<16x512xf32> -> vector<16x512xf32>
    %55 = arith.index_cast %c1_i32 : i32 to index
    %c0_24 = arith.constant 0 : index
    %c0_25 = arith.constant 0 : index
    %56 = vector.load %arg2[%55, %c0_24, %c0_25] : memref<5x16x512xf32, #tpu.memory_space<vmem>>, vector<1x16x512xf32>
    %57 = vector.shape_cast %56 : vector<1x16x512xf32> to vector<16x512xf32>
    %cst_26 = arith.constant dense<0.000000e+00> : vector<16x512xf32>
    %58 = tpu.matmul %34, %3, %cst_26 {dimension_numbers = #tpu.dot_dimension_numbers<[1], [0], [0], [1], [0, 0, 1, 1], [], []>} : vector<16x128xf32>, vector<128x512xf32>, vector<16x512xf32> -> vector<16x512xf32>
    %59 = arith.addf %57, %58 : vector<16x512xf32>
    %60 = vector.extract_strided_slice %59 {offsets = [0, 0], sizes = [16, 384], strides = [1, 1]} : vector<16x512xf32> to vector<16x384xf32>
    %61 = arith.negf %60 : vector<16x384xf32>
    %62 = math.exp %61 : vector<16x384xf32>
    %cst_27 = arith.constant 1.000000e+00 : f32
    %63 = vector.broadcast %cst_27 : f32 to vector<16x384xf32>
    %64 = arith.addf %63, %62 : vector<16x384xf32>
    %65 = arith.divf %63, %64 : vector<16x384xf32>
    %66 = vector.extract_strided_slice %65 {offsets = [0, 0], sizes = [16, 128], strides = [1, 1]} : vector<16x384xf32> to vector<16x128xf32>
    %67 = vector.extract_strided_slice %65 {offsets = [0, 128], sizes = [16, 128], strides = [1, 1]} : vector<16x384xf32> to vector<16x128xf32>
    %68 = vector.extract_strided_slice %65 {offsets = [0, 256], sizes = [16, 128], strides = [1, 1]} : vector<16x384xf32> to vector<16x128xf32>
    %69 = vector.extract_strided_slice %59 {offsets = [0, 384], sizes = [16, 128], strides = [1, 1]} : vector<16x512xf32> to vector<16x128xf32>
    %70 = math.tanh %69 : vector<16x128xf32>
    %71 = arith.mulf %67, %32 : vector<16x128xf32>
    %72 = arith.mulf %66, %70 : vector<16x128xf32>
    %73 = arith.addf %71, %72 : vector<16x128xf32>
    %74 = math.tanh %73 : vector<16x128xf32>
    %75 = arith.mulf %68, %74 : vector<16x128xf32>
    %cst_28 = arith.constant dense<0.000000e+00> : vector<16x512xf32>
    %76 = tpu.matmul %75, %4, %cst_28 {dimension_numbers = #tpu.dot_dimension_numbers<[1], [0], [0], [1], [0, 0, 1, 1], [], []>} : vector<16x128xf32>, vector<128x512xf32>, vector<16x512xf32> -> vector<16x512xf32>
    %77 = arith.addf %54, %76 : vector<16x512xf32>
    %78 = arith.addf %77, %8 : vector<16x512xf32>
    %79 = vector.extract_strided_slice %78 {offsets = [0, 0], sizes = [16, 384], strides = [1, 1]} : vector<16x512xf32> to vector<16x384xf32>
    %80 = arith.negf %79 : vector<16x384xf32>
    %81 = math.exp %80 : vector<16x384xf32>
    %cst_29 = arith.constant 1.000000e+00 : f32
    %82 = vector.broadcast %cst_29 : f32 to vector<16x384xf32>
    %83 = arith.addf %82, %81 : vector<16x384xf32>
    %84 = arith.divf %82, %83 : vector<16x384xf32>
    %85 = vector.extract_strided_slice %84 {offsets = [0, 0], sizes = [16, 128], strides = [1, 1]} : vector<16x384xf32> to vector<16x128xf32>
    %86 = vector.extract_strided_slice %84 {offsets = [0, 128], sizes = [16, 128], strides = [1, 1]} : vector<16x384xf32> to vector<16x128xf32>
    %87 = vector.extract_strided_slice %84 {offsets = [0, 256], sizes = [16, 128], strides = [1, 1]} : vector<16x384xf32> to vector<16x128xf32>
    %88 = vector.extract_strided_slice %78 {offsets = [0, 384], sizes = [16, 128], strides = [1, 1]} : vector<16x512xf32> to vector<16x128xf32>
    %89 = math.tanh %88 : vector<16x128xf32>
    %90 = arith.mulf %86, %51 : vector<16x128xf32>
    %91 = arith.mulf %85, %89 : vector<16x128xf32>
    %92 = arith.addf %90, %91 : vector<16x128xf32>
    %93 = math.tanh %92 : vector<16x128xf32>
    %94 = arith.mulf %87, %93 : vector<16x128xf32>
    %c2_i32 = arith.constant 2 : i32
    %cst_30 = arith.constant dense<0.000000e+00> : vector<16x512xf32>
    %95 = tpu.matmul %94, %5, %cst_30 {dimension_numbers = #tpu.dot_dimension_numbers<[1], [0], [0], [1], [0, 0, 1, 1], [], []>} : vector<16x128xf32>, vector<128x512xf32>, vector<16x512xf32> -> vector<16x512xf32>
    %96 = arith.index_cast %c2_i32 : i32 to index
    %c0_31 = arith.constant 0 : index
    %c0_32 = arith.constant 0 : index
    %97 = vector.load %arg2[%96, %c0_31, %c0_32] : memref<5x16x512xf32, #tpu.memory_space<vmem>>, vector<1x16x512xf32>
    %98 = vector.shape_cast %97 : vector<1x16x512xf32> to vector<16x512xf32>
    %cst_33 = arith.constant dense<0.000000e+00> : vector<16x512xf32>
    %99 = tpu.matmul %75, %3, %cst_33 {dimension_numbers = #tpu.dot_dimension_numbers<[1], [0], [0], [1], [0, 0, 1, 1], [], []>} : vector<16x128xf32>, vector<128x512xf32>, vector<16x512xf32> -> vector<16x512xf32>
    %100 = arith.addf %98, %99 : vector<16x512xf32>
    %101 = vector.extract_strided_slice %100 {offsets = [0, 0], sizes = [16, 384], strides = [1, 1]} : vector<16x512xf32> to vector<16x384xf32>
    %102 = arith.negf %101 : vector<16x384xf32>
    %103 = math.exp %102 : vector<16x384xf32>
    %cst_34 = arith.constant 1.000000e+00 : f32
    %104 = vector.broadcast %cst_34 : f32 to vector<16x384xf32>
    %105 = arith.addf %104, %103 : vector<16x384xf32>
    %106 = arith.divf %104, %105 : vector<16x384xf32>
    %107 = vector.extract_strided_slice %106 {offsets = [0, 0], sizes = [16, 128], strides = [1, 1]} : vector<16x384xf32> to vector<16x128xf32>
    %108 = vector.extract_strided_slice %106 {offsets = [0, 128], sizes = [16, 128], strides = [1, 1]} : vector<16x384xf32> to vector<16x128xf32>
    %109 = vector.extract_strided_slice %106 {offsets = [0, 256], sizes = [16, 128], strides = [1, 1]} : vector<16x384xf32> to vector<16x128xf32>
    %110 = vector.extract_strided_slice %100 {offsets = [0, 384], sizes = [16, 128], strides = [1, 1]} : vector<16x512xf32> to vector<16x128xf32>
    %111 = math.tanh %110 : vector<16x128xf32>
    %112 = arith.mulf %108, %73 : vector<16x128xf32>
    %113 = arith.mulf %107, %111 : vector<16x128xf32>
    %114 = arith.addf %112, %113 : vector<16x128xf32>
    %115 = math.tanh %114 : vector<16x128xf32>
    %116 = arith.mulf %109, %115 : vector<16x128xf32>
    %cst_35 = arith.constant dense<0.000000e+00> : vector<16x512xf32>
    %117 = tpu.matmul %116, %4, %cst_35 {dimension_numbers = #tpu.dot_dimension_numbers<[1], [0], [0], [1], [0, 0, 1, 1], [], []>} : vector<16x128xf32>, vector<128x512xf32>, vector<16x512xf32> -> vector<16x512xf32>
    %118 = arith.addf %95, %117 : vector<16x512xf32>
    %119 = arith.addf %118, %8 : vector<16x512xf32>
    %120 = vector.extract_strided_slice %119 {offsets = [0, 0], sizes = [16, 384], strides = [1, 1]} : vector<16x512xf32> to vector<16x384xf32>
    %121 = arith.negf %120 : vector<16x384xf32>
    %122 = math.exp %121 : vector<16x384xf32>
    %cst_36 = arith.constant 1.000000e+00 : f32
    %123 = vector.broadcast %cst_36 : f32 to vector<16x384xf32>
    %124 = arith.addf %123, %122 : vector<16x384xf32>
    %125 = arith.divf %123, %124 : vector<16x384xf32>
    %126 = vector.extract_strided_slice %125 {offsets = [0, 0], sizes = [16, 128], strides = [1, 1]} : vector<16x384xf32> to vector<16x128xf32>
    %127 = vector.extract_strided_slice %125 {offsets = [0, 128], sizes = [16, 128], strides = [1, 1]} : vector<16x384xf32> to vector<16x128xf32>
    %128 = vector.extract_strided_slice %125 {offsets = [0, 256], sizes = [16, 128], strides = [1, 1]} : vector<16x384xf32> to vector<16x128xf32>
    %129 = vector.extract_strided_slice %119 {offsets = [0, 384], sizes = [16, 128], strides = [1, 1]} : vector<16x512xf32> to vector<16x128xf32>
    %130 = math.tanh %129 : vector<16x128xf32>
    %131 = arith.mulf %127, %92 : vector<16x128xf32>
    %132 = arith.mulf %126, %130 : vector<16x128xf32>
    %133 = arith.addf %131, %132 : vector<16x128xf32>
    %134 = math.tanh %133 : vector<16x128xf32>
    %135 = arith.mulf %128, %134 : vector<16x128xf32>
    %c3_i32 = arith.constant 3 : i32
    %cst_37 = arith.constant dense<0.000000e+00> : vector<16x512xf32>
    %136 = tpu.matmul %135, %5, %cst_37 {dimension_numbers = #tpu.dot_dimension_numbers<[1], [0], [0], [1], [0, 0, 1, 1], [], []>} : vector<16x128xf32>, vector<128x512xf32>, vector<16x512xf32> -> vector<16x512xf32>
    %137 = arith.index_cast %c3_i32 : i32 to index
    %c0_38 = arith.constant 0 : index
    %c0_39 = arith.constant 0 : index
    %138 = vector.load %arg2[%137, %c0_38, %c0_39] : memref<5x16x512xf32, #tpu.memory_space<vmem>>, vector<1x16x512xf32>
    %139 = vector.shape_cast %138 : vector<1x16x512xf32> to vector<16x512xf32>
    %cst_40 = arith.constant dense<0.000000e+00> : vector<16x512xf32>
    %140 = tpu.matmul %116, %3, %cst_40 {dimension_numbers = #tpu.dot_dimension_numbers<[1], [0], [0], [1], [0, 0, 1, 1], [], []>} : vector<16x128xf32>, vector<128x512xf32>, vector<16x512xf32> -> vector<16x512xf32>
    %141 = arith.addf %139, %140 : vector<16x512xf32>
    %142 = vector.extract_strided_slice %141 {offsets = [0, 0], sizes = [16, 384], strides = [1, 1]} : vector<16x512xf32> to vector<16x384xf32>
    %143 = arith.negf %142 : vector<16x384xf32>
    %144 = math.exp %143 : vector<16x384xf32>
    %cst_41 = arith.constant 1.000000e+00 : f32
    %145 = vector.broadcast %cst_41 : f32 to vector<16x384xf32>
    %146 = arith.addf %145, %144 : vector<16x384xf32>
    %147 = arith.divf %145, %146 : vector<16x384xf32>
    %148 = vector.extract_strided_slice %147 {offsets = [0, 0], sizes = [16, 128], strides = [1, 1]} : vector<16x384xf32> to vector<16x128xf32>
    %149 = vector.extract_strided_slice %147 {offsets = [0, 128], sizes = [16, 128], strides = [1, 1]} : vector<16x384xf32> to vector<16x128xf32>
    %150 = vector.extract_strided_slice %147 {offsets = [0, 256], sizes = [16, 128], strides = [1, 1]} : vector<16x384xf32> to vector<16x128xf32>
    %151 = vector.extract_strided_slice %141 {offsets = [0, 384], sizes = [16, 128], strides = [1, 1]} : vector<16x512xf32> to vector<16x128xf32>
    %152 = math.tanh %151 : vector<16x128xf32>
    %153 = arith.mulf %149, %114 : vector<16x128xf32>
    %154 = arith.mulf %148, %152 : vector<16x128xf32>
    %155 = arith.addf %153, %154 : vector<16x128xf32>
    %156 = math.tanh %155 : vector<16x128xf32>
    %157 = arith.mulf %150, %156 : vector<16x128xf32>
    %cst_42 = arith.constant dense<0.000000e+00> : vector<16x512xf32>
    %158 = tpu.matmul %157, %4, %cst_42 {dimension_numbers = #tpu.dot_dimension_numbers<[1], [0], [0], [1], [0, 0, 1, 1], [], []>} : vector<16x128xf32>, vector<128x512xf32>, vector<16x512xf32> -> vector<16x512xf32>
    %159 = arith.addf %136, %158 : vector<16x512xf32>
    %160 = arith.addf %159, %8 : vector<16x512xf32>
    %161 = vector.extract_strided_slice %160 {offsets = [0, 0], sizes = [16, 384], strides = [1, 1]} : vector<16x512xf32> to vector<16x384xf32>
    %162 = arith.negf %161 : vector<16x384xf32>
    %163 = math.exp %162 : vector<16x384xf32>
    %cst_43 = arith.constant 1.000000e+00 : f32
    %164 = vector.broadcast %cst_43 : f32 to vector<16x384xf32>
    %165 = arith.addf %164, %163 : vector<16x384xf32>
    %166 = arith.divf %164, %165 : vector<16x384xf32>
    %167 = vector.extract_strided_slice %166 {offsets = [0, 0], sizes = [16, 128], strides = [1, 1]} : vector<16x384xf32> to vector<16x128xf32>
    %168 = vector.extract_strided_slice %166 {offsets = [0, 128], sizes = [16, 128], strides = [1, 1]} : vector<16x384xf32> to vector<16x128xf32>
    %169 = vector.extract_strided_slice %166 {offsets = [0, 256], sizes = [16, 128], strides = [1, 1]} : vector<16x384xf32> to vector<16x128xf32>
    %170 = vector.extract_strided_slice %160 {offsets = [0, 384], sizes = [16, 128], strides = [1, 1]} : vector<16x512xf32> to vector<16x128xf32>
    %171 = math.tanh %170 : vector<16x128xf32>
    %172 = arith.mulf %168, %133 : vector<16x128xf32>
    %173 = arith.mulf %167, %171 : vector<16x128xf32>
    %174 = arith.addf %172, %173 : vector<16x128xf32>
    %175 = math.tanh %174 : vector<16x128xf32>
    %176 = arith.mulf %169, %175 : vector<16x128xf32>
    %c4_i32 = arith.constant 4 : i32
    %cst_44 = arith.constant dense<0.000000e+00> : vector<16x512xf32>
    %177 = tpu.matmul %176, %5, %cst_44 {dimension_numbers = #tpu.dot_dimension_numbers<[1], [0], [0], [1], [0, 0, 1, 1], [], []>} : vector<16x128xf32>, vector<128x512xf32>, vector<16x512xf32> -> vector<16x512xf32>
    %178 = arith.index_cast %c4_i32 : i32 to index
    %c0_45 = arith.constant 0 : index
    %c0_46 = arith.constant 0 : index
    %179 = vector.load %arg2[%178, %c0_45, %c0_46] : memref<5x16x512xf32, #tpu.memory_space<vmem>>, vector<1x16x512xf32>
    %180 = vector.shape_cast %179 : vector<1x16x512xf32> to vector<16x512xf32>
    %cst_47 = arith.constant dense<0.000000e+00> : vector<16x512xf32>
    %181 = tpu.matmul %157, %3, %cst_47 {dimension_numbers = #tpu.dot_dimension_numbers<[1], [0], [0], [1], [0, 0, 1, 1], [], []>} : vector<16x128xf32>, vector<128x512xf32>, vector<16x512xf32> -> vector<16x512xf32>
    %182 = arith.addf %180, %181 : vector<16x512xf32>
    %183 = vector.extract_strided_slice %182 {offsets = [0, 0], sizes = [16, 384], strides = [1, 1]} : vector<16x512xf32> to vector<16x384xf32>
    %184 = arith.negf %183 : vector<16x384xf32>
    %185 = math.exp %184 : vector<16x384xf32>
    %cst_48 = arith.constant 1.000000e+00 : f32
    %186 = vector.broadcast %cst_48 : f32 to vector<16x384xf32>
    %187 = arith.addf %186, %185 : vector<16x384xf32>
    %188 = arith.divf %186, %187 : vector<16x384xf32>
    %189 = vector.extract_strided_slice %188 {offsets = [0, 0], sizes = [16, 128], strides = [1, 1]} : vector<16x384xf32> to vector<16x128xf32>
    %190 = vector.extract_strided_slice %188 {offsets = [0, 128], sizes = [16, 128], strides = [1, 1]} : vector<16x384xf32> to vector<16x128xf32>
    %191 = vector.extract_strided_slice %188 {offsets = [0, 256], sizes = [16, 128], strides = [1, 1]} : vector<16x384xf32> to vector<16x128xf32>
    %192 = vector.extract_strided_slice %182 {offsets = [0, 384], sizes = [16, 128], strides = [1, 1]} : vector<16x512xf32> to vector<16x128xf32>
    %193 = math.tanh %192 : vector<16x128xf32>
    %194 = arith.mulf %190, %155 : vector<16x128xf32>
    %195 = arith.mulf %189, %193 : vector<16x128xf32>
    %196 = arith.addf %194, %195 : vector<16x128xf32>
    %197 = math.tanh %196 : vector<16x128xf32>
    %198 = arith.mulf %191, %197 : vector<16x128xf32>
    %cst_49 = arith.constant dense<0.000000e+00> : vector<16x512xf32>
    %199 = tpu.matmul %198, %4, %cst_49 {dimension_numbers = #tpu.dot_dimension_numbers<[1], [0], [0], [1], [0, 0, 1, 1], [], []>} : vector<16x128xf32>, vector<128x512xf32>, vector<16x512xf32> -> vector<16x512xf32>
    %200 = arith.addf %177, %199 : vector<16x512xf32>
    %201 = arith.addf %200, %8 : vector<16x512xf32>
    %202 = vector.extract_strided_slice %201 {offsets = [0, 0], sizes = [16, 384], strides = [1, 1]} : vector<16x512xf32> to vector<16x384xf32>
    %203 = arith.negf %202 : vector<16x384xf32>
    %204 = math.exp %203 : vector<16x384xf32>
    %cst_50 = arith.constant 1.000000e+00 : f32
    %205 = vector.broadcast %cst_50 : f32 to vector<16x384xf32>
    %206 = arith.addf %205, %204 : vector<16x384xf32>
    %207 = arith.divf %205, %206 : vector<16x384xf32>
    %208 = vector.extract_strided_slice %207 {offsets = [0, 0], sizes = [16, 128], strides = [1, 1]} : vector<16x384xf32> to vector<16x128xf32>
    %209 = vector.extract_strided_slice %207 {offsets = [0, 128], sizes = [16, 128], strides = [1, 1]} : vector<16x384xf32> to vector<16x128xf32>
    %210 = vector.extract_strided_slice %207 {offsets = [0, 256], sizes = [16, 128], strides = [1, 1]} : vector<16x384xf32> to vector<16x128xf32>
    %211 = vector.extract_strided_slice %201 {offsets = [0, 384], sizes = [16, 128], strides = [1, 1]} : vector<16x512xf32> to vector<16x128xf32>
    %212 = math.tanh %211 : vector<16x128xf32>
    %213 = arith.mulf %209, %174 : vector<16x128xf32>
    %214 = arith.mulf %208, %212 : vector<16x128xf32>
    %215 = arith.addf %213, %214 : vector<16x128xf32>
    %216 = math.tanh %215 : vector<16x128xf32>
    %217 = arith.mulf %210, %216 : vector<16x128xf32>
    %c5_i32 = arith.constant 5 : i32
    %c0_51 = arith.constant 0 : index
    %c0_52 = arith.constant 0 : index
    %218 = vector.load %arg14[%c0_51, %c0_52] : memref<16x128xf32, #tpu.memory_space<vmem>>, vector<16x128xf32>
    tpu.vector_store %arg14[%c0_51, %c0_52], %198 {strides = array<i32>} : memref<16x128xf32, #tpu.memory_space<vmem>>, vector<16x128xf32>,
    %c0_53 = arith.constant 0 : index
    %c0_54 = arith.constant 0 : index
    %219 = vector.load %arg15[%c0_53, %c0_54] : memref<16x128xf32, #tpu.memory_space<vmem>>, vector<16x128xf32>
    tpu.vector_store %arg15[%c0_53, %c0_54], %196 {strides = array<i32>} : memref<16x128xf32, #tpu.memory_space<vmem>>, vector<16x128xf32>,
    %c0_55 = arith.constant 0 : index
    %c0_56 = arith.constant 0 : index
    %220 = vector.load %arg16[%c0_55, %c0_56] : memref<16x128xf32, #tpu.memory_space<vmem>>, vector<16x128xf32>
    tpu.vector_store %arg16[%c0_55, %c0_56], %217 {strides = array<i32>} : memref<16x128xf32, #tpu.memory_space<vmem>>, vector<16x128xf32>,
    %c0_57 = arith.constant 0 : index
    %c0_58 = arith.constant 0 : index
    %221 = vector.load %arg17[%c0_57, %c0_58] : memref<16x128xf32, #tpu.memory_space<vmem>>, vector<16x128xf32>
    tpu.vector_store %arg17[%c0_57, %c0_58], %215 {strides = array<i32>} : memref<16x128xf32, #tpu.memory_space<vmem>>, vector<16x128xf32>,
    %c1_i32_59 = arith.constant 1 : i32
    %222 = arith.cmpi eq, %arg1, %c1_i32_59 : i32
    %223 = arith.extui %222 : i1 to i32
    %c0_i32_60 = arith.constant 0 : i32
    %224 = arith.cmpi ne, %223, %c0_i32_60 : i32
    scf.if %224 {
      %c0_61 = arith.constant 0 : index
      %c0_62 = arith.constant 0 : index
      %225 = vector.load %arg9[%c0_61, %c0_62] : memref<1x128xf32, #tpu.memory_space<vmem>>, vector<1x128xf32>
      %226 = vector.broadcast %225 : vector<1x128xf32> to vector<16x128xf32>
      %227 = arith.mulf %217, %226 : vector<16x128xf32>
      %cst_63 = arith.constant dense<0.000000e+00> : vector<16xf32>
      %228 = vector.multi_reduction <add>, %227, %cst_63 [1] : vector<16x128xf32> to vector<16xf32>
      %229 = vector.shape_cast %228 : vector<16xf32> to vector<16x1xf32>
      %c0_64 = arith.constant 0 : index
      %c0_65 = arith.constant 0 : index
      %230 = memref.load %arg10[%c0_64, %c0_65] : memref<1x1xf32, #tpu.memory_space<smem>>
      %231 = vector.broadcast %230 : f32 to vector<16x1xf32>
      %232 = arith.addf %229, %231 : vector<16x1xf32>
      %233 = arith.negf %232 : vector<16x1xf32>
      %234 = math.exp %233 : vector<16x1xf32>
      %cst_66 = arith.constant 1.000000e+00 : f32
      %235 = vector.broadcast %cst_66 : f32 to vector<16x1xf32>
      %236 = arith.addf %235, %234 : vector<16x1xf32>
      %237 = arith.divf %235, %236 : vector<16x1xf32>
      %c0_67 = arith.constant 0 : index
      %c0_68 = arith.constant 0 : index
      %238 = vector.load %arg11[%c0_67, %c0_68] : memref<16x1xf32, #tpu.memory_space<vmem>>, vector<16x1xf32>
      tpu.vector_store %arg11[%c0_67, %c0_68], %237 {strides = array<i32>} : memref<16x1xf32, #tpu.memory_space<vmem>>, vector<16x1xf32>,
      %c0_69 = arith.constant 0 : index
      %c0_70 = arith.constant 0 : index
      %c0_71 = arith.constant 0 : index
      %239 = vector.load %arg12[%c0_69, %c0_70, %c0_71] : memref<2x16x128xf32, #tpu.memory_space<vmem>>, vector<1x16x128xf32>
      %240 = vector.shape_cast %239 : vector<1x16x128xf32> to vector<16x128xf32>
      %241 = vector.shape_cast %198 : vector<16x128xf32> to vector<1x16x128xf32>
      tpu.vector_store %arg12[%c0_69, %c0_70, %c0_71], %241 {strides = array<i32>} : memref<2x16x128xf32, #tpu.memory_space<vmem>>, vector<1x16x128xf32>,
      %c1 = arith.constant 1 : index
      %c0_72 = arith.constant 0 : index
      %c0_73 = arith.constant 0 : index
      %242 = vector.load %arg12[%c1, %c0_72, %c0_73] : memref<2x16x128xf32, #tpu.memory_space<vmem>>, vector<1x16x128xf32>
      %243 = vector.shape_cast %242 : vector<1x16x128xf32> to vector<16x128xf32>
      %244 = vector.shape_cast %217 : vector<16x128xf32> to vector<1x16x128xf32>
      tpu.vector_store %arg12[%c1, %c0_72, %c0_73], %244 {strides = array<i32>} : memref<2x16x128xf32, #tpu.memory_space<vmem>>, vector<1x16x128xf32>,
      %c0_74 = arith.constant 0 : index
      %c0_75 = arith.constant 0 : index
      %c0_76 = arith.constant 0 : index
      %245 = vector.load %arg13[%c0_74, %c0_75, %c0_76] : memref<2x16x128xf32, #tpu.memory_space<vmem>>, vector<1x16x128xf32>
      %246 = vector.shape_cast %245 : vector<1x16x128xf32> to vector<16x128xf32>
      %247 = vector.shape_cast %196 : vector<16x128xf32> to vector<1x16x128xf32>
      tpu.vector_store %arg13[%c0_74, %c0_75, %c0_76], %247 {strides = array<i32>} : memref<2x16x128xf32, #tpu.memory_space<vmem>>, vector<1x16x128xf32>,
      %c1_77 = arith.constant 1 : index
      %c0_78 = arith.constant 0 : index
      %c0_79 = arith.constant 0 : index
      %248 = vector.load %arg13[%c1_77, %c0_78, %c0_79] : memref<2x16x128xf32, #tpu.memory_space<vmem>>, vector<1x16x128xf32>
      %249 = vector.shape_cast %248 : vector<1x16x128xf32> to vector<16x128xf32>
      %250 = vector.shape_cast %215 : vector<16x128xf32> to vector<1x16x128xf32>
      tpu.vector_store %arg13[%c1_77, %c0_78, %c0_79], %250 {strides = array<i32>} : memref<2x16x128xf32, #tpu.memory_space<vmem>>, vector<1x16x128xf32>,
    } else {
    }
    return
  }
  func.func @transform_0(%arg0: i32, %arg1: i32) -> (i32, i32, i32) {
    %c0_i32 = arith.constant 0 : i32
    %c0_i32_0 = arith.constant 0 : i32
    return %arg1, %arg0, %c0_i32 : i32, i32, i32
  }
  func.func @transform_1(%arg0: i32, %arg1: i32) -> (i32, i32, i32) {
    %c0_i32 = arith.constant 0 : i32
    %c0_i32_0 = arith.constant 0 : i32
    %c0_i32_1 = arith.constant 0 : i32
    return %c0_i32, %arg0, %c0_i32_0 : i32, i32, i32
  }
  func.func @transform_2(%arg0: i32, %arg1: i32) -> (i32, i32, i32) {
    %c0_i32 = arith.constant 0 : i32
    %c0_i32_0 = arith.constant 0 : i32
    %c0_i32_1 = arith.constant 0 : i32
    return %c0_i32, %arg0, %c0_i32_0 : i32, i32, i32
  }
  func.func @transform_3(%arg0: i32, %arg1: i32) -> (i32, i32) {
    %c0_i32 = arith.constant 0 : i32
    %c0_i32_0 = arith.constant 0 : i32
    %c0_i32_1 = arith.constant 0 : i32
    return %c0_i32, %c0_i32_0 : i32, i32
  }
  func.func @transform_4(%arg0: i32, %arg1: i32) -> (i32, i32) {
    %c0_i32 = arith.constant 0 : i32
    %c0_i32_0 = arith.constant 0 : i32
    %c0_i32_1 = arith.constant 0 : i32
    return %c0_i32, %c0_i32_0 : i32, i32
  }
  func.func @transform_5(%arg0: i32, %arg1: i32) -> (i32, i32) {
    %c0_i32 = arith.constant 0 : i32
    %c0_i32_0 = arith.constant 0 : i32
    %c0_i32_1 = arith.constant 0 : i32
    return %c0_i32, %c0_i32_0 : i32, i32
  }
  func.func @transform_6(%arg0: i32, %arg1: i32) -> (i32, i32) {
    %c0_i32 = arith.constant 0 : i32
    %c0_i32_0 = arith.constant 0 : i32
    %c0_i32_1 = arith.constant 0 : i32
    return %c0_i32, %c0_i32_0 : i32, i32
  }
  func.func @transform_7(%arg0: i32, %arg1: i32) -> (i32, i32) {
    %c0_i32 = arith.constant 0 : i32
    %c0_i32_0 = arith.constant 0 : i32
    %c0_i32_1 = arith.constant 0 : i32
    return %c0_i32, %c0_i32_0 : i32, i32
  }
  func.func @transform_8(%arg0: i32, %arg1: i32) -> (i32, i32) {
    %c0_i32 = arith.constant 0 : i32
    %c0_i32_0 = arith.constant 0 : i32
    %c0_i32_1 = arith.constant 0 : i32
    return %c0_i32, %c0_i32_0 : i32, i32
  }
  func.func @transform_9(%arg0: i32, %arg1: i32) -> (i32, i32) {
    %c0_i32 = arith.constant 0 : i32
    %c0_i32_0 = arith.constant 0 : i32
    return %arg0, %c0_i32 : i32, i32
  }
  func.func @transform_10(%arg0: i32, %arg1: i32) -> (i32, i32, i32) {
    %c0_i32 = arith.constant 0 : i32
    %c0_i32_0 = arith.constant 0 : i32
    %c0_i32_1 = arith.constant 0 : i32
    return %c0_i32, %arg0, %c0_i32_0 : i32, i32, i32
  }
  func.func @transform_11(%arg0: i32, %arg1: i32) -> (i32, i32, i32) {
    %c0_i32 = arith.constant 0 : i32
    %c0_i32_0 = arith.constant 0 : i32
    %c0_i32_1 = arith.constant 0 : i32
    return %c0_i32, %arg0, %c0_i32_0 : i32, i32, i32
  }
}

</mosaic_0001>

<bundles_post_ra>
// kernel: sentiment_lstm_forward.1
= control target key start
LH: loop header
LB: loop body
LE: loop exit
PB: predicated region body
PF: predicated region fallthrough
CT: control target
= control target key end

     0   :  { %s9500_s0 = inlined_call_operand.vmem [shape: f32[10,16,512], index: 0, kind: input, shape index: {}]   ;;  %s9501_s1 = inlined_call_operand.vmem [shape: f32[2,16,128], index: 1, kind: input, shape index: {}]   ;;  %s9502_s2 = inlined_call_operand.vmem [shape: f32[2,16,128], index: 2, kind: input, shape index: {}]   ;;  %s9503_s3 = inlined_call_operand.vmem [shape: f32[128,512], index: 3, kind: input, shape index: {}]   ;;  %s9504_s4 = inlined_call_operand.vmem [shape: f32[128,512], index: 4, kind: input, shape index: {}]   ;;  %s9505_s5 = inlined_call_operand.vmem [shape: f32[128,512], index: 5, kind: input, shape index: {}]   ;;  %s9506_s6 = inlined_call_operand.vmem [shape: f32[1,512], index: 6, kind: input, shape index: {}]   ;;  %s9507_s7 = inlined_call_operand.vmem [shape: f32[1,128], index: 7, kind: input, shape index: {}]   ;;  %s9508_s8 = inlined_call_operand.<no memory space> [shape: f32[1,1], index: 8, kind: input, shape index: {}]   ;;  %s9509_s9 = inlined_call_operand.vmem [shape: f32[16,1], index: 9, kind: output, shape index: {0}]   ;;  %s9510_s10 = inlined_call_operand.hbm [shape: f32[2,16,128], index: 10, kind: output, shape index: {1}]   ;;  %s9511_s11 = inlined_call_operand.hbm [shape: f32[2,16,128], index: 11, kind: output, shape index: {2}]  }
   0x1   :  { %17 = sst [smem:[#allocation6]] %s9508_s8 }
   0x2   :  { %18 = vsyncpa [#allocation8], 0 }
   0x3   :  { %19 = vsyncpa [#allocation10], 0  ;;  %s4968_s19 = smov 0   ;;  %s4970_s20 = smov 0  }
   0x4   :  { %s4972_s21 = smov 0  }
   0x5 LB: > { %s3716_s8 = sadd.s32 4294967295, %s4899_s21   ;;  %s34_s22 = sadd.s32 1, %s4895_s20  ;;  %s4899_s21 = sphi %s4972_s21, %s25_s21   ;;  %s4895_s20 = sphi %s4970_s20, %s9917_s20   ;;  %s4891_s19 = sphi %s4968_s19, %s9916_s19  }
   0x6   : > { %p35_p0 = scmp.ge.s32.totalorder %s34_s22, 2  ;;  %p3721_p1 = scmp.ge.s32.totalorder %s4899_s21, 1 }
   0x7   : > { %p389_p2 = scmp.lt.s32.totalorder %s4899_s21, 3 }
   0x8   : > { %s9919_s22 = smov (%p35_p0, %s34_s22), 0 }
   0x9   : > { %p390_p3 = pnand %p3721_p1, %p389_p2 }
   0xb   : > { %393 = sbr.rel (%p390_p3) target bundleno = 1472 (0x5c0), region = 56 }
  0x10   : > { %s445_s23 = smul.u32 5, %s4891_s19  ;;  %p3724_p5 = scmp.ne.s32.totalorder %s4891_s19, 0 }
  0x12   : > { %p447_p4 = scmp.lt.s32.totalorder %s445_s23, 9  ;;  %481 = sbr.rel (%p3724_p5) target bundleno = 32 (0x20), region = 60 }
  0x14   : > { %s9921_s23 = smov (!%p447_p4, %s445_s23), 9 }
  0x15   : > { %s3832_s24 = sshll.u32 %s9921_s23, 6 }
  0x16   : > { %s4993_s27 = scalar_lea.vmem %s9500_s0, %s3832_s24 }
  0x17   : > { %v482_v0 = vld [vmem:[%s9501_s1] sm:$0xff]  ;;  %v483_v1 = vld [vmem:[%s9501_s1 + $0x8] sm:$0xff]  ;;  %v3725_v4 = vld [vmem:[%s9501_s1 + $0x10] sm:$0xff] }
  0x18   : > { %v486_v2 = vld [vmem:[%s9502_s2] sm:$0xff]  ;;  %484 = vst [vmem:[#allocation2] sm:$0xff] %v482_v0  ;;  %v487_v3 = vld [vmem:[%s9502_s2 + $0x8] sm:$0xff]  ;;  %v3726_v5 = vld [vmem:[%s9501_s1 + $0x18] sm:$0xff] }
  0x19   : > { %485 = vst [vmem:[#allocation2 + $0x8] sm:$0xff] %v483_v1  ;;  %v3727_v6 = vld [vmem:[%s9502_s2 + $0x10] sm:$0xff]  ;;  %v3728_v7 = vld [vmem:[%s9502_s2 + $0x18] sm:$0xff] }
  0x1a   : > { %488 = vst [vmem:[#allocation3 + $0x8] sm:$0xff] %v486_v2 }
  0x1b   : > { %489 = vst [vmem:[#allocation3] sm:$0xff] %v487_v3 }
  0x1c   : > { %493 = vst [vmem:[#allocation4 + $0x8] sm:$0xff] %v3725_v4 }
  0x1d   : > { %494 = vst [vmem:[#allocation4] sm:$0xff] %v3726_v5 }
  0x1e   : > { %498 = vst [vmem:[#allocation5] sm:$0xff] %v3727_v6 }
  0x1f   : > { %499 = vst [vmem:[#allocation5 + $0x8] sm:$0xff] %v3728_v7 }
  0x20 PF: > { %v560_v8 = vld [vmem:[%s9503_s3 + $0x1e0] sm:$0xff]  ;;  %v561_v9 = vld [vmem:[%s9503_s3 + $0x1e8] sm:$0xff]  ;;  %v562_v10 = vld [vmem:[%s9503_s3 + $0x1f0] sm:$0xff]  ;;  %p3821_p6 = scmp.ne.s32.totalorder %s4891_s19, 1 }
  0x21   : > { %718 = vmatpush.msra.mxu0 %v560_v8  ;;  %741 = vmatpush.msra.mxu1 %v561_v9  ;;  %v556_v11 = vld [vmem:[%s9503_s3 + $0x1c0] sm:$0xff]  ;;  %v557_v12 = vld [vmem:[%s9503_s3 + $0x1c8] sm:$0xff]  ;;  %v558_v13 = vld [vmem:[%s9503_s3 + $0x1d0] sm:$0xff]  ;;  %s3496_s19 = sld [smem:[#allocation6]] (!%p3821_p6) }
  0x22   : > { %764 = vmatpush.msra.mxu2 %v562_v10  ;;  %v552_v14 = vld [vmem:[%s9503_s3 + $0x1a0] sm:$0xff]  ;;  %v553_v15 = vld [vmem:[%s9503_s3 + $0x1a8] sm:$0xff]  ;;  %v554_v16 = vld [vmem:[%s9503_s3 + $0x1b0] sm:$0xff] }
  0x23   : > { %719 = vmatpush.msra.mxu0 %v556_v11  ;;  %742 = vmatpush.msra.mxu1 %v557_v12  ;;  %v548_v17 = vld [vmem:[%s9503_s3 + $0x180] sm:$0xff]  ;;  %v549_v18 = vld [vmem:[%s9503_s3 + $0x188] sm:$0xff]  ;;  %v550_v19 = vld [vmem:[%s9503_s3 + $0x190] sm:$0xff] }
  0x24   : > { %765 = vmatpush.msra.mxu2 %v558_v13  ;;  %v544_v20 = vld [vmem:[%s9503_s3 + $0x160] sm:$0xff]  ;;  %v545_v21 = vld [vmem:[%s9503_s3 + $0x168] sm:$0xff]  ;;  %v546_v22 = vld [vmem:[%s9503_s3 + $0x170] sm:$0xff] }
  0x25   : > { %720 = vmatpush.msra.mxu0 %v552_v14  ;;  %743 = vmatpush.msra.mxu1 %v553_v15  ;;  %v540_v23 = vld [vmem:[%s9503_s3 + $0x140] sm:$0xff]  ;;  %v541_v24 = vld [vmem:[%s9503_s3 + $0x148] sm:$0xff]  ;;  %v563_v25 = vld [vmem:[%s9503_s3 + $0x1f8] sm:$0xff] }
  0x26   : > { %766 = vmatpush.msra.mxu2 %v554_v16  ;;  %v542_v26 = vld [vmem:[%s9503_s3 + $0x150] sm:$0xff]  ;;  %v559_v27 = vld [vmem:[%s9503_s3 + $0x1d8] sm:$0xff]  ;;  %v536_v28 = vld [vmem:[%s9503_s3 + $0x120] sm:$0xff]  ;;  %787 = vmatpush.msra.mxu3 %v563_v25 }
  0x27   : > { %721 = vmatpush.msra.mxu0 %v548_v17  ;;  %744 = vmatpush.msra.mxu1 %v549_v18  ;;  %v537_v29 = vld [vmem:[%s9503_s3 + $0x128] sm:$0xff]  ;;  %v538_v30 = vld [vmem:[%s9503_s3 + $0x130] sm:$0xff]  ;;  %v555_v31 = vld [vmem:[%s9503_s3 + $0x1b8] sm:$0xff] }
  0x28   : > { %767 = vmatpush.msra.mxu2 %v550_v19  ;;  %v532_v32 = vld [vmem:[%s9503_s3 + $0x100] sm:$0xff]  ;;  %v533_v33 = vld [vmem:[%s9503_s3 + $0x108] sm:$0xff]  ;;  %788 = vmatpush.msra.mxu3 %v559_v27  ;;  %v534_v34 = vld [vmem:[%s9503_s3 + $0x110] sm:$0xff] }
  0x29   : > { %722 = vmatpush.msra.mxu0 %v544_v20  ;;  %745 = vmatpush.msra.mxu1 %v545_v21  ;;  %v551_v35 = vld [vmem:[%s9503_s3 + $0x198] sm:$0xff]  ;;  %v528_v36 = vld [vmem:[%s9503_s3 + $0xe0] sm:$0xff]  ;;  %v529_v37 = vld [vmem:[%s9503_s3 + $0xe8] sm:$0xff] }
  0x2a   : > { %768 = vmatpush.msra.mxu2 %v546_v22  ;;  %789 = vmatpush.msra.mxu3 %v555_v31  ;;  %v530_v38 = vld [vmem:[%s9503_s3 + $0xf0] sm:$0xff]  ;;  %v547_v39 = vld [vmem:[%s9503_s3 + $0x178] sm:$0xff]  ;;  %v524_v40 = vld [vmem:[%s9503_s3 + $0xc0] sm:$0xff] }
  0x2b   : > { %723 = vmatpush.msra.mxu0 %v540_v23  ;;  %746 = vmatpush.msra.mxu1 %v541_v24  ;;  %v525_v41 = vld [vmem:[%s9503_s3 + $0xc8] sm:$0xff]  ;;  %v526_v42 = vld [vmem:[%s9503_s3 + $0xd0] sm:$0xff]  ;;  %v543_v43 = vld [vmem:[%s9503_s3 + $0x158] sm:$0xff] }
  0x2c   : > { %769 = vmatpush.msra.mxu2 %v542_v26  ;;  %790 = vmatpush.msra.mxu3 %v551_v35  ;;  %v520_v44 = vld [vmem:[%s9503_s3 + $0xa0] sm:$0xff]  ;;  %v521_v45 = vld [vmem:[%s9503_s3 + $0xa8] sm:$0xff]  ;;  %v522_v46 = vld [vmem:[%s9503_s3 + $0xb0] sm:$0xff] }
  0x2d   : > { %724 = vmatpush.msra.mxu0 %v536_v28  ;;  %747 = vmatpush.msra.mxu1 %v537_v29  ;;  %v539_v47 = vld [vmem:[%s9503_s3 + $0x138] sm:$0xff]  ;;  %v516_v48 = vld [vmem:[%s9503_s3 + $0x80] sm:$0xff]  ;;  %v517_v49 = vld [vmem:[%s9503_s3 + $0x88] sm:$0xff] }
  0x2e   : > { %770 = vmatpush.msra.mxu2 %v538_v30  ;;  %791 = vmatpush.msra.mxu3 %v547_v39  ;;  %v518_v50 = vld [vmem:[%s9503_s3 + $0x90] sm:$0xff]  ;;  %v5152_v51 = vld [vmem:[%s9503_s3 + $0x118] sm:$0xff]  ;;  %v512_v52 = vld [vmem:[%s9503_s3 + $0x60] sm:$0xff] }
  0x2f   : > { %725 = vmatpush.msra.mxu0 %v532_v32  ;;  %748 = vmatpush.msra.mxu1 %v533_v33  ;;  %v513_v53 = vld [vmem:[%s9503_s3 + $0x68] sm:$0xff]  ;;  %v514_v54 = vld [vmem:[%s9503_s3 + $0x70] sm:$0xff]  ;;  %v5166_v55 = vld [vmem:[%s9503_s3 + $0xf8] sm:$0xff] }
  0x30   : > { %771 = vmatpush.msra.mxu2 %v534_v34  ;;  %792 = vmatpush.msra.mxu3 %v543_v43  ;;  %v508_v56 = vld [vmem:[%s9503_s3 + $0x40] sm:$0xff]  ;;  %v509_v57 = vld [vmem:[%s9503_s3 + $0x48] sm:$0xff]  ;;  %v510_v58 = vld [vmem:[%s9503_s3 + $0x50] sm:$0xff] }
  0x31   : > { %726 = vmatpush.msra.mxu0 %v528_v36  ;;  %749 = vmatpush.msra.mxu1 %v529_v37  ;;  %v5181_v59 = vld [vmem:[%s9503_s3 + $0xd8] sm:$0xff]  ;;  %v504_v60 = vld [vmem:[%s9503_s3 + $0x20] sm:$0xff]  ;;  %v505_v61 = vld [vmem:[%s9503_s3 + $0x28] sm:$0xff] }
  0x32   : > { %772 = vmatpush.msra.mxu2 %v530_v38  ;;  %793 = vmatpush.msra.mxu3 %v539_v47  ;;  %v506_v62 = vld [vmem:[%s9503_s3 + $0x30] sm:$0xff]  ;;  %v5196_v63 = vld [vmem:[%s9503_s3 + $0xb8] sm:$0xff]  ;;  %v500_v0 = vld [vmem:[%s9503_s3] sm:$0xff] }
  0x33   : > { %727 = vmatpush.msra.mxu0 %v524_v40  ;;  %750 = vmatpush.msra.mxu1 %v525_v41  ;;  %v501_v1 = vld [vmem:[%s9503_s3 + $0x8] sm:$0xff]  ;;  %v502_v2 = vld [vmem:[%s9503_s3 + $0x10] sm:$0xff]  ;;  %v702_v3 = vld [vmem:[#allocation2] sm:$0xff] }
  0x34   : > { %773 = vmatpush.msra.mxu2 %v526_v42  ;;  %794 = vmatpush.msra.mxu3 %v5152_v51  ;;  %v5212_v4 = vld [vmem:[%s9503_s3 + $0x98] sm:$0xff]  ;;  %v624_v5 = vld [vmem:[%s9504_s4 + $0x1e0] sm:$0xff]  ;;  %v625_v6 = vld [vmem:[%s9504_s4 + $0x1e8] sm:$0xff] }
  0x35   : > { %728 = vmatpush.msra.mxu0 %v520_v44  ;;  %751 = vmatpush.msra.mxu1 %v521_v45  ;;  %v626_v7 = vld [vmem:[%s9504_s4 + $0x1f0] sm:$0xff]  ;;  %v5226_v8 = vld [vmem:[%s9503_s3 + $0x78] sm:$0xff]  ;;  %v620_v9 = vld [vmem:[%s9504_s4 + $0x1c0] sm:$0xff] }
  0x36   : > { %774 = vmatpush.msra.mxu2 %v522_v46  ;;  %795 = vmatpush.msra.mxu3 %v5166_v55  ;;  %v5235_v10 = vld [vmem:[%s9504_s4 + $0x1c8] sm:$0xff]  ;;  %v5240_v11 = vld [vmem:[%s9504_s4 + $0x1d0] sm:$0xff]  ;;  %v5245_v12 = vld [vmem:[%s9503_s3 + $0x58] sm:$0xff] }
  0x37   : > { %729 = vmatpush.msra.mxu0 %v516_v48  ;;  %752 = vmatpush.msra.mxu1 %v517_v49  ;;  %v5250_v13 = vld [vmem:[%s9504_s4 + $0x1a0] sm:$0xff]  ;;  %v5256_v14 = vld [vmem:[%s9504_s4 + $0x1a8] sm:$0xff]  ;;  %v5261_v15 = vld [vmem:[%s9504_s4 + $0x1b0] sm:$0xff] }
  0x38   : > { %775 = vmatpush.msra.mxu2 %v518_v50  ;;  %796 = vmatpush.msra.mxu3 %v5181_v59  ;;  %v703_v16 = vld [vmem:[#allocation2 + $0x8] sm:$0xff]  ;;  %v5266_v17 = vld [vmem:[%s9503_s3 + $0x38] sm:$0xff]  ;;  %v5282_v19 = vld [vmem:[%s9504_s4 + $0x180] sm:$0xff] }
  0x39   : > { %730 = vmatpush.msra.mxu0 %v512_v52  ;;  %753 = vmatpush.msra.mxu1 %v513_v53  ;;  %v5275_v18 = vld [vmem:[%s9503_s3 + $0x18] sm:$0xff]  ;;  %v5288_v20 = vld [vmem:[%s9504_s4 + $0x188] sm:$0xff]  ;;  %v5298_v22 = vld [vmem:[%s9504_s4 + $0x190] sm:$0xff] }
  0x3a   : > { %776 = vmatpush.msra.mxu2 %v514_v54  ;;  %797 = vmatpush.msra.mxu3 %v5196_v63  ;;  %v5293_v21 = vld [vmem:[%s9504_s4 + $0x1f8] sm:$0xff]  ;;  %v5305_v23 = vld [vmem:[%s9504_s4 + $0x160] sm:$0xff]  ;;  %v5310_v24 = vld [vmem:[%s9504_s4 + $0x168] sm:$0xff] }
  0x3b   : > { %731 = vmatpush.msra.mxu0 %v508_v56  ;;  %754 = vmatpush.msra.mxu1 %v509_v57  ;;  %v5315_v25 = vld [vmem:[%s9504_s4 + $0x1d8] sm:$0xff]  ;;  %v5321_v26 = vld [vmem:[%s9504_s4 + $0x170] sm:$0xff]  ;;  %v5328_v27 = vld [vmem:[%s9504_s4 + $0x140] sm:$0xff] }
  0x3c   : > { %777 = vmatpush.msra.mxu2 %v510_v58  ;;  %798 = vmatpush.msra.mxu3 %v5212_v4  ;;  %v5333_v28 = vld [vmem:[%s9504_s4 + $0x148] sm:$0xff]  ;;  %v5338_v29 = vld [vmem:[%s9504_s4 + $0x1b8] sm:$0xff]  ;;  %v5345_v30 = vld [vmem:[%s9504_s4 + $0x150] sm:$0xff] }
  0x3d   : > { %732 = vmatpush.msra.mxu0 %v504_v60  ;;  %755 = vmatpush.msra.mxu1 %v505_v61  ;;  %v5352_v31 = vld [vmem:[%s9504_s4 + $0x120] sm:$0xff]  ;;  %v5357_v32 = vld [vmem:[%s9504_s4 + $0x128] sm:$0xff]  ;;  %v5362_v33 = vld [vmem:[%s9504_s4 + $0x198] sm:$0xff] }
  0x3e   : > { %778 = vmatpush.msra.mxu2 %v506_v62  ;;  %799 = vmatpush.msra.mxu3 %v5226_v8  ;;  %v5369_v34 = vld [vmem:[%s9504_s4 + $0x130] sm:$0xff]  ;;  %v5376_v35 = vld [vmem:[%s9504_s4 + $0x100] sm:$0xff]  ;;  %v5381_v36 = vld [vmem:[%s9504_s4 + $0x178] sm:$0xff] }
  0x3f   : > { %733 = vmatpush.msra.mxu0 %v500_v0  ;;  %756 = vmatpush.msra.mxu1 %v501_v1  ;;  %9619 = vst [vmem:[#allocation13_spill] sm:$0xff] %v5376_v35  ;;  %v5388_v37 = vld [vmem:[%s9504_s4 + $0x108] sm:$0xff]  ;;  %v5395_v38 = vld [vmem:[%s9504_s4 + $0x110] sm:$0xff]  ;;  %v5400_v39 = vld [vmem:[%s9504_s4 + $0xe0] sm:$0xff] }
  0x40   : > { %779 = vmatpush.msra.mxu2 %v502_v2  ;;  %734 = vmatmul.f32.vlgmr.msra.gmra.mxu0 %v702_v3  ;;  %9620 = vst [vmem:[#allocation14_spill] sm:$0xff] %v5388_v37  ;;  %v5405_v40 = vld [vmem:[%s9504_s4 + $0x158] sm:$0xff]  ;;  %v5411_v41 = vld [vmem:[%s9504_s4 + $0xe8] sm:$0xff]  ;;  %v5418_v42 = vld [vmem:[%s9504_s4 + $0xf0] sm:$0xff] }
  0x41   : > { %757 = vmatmul.f32.vlgmr.msra.gmra.mxu1 %v702_v3  ;;  %780 = vmatmul.f32.vlgmr.msra.gmra.mxu2 %v702_v3  ;;  %9621 = vst [vmem:[#allocation15_spill] sm:$0xff] %v5395_v38  ;;  %v5423_v43 = vld [vmem:[%s9504_s4 + $0x138] sm:$0xff]  ;;  %v5446_v46 = vld [vmem:[%s9504_s4 + $0xc0] sm:$0xff]  ;;  %v5451_v47 = vld [vmem:[%s9504_s4 + $0xc8] sm:$0xff] }
  0x42   : > { %944 = vmatpush.msrb.mxu0 %v624_v5  ;;  %967 = vmatpush.msrb.mxu1 %v625_v6  ;;  %9622 = vst [vmem:[#allocation16_spill] sm:$0xff] %v5400_v39  ;;  %v5432_v44 = vld [vmem:[%s9504_s4 + $0x118] sm:$0xff]  ;;  %v5458_v48 = vld [vmem:[%s9504_s4 + $0xd0] sm:$0xff]  ;;  %v5470_v50 = vld [vmem:[%s9504_s4 + $0xa0] sm:$0xff] }
  0x43   : > { %990 = vmatpush.msrb.mxu2 %v626_v7  ;;  %800 = vmatpush.msra.mxu3 %v5245_v12  ;;  %9623 = vst [vmem:[#allocation17_spill] sm:$0xff] %v5411_v41  ;;  %v5439_v45 = vld [vmem:[%s9504_s4 + $0xf8] sm:$0xff]  ;;  %v5475_v52 = vld [vmem:[%s9504_s4 + $0xa8] sm:$0xff]  ;;  %v5480_v53 = vld [vmem:[%s9504_s4 + $0xb0] sm:$0xff] }
  0x44   : > { %945 = vmatpush.msrb.mxu0 %v620_v9  ;;  %968 = vmatpush.msrb.mxu1 %v5235_v10  ;;  %9624 = vst [vmem:[#allocation18_spill] sm:$0xff] %v5418_v42  ;;  %v5463_v49 = vld [vmem:[%s9504_s4 + $0xd8] sm:$0xff]  ;;  %v5494_v56 = vld [vmem:[%s9504_s4 + $0x80] sm:$0xff]  ;;  %v5499_v57 = vld [vmem:[%s9504_s4 + $0x88] sm:$0xff] }
  0x45   : > { %991 = vmatpush.msrb.mxu2 %v5240_v11  ;;  %801 = vmatpush.msra.mxu3 %v5266_v17  ;;  %9625 = vst [vmem:[#allocation19_spill] sm:$0xff] %v5423_v43  ;;  %v5487_v54 = vld [vmem:[%s9504_s4 + $0xb8] sm:$0xff]  ;;  %v5504_v58 = vld [vmem:[%s9504_s4 + $0x90] sm:$0xff]  ;;  %v5518_v61 = vld [vmem:[%s9504_s4 + $0x60] sm:$0xff] }
  0x46   : > { %946 = vmatpush.msrb.mxu0 %v5250_v13  ;;  %969 = vmatpush.msrb.mxu1 %v5256_v14  ;;  %9626 = vst [vmem:[#allocation20_spill] sm:$0xff] %v5432_v44  ;;  %v5511_v60 = vld [vmem:[%s9504_s4 + $0x98] sm:$0xff]  ;;  %v5523_v62 = vld [vmem:[%s9504_s4 + $0x68] sm:$0xff]  ;;  %v5530_v0 = vld [vmem:[%s9504_s4 + $0x70] sm:$0xff] }
  0x47   : > { %992 = vmatpush.msrb.mxu2 %v5261_v15  ;;  %802 = vmatpush.msra.mxu3 %v5275_v18  ;;  %9627 = vst [vmem:[#allocation21_spill] sm:$0xff] %v5439_v45  ;;  %v5535_v1 = vld [vmem:[%s9504_s4 + $0x78] sm:$0xff]  ;;  %v5542_v2 = vld [vmem:[%s9504_s4 + $0x40] sm:$0xff]  ;;  %v5552_v5 = vld [vmem:[%s9504_s4 + $0x50] sm:$0xff] }
  0x48   : > { %737 = vmatmul.f32.gmra.mxu0 %v703_v16  ;;  %803 = vmatmul.f32.vlgmr.msra.gmra.mxu3 %v702_v3  ;;  %9628 = vst [vmem:[#allocation22_spill] sm:$0xff] %v5446_v46  ;;  %v5547_v3 = vld [vmem:[%s9504_s4 + $0x48] sm:$0xff]  ;;  %v5559_v6 = vld [vmem:[%s9504_s4 + $0x58] sm:$0xff]  ;;  %v5566_v7 = vld [vmem:[%s9504_s4 + $0x20] sm:$0xff] }
  0x49   : > { %760 = vmatmul.f32.gmra.mxu1 %v703_v16  ;;  %783 = vmatmul.f32.gmra.mxu2 %v703_v16  ;;  %9629 = vst [vmem:[#allocation23_spill] sm:$0xff] %v5451_v47  ;;  %v5571_v9 = vld [vmem:[%s9504_s4 + $0x28] sm:$0xff] }
  0x4a   : > { %947 = vmatpush.msrb.mxu0 %v5282_v19  ;;  %970 = vmatpush.msrb.mxu1 %v5288_v20  ;;  %9630 = vst [vmem:[#allocation24_spill] sm:$0xff] %v5458_v48 }
  0x4b   : > { %1013 = vmatpush.msrb.mxu3 %v5293_v21  ;;  %993 = vmatpush.msrb.mxu2 %v5298_v22  ;;  %9631 = vst [vmem:[#allocation25_spill] sm:$0xff] %v5463_v49 }
  0x4c   : > { %948 = vmatpush.msrb.mxu0 %v5305_v23  ;;  %971 = vmatpush.msrb.mxu1 %v5310_v24  ;;  %9632 = vst [vmem:[#allocation26_spill] sm:$0xff] %v5470_v50 }
  0x4d   : > { %1014 = vmatpush.msrb.mxu3 %v5315_v25  ;;  %994 = vmatpush.msrb.mxu2 %v5321_v26  ;;  %9633 = vst [vmem:[#allocation27_spill] sm:$0xff] %v5475_v52 }
  0x4e   : > { %949 = vmatpush.msrb.mxu0 %v5328_v27  ;;  %972 = vmatpush.msrb.mxu1 %v5333_v28  ;;  %9634 = vst [vmem:[#allocation28_spill] sm:$0xff] %v5480_v53 }
  0x4f   : > { %1015 = vmatpush.msrb.mxu3 %v5338_v29  ;;  %995 = vmatpush.msrb.mxu2 %v5345_v30  ;;  %9635 = vst [vmem:[#allocation29_spill] sm:$0xff] %v5487_v54 }
  0x50   : > { %950 = vmatpush.msrb.mxu0 %v5352_v31  ;;  %973 = vmatpush.msrb.mxu1 %v5357_v32  ;;  %9636 = vst [vmem:[#allocation30_spill] sm:$0xff] %v5494_v56 }
  0x51   : > { %1016 = vmatpush.msrb.mxu3 %v5362_v33  ;;  %996 = vmatpush.msrb.mxu2 %v5369_v34  ;;  %9637 = vst [vmem:[#allocation31_spill] sm:$0xff] %v5499_v57 }
  0x52   : > { %806 = vmatmul.f32.gmra.mxu3 %v703_v16  ;;  %951 = vmatpush.msrb.mxu0 %v5376_v35  ;;  %9638 = vst [vmem:[#allocation32_spill] sm:$0xff] %v5504_v58  ;;  %v5576_v16 = vld [vmem:[%s9504_s4 + $0x30] sm:$0xff] }
  0x53   : > { %1017 = vmatpush.msrb.mxu3 %v5381_v36  ;;  %974 = vmatpush.msrb.mxu1 %v5388_v37  ;;  %9639 = vst [vmem:[#allocation33_spill] sm:$0xff] %v5511_v60 }
  0x54   : > { %997 = vmatpush.msrb.mxu2 %v5395_v38  ;;  %952 = vmatpush.msrb.mxu0 %v5400_v39  ;;  %9640 = vst [vmem:[#allocation34_spill] sm:$0xff] %v5518_v61 }
  0x55   : > { %1018 = vmatpush.msrb.mxu3 %v5405_v40  ;;  %975 = vmatpush.msrb.mxu1 %v5411_v41  ;;  %9641 = vst [vmem:[#allocation35_spill] sm:$0xff] %v5523_v62 }
  0x56   : > { %998 = vmatpush.msrb.mxu2 %v5418_v42  ;;  %953 = vmatpush.msrb.mxu0 %v5446_v46  ;;  %9642 = vst [vmem:[#allocation36_spill] sm:$0xff] %v5530_v0 }
  0x57   : > { %1019 = vmatpush.msrb.mxu3 %v5423_v43  ;;  %976 = vmatpush.msrb.mxu1 %v5451_v47  ;;  %9643 = vst [vmem:[#allocation37_spill] sm:$0xff] %v5535_v1 }
  0x58   : > { %999 = vmatpush.msrb.mxu2 %v5458_v48  ;;  %954 = vmatpush.msrb.mxu0 %v5470_v50  ;;  %9644 = vst [vmem:[#allocation38_spill] sm:$0xff] %v5542_v2 }
  0x59   : > { %1020 = vmatpush.msrb.mxu3 %v5432_v44  ;;  %977 = vmatpush.msrb.mxu1 %v5475_v52  ;;  %9645 = vst [vmem:[#allocation39_spill] sm:$0xff] %v5547_v3 }
  0x5a   : > { %1000 = vmatpush.msrb.mxu2 %v5480_v53  ;;  %955 = vmatpush.msrb.mxu0 %v5494_v56  ;;  %9646 = vst [vmem:[#allocation40_spill] sm:$0xff] %v5552_v5  ;;  %v715_v56 = vld [vmem:[%s4993_s27 + $0x28] sm:$0xff] }
  0x5b   : > { %1021 = vmatpush.msrb.mxu3 %v5439_v45  ;;  %978 = vmatpush.msrb.mxu1 %v5499_v57  ;;  %9647 = vst [vmem:[#allocation41_spill] sm:$0xff] %v5559_v6  ;;  %v714_v57 = vld [vmem:[%s4993_s27 + $0x20] sm:$0xff] }
  0x5c   : > { %1001 = vmatpush.msrb.mxu2 %v5504_v58  ;;  %956 = vmatpush.msrb.mxu0 %v5518_v61  ;;  %9648 = vst [vmem:[#allocation42_spill] sm:$0xff] %v5566_v7  ;;  %v712_v58 = vld [vmem:[%s4993_s27 + $0x10] sm:$0xff] }
  0x5d   : > { %1022 = vmatpush.msrb.mxu3 %v5463_v49  ;;  %979 = vmatpush.msrb.mxu1 %v5523_v62  ;;  %9649 = vst [vmem:[#allocation43_spill] sm:$0xff] %v5571_v9 }
  0x5e   : > { %1002 = vmatpush.msrb.mxu2 %v5530_v0  ;;  %957 = vmatpush.msrb.mxu0 %v5542_v2  ;;  %9650 = vst [vmem:[#allocation44_spill] sm:$0xff] %v5576_v16  ;;  %v5646_v2 = vld [vmem:[%s9505_s5 + $0x1d0] sm:$0xff]  ;;  %v711_v0 = vld [vmem:[%s4993_s27 + $0x8] sm:$0xff] }
  0x5f   : > { %1023 = vmatpush.msrb.mxu3 %v5487_v54  ;;  %980 = vmatpush.msrb.mxu1 %v5547_v3  ;;  %v5617_v3 = vld [vmem:[%s9505_s5 + $0x1e8] sm:$0xff]  ;;  %9662 = vst [vmem:[#allocation56_spill] sm:$0xff] %v5646_v2 }
  0x60   : > { %1003 = vmatpush.msrb.mxu2 %v5552_v5  ;;  %958 = vmatpush.msrb.mxu0 %v5566_v7  ;;  %v5590_v5 = vld [vmem:[%s9504_s4] sm:$0xff]  ;;  %v5595_v7 = vld [vmem:[%s9504_s4 + $0x8] sm:$0xff]  ;;  %9657 = vst [vmem:[#allocation51_spill] sm:$0xff] %v5617_v3 }
  0x61   : > { %1024 = vmatpush.msrb.mxu3 %v5511_v60  ;;  %981 = vmatpush.msrb.mxu1 %v5571_v9  ;;  %9652 = vst [vmem:[#allocation46_spill] sm:$0xff] %v5590_v5  ;;  %v5600_v9 = vld [vmem:[%s9504_s4 + $0x10] sm:$0xff] }
  0x62   : > { %1004 = vmatpush.msrb.mxu2 %v5576_v16  ;;  %9653 = vst [vmem:[#allocation47_spill] sm:$0xff] %v5595_v7  ;;  %959 = vmatpush.msrb.mxu0 %v5590_v5  ;;  %v5612_v16 = vld [vmem:[%s9505_s5 + $0x1e0] sm:$0xff]  ;;  %v5629_v5 = vld [vmem:[%s9505_s5 + $0x1f8] sm:$0xff] }
  0x63   : > { %1025 = vmatpush.msrb.mxu3 %v5535_v1  ;;  %9654 = vst [vmem:[#allocation48_spill] sm:$0xff] %v5600_v9  ;;  %982 = vmatpush.msrb.mxu1 %v5595_v7  ;;  %v5624_v7 = vld [vmem:[%s9505_s5 + $0x1f0] sm:$0xff]  ;;  %v710_v1 = vld [vmem:[%s4993_s27] sm:$0xff] }
  0x64   : > { %9656 = vst [vmem:[#allocation50_spill] sm:$0xff] %v5612_v16  ;;  %1005 = vmatpush.msrb.mxu2 %v5600_v9  ;;  %1036 = vmatpush.msra.mxu0 %v5612_v16  ;;  %v5636_v9 = vld [vmem:[%s9505_s5 + $0x1c0] sm:$0xff] }
  0x65   : > { %1026 = vmatpush.msrb.mxu3 %v5559_v6  ;;  %v5583_v6 = vld [vmem:[%s9504_s4 + $0x38] sm:$0xff]  ;;  %9658 = vst [vmem:[#allocation52_spill] sm:$0xff] %v5624_v7  ;;  %1059 = vmatpush.msra.mxu1 %v5617_v3  ;;  %v5660_v16 = vld [vmem:[%s9505_s5 + $0x1a0] sm:$0xff] }
  0x66   : > { %9651 = vst [vmem:[#allocation45_spill] sm:$0xff] %v5583_v6  ;;  %1082 = vmatpush.msra.mxu2 %v5624_v7  ;;  %v5653_v3 = vld [vmem:[%s9505_s5 + $0x1d8] sm:$0xff]  ;;  %1037 = vmatpush.msra.mxu0 %v5636_v9  ;;  %v5665_v7 = vld [vmem:[%s9505_s5 + $0x1a8] sm:$0xff] }
  0x67   : > { %1027 = vmatpush.msrb.mxu3 %v5583_v6  ;;  %v5607_v6 = vld [vmem:[%s9504_s4 + $0x18] sm:$0xff]  ;;  %9659 = vst [vmem:[#allocation53_spill] sm:$0xff] %v5629_v5 }
  0x68   : > { %9655 = vst [vmem:[#allocation49_spill] sm:$0xff] %v5607_v6  ;;  %1083 = vmatpush.msra.mxu2 %v5646_v2  ;;  %1038 = vmatpush.msra.mxu0 %v5660_v16  ;;  %v5689_v2 = vld [vmem:[%s9505_s5 + $0x188] sm:$0xff] }
  0x69   : > { %1028 = vmatpush.msrb.mxu3 %v5607_v6  ;;  %9660 = vst [vmem:[#allocation54_spill] sm:$0xff] %v5636_v9  ;;  %v5641_v6 = vld [vmem:[%s9505_s5 + $0x1c8] sm:$0xff]  ;;  %v5684_v9 = vld [vmem:[%s9505_s5 + $0x180] sm:$0xff] }
  0x6a   : > { %9661 = vst [vmem:[#allocation55_spill] sm:$0xff] %v5641_v6  ;;  %1060 = vmatpush.msra.mxu1 %v5641_v6  ;;  %v5677_v6 = vld [vmem:[%s9505_s5 + $0x1b8] sm:$0xff]  ;;  %1039 = vmatpush.msra.mxu0 %v5684_v9 }
  0x6b   : > { %1105 = vmatpush.msra.mxu3 %v5629_v5  ;;  %9663 = vst [vmem:[#allocation57_spill] sm:$0xff] %v5653_v3  ;;  %v5670_v5 = vld [vmem:[%s9505_s5 + $0x1b0] sm:$0xff] }
  0x6c   : > { %9664 = vst [vmem:[#allocation58_spill] sm:$0xff] %v5660_v16  ;;  %1061 = vmatpush.msra.mxu1 %v5665_v7  ;;  %1084 = vmatpush.msra.mxu2 %v5670_v5  ;;  %v5708_v16 = vld [vmem:[%s9505_s5 + $0x160] sm:$0xff] }
  0x6d   : > { %9665 = vst [vmem:[#allocation59_spill] sm:$0xff] %v5665_v7  ;;  %1106 = vmatpush.msra.mxu3 %v5653_v3  ;;  %v5694_v3 = vld [vmem:[%s9505_s5 + $0x190] sm:$0xff]  ;;  %v5701_v7 = vld [vmem:[%s9505_s5 + $0x198] sm:$0xff]  ;;  %1040 = vmatpush.msra.mxu0 %v5708_v16 }
  0x6e   : > { %9666 = vst [vmem:[#allocation60_spill] sm:$0xff] %v5670_v5  ;;  %1062 = vmatpush.msra.mxu1 %v5689_v2  ;;  %v5713_v5 = vld [vmem:[%s9505_s5 + $0x168] sm:$0xff]  ;;  %1085 = vmatpush.msra.mxu2 %v5694_v3 }
  0x6f   : > { %9667 = vst [vmem:[#allocation61_spill] sm:$0xff] %v5677_v6  ;;  %1107 = vmatpush.msra.mxu3 %v5677_v6  ;;  %v5742_v6 = vld [vmem:[%s9505_s5 + $0x150] sm:$0xff] }
  0x70   : > { %9668 = vst [vmem:[#allocation62_spill] sm:$0xff] %v5684_v9  ;;  %v5720_v9 = vld [vmem:[%s9505_s5 + $0x170] sm:$0xff]  ;;  %1063 = vmatpush.msra.mxu1 %v5713_v5 }
  0x71   : > { %9669 = vst [vmem:[#allocation63_spill] sm:$0xff] %v5689_v2  ;;  %1108 = vmatpush.msra.mxu3 %v5701_v7  ;;  %v5725_v2 = vld [vmem:[%s9505_s5 + $0x178] sm:$0xff]  ;;  %1086 = vmatpush.msra.mxu2 %v5720_v9 }
  0x72   : > { %9670 = vst [vmem:[#allocation64_spill] sm:$0xff] %v5694_v3  ;;  %v5732_v3 = vld [vmem:[%s9505_s5 + $0x140] sm:$0xff] }
  0x73   : > { %9671 = vst [vmem:[#allocation65_spill] sm:$0xff] %v5701_v7  ;;  %v5737_v7 = vld [vmem:[%s9505_s5 + $0x148] sm:$0xff]  ;;  %1109 = vmatpush.msra.mxu3 %v5725_v2  ;;  %1041 = vmatpush.msra.mxu0 %v5732_v3 }
  0x74   : > { %9672 = vst [vmem:[#allocation66_spill] sm:$0xff] %v5708_v16  ;;  %1064 = vmatpush.msra.mxu1 %v5737_v7  ;;  %v5756_v16 = vld [vmem:[%s9505_s5 + $0x120] sm:$0xff]  ;;  %1087 = vmatpush.msra.mxu2 %v5742_v6 }
  0x75   : > { %9673 = vst [vmem:[#allocation67_spill] sm:$0xff] %v5713_v5  ;;  %v5749_v5 = vld [vmem:[%s9505_s5 + $0x158] sm:$0xff]  ;;  %1042 = vmatpush.msra.mxu0 %v5756_v16 }
  0x76   : > { %9674 = vst [vmem:[#allocation68_spill] sm:$0xff] %v5720_v9  ;;  %v5761_v9 = vld [vmem:[%s9505_s5 + $0x128] sm:$0xff]  ;;  %1110 = vmatpush.msra.mxu3 %v5749_v5 }
  0x77   : > { %9675 = vst [vmem:[#allocation69_spill] sm:$0xff] %v5725_v2  ;;  %v5766_v2 = vld [vmem:[%s9505_s5 + $0x130] sm:$0xff]  ;;  %1065 = vmatpush.msra.mxu1 %v5761_v9 }
  0x78   : > { %9676 = vst [vmem:[#allocation70_spill] sm:$0xff] %v5732_v3  ;;  %v5781_v3 = vld [vmem:[%s9505_s5 + $0x100] sm:$0xff]  ;;  %1088 = vmatpush.msra.mxu2 %v5766_v2 }
  0x79   : > { %9677 = vst [vmem:[#allocation71_spill] sm:$0xff] %v5737_v7  ;;  %v5774_v7 = vld [vmem:[%s9505_s5 + $0x138] sm:$0xff]  ;;  %1043 = vmatpush.msra.mxu0 %v5781_v3 }
  0x7a   : > { %9678 = vst [vmem:[#allocation72_spill] sm:$0xff] %v5742_v6  ;;  %v5786_v6 = vld [vmem:[%s9505_s5 + $0x108] sm:$0xff]  ;;  %1111 = vmatpush.msra.mxu3 %v5774_v7 }
  0x7b   : > { %9679 = vst [vmem:[#allocation73_spill] sm:$0xff] %v5749_v5  ;;  %v5791_v5 = vld [vmem:[%s9505_s5 + $0x110] sm:$0xff]  ;;  %1066 = vmatpush.msra.mxu1 %v5786_v6 }
  0x7c   : > { %9680 = vst [vmem:[#allocation74_spill] sm:$0xff] %v5756_v16  ;;  %1089 = vmatpush.msra.mxu2 %v5791_v5 }
  0x7d   : > { %9681 = vst [vmem:[#allocation75_spill] sm:$0xff] %v5761_v9  ;;  %v5799_v9 = vld [vmem:[%s9505_s5 + $0x118] sm:$0xff] }
  0x7e   : > { %9682 = vst [vmem:[#allocation76_spill] sm:$0xff] %v5766_v2  ;;  %1112 = vmatpush.msra.mxu3 %v5799_v9 }
  0x7f   : > { %9683 = vst [vmem:[#allocation77_spill] sm:$0xff] %v5774_v7 }
  0x80   : > { %9684 = vst [vmem:[#allocation78_spill] sm:$0xff] %v5781_v3  ;;  %v5811_v3 = vld [vmem:[%s9505_s5 + $0xe0] sm:$0xff] }
  0x81   : > { %9685 = vst [vmem:[#allocation79_spill] sm:$0xff] %v5786_v6  ;;  %1044 = vmatpush.msra.mxu0 %v5811_v3 }
  0x82   : > { %9686 = vst [vmem:[#allocation80_spill] sm:$0xff] %v5791_v5 }
  0x83   : > { %9687 = vst [vmem:[#allocation81_spill] sm:$0xff] %v5799_v9  ;;  %v5986_v9 = vld [vmem:[%s9505_s5 + $0x38] sm:$0xff] }
  0x84   : > { %9688 = vst [vmem:[#allocation82_spill] sm:$0xff] %v5811_v3 }
  0x85   : > { %9715 = vst [vmem:[#allocation109_spill] sm:$0xff] %v5986_v9 }
  0xbd   : > { %v735_v16 = vpop.f32.mrf.mxu0 }
  0xbe   : > { %v810_v62 = vadd.f32 %v735_v16, %v710_v1  ;;  %v758_v61 = vpop.f32.mrf.mxu1  ;;  %v5816_v1 = vld [vmem:[%s9505_s5 + $0xe8] sm:$0xff] }
  0xbf   : > { %v811_v2 = vadd.f32 %v758_v61, %v711_v0  ;;  %9689 = vst [vmem:[#allocation83_spill] sm:$0xff] %v5816_v1  ;;  %v5821_v61 = vld [vmem:[%s9505_s5 + $0xf0] sm:$0xff]  ;;  %1067 = vmatpush.msra.mxu1 %v5816_v1  ;;  %v5828_v0 = vld [vmem:[%s9505_s5 + $0xf8] sm:$0xff] }
  0xc0   : > { %v3729_v60 = vmul.f32 -1.442695, %v810_v62  ;;  %9690 = vst [vmem:[#allocation84_spill] sm:$0xff] %v5821_v61  ;;  %1090 = vmatpush.msra.mxu2 %v5821_v61  ;;  %1113 = vmatpush.msra.mxu3 %v5828_v0 }
  0xc1   : > { %v3730_v7 = vmul.f32 -1.442695, %v811_v2  ;;  %9691 = vst [vmem:[#allocation85_spill] sm:$0xff] %v5828_v0 }
  0xc2   : > { %3873 = vpow2.f32 %v3729_v60 }
  0xc3   : > { %3875 = vpow2.f32 %v3730_v7 }
  0xc4   : > { %v781_v54 = vpop.f32.mrf.mxu2 }
  0xc5   : > { %v812_v60 = vadd.f32 %v781_v54, %v712_v58  ;;  %v738_v62 = vpop.f32.mrf.mxu0  ;;  %v5835_v54 = vld [vmem:[%s9505_s5 + $0xc0] sm:$0xff]  ;;  %v5840_v58 = vld [vmem:[%s9505_s5 + $0xc8] sm:$0xff] }
  0xc6   : > { %v814_v2 = vadd.f32 %v738_v62, %v714_v57  ;;  %v761_v7 = vpop.f32.mrf.mxu1  ;;  %9692 = vst [vmem:[#allocation86_spill] sm:$0xff] %v5835_v54  ;;  %1045 = vmatpush.msra.mxu0 %v5835_v54  ;;  %1068 = vmatpush.msra.mxu1 %v5840_v58  ;;  %v5847_v57 = vld [vmem:[%s9505_s5 + $0xd0] sm:$0xff]  ;;  %v5852_v62 = vld [vmem:[%s9505_s5 + $0xd8] sm:$0xff] }
  0xc7   : > { %9693 = vst [vmem:[#allocation87_spill] sm:$0xff] %v5840_v58  ;;  %v3731_v16 = vmul.f32 -1.442695, %v812_v60  ;;  %v815_v1 = vadd.f32 %v761_v7, %v715_v56  ;;  %1091 = vmatpush.msra.mxu2 %v5847_v57  ;;  %1114 = vmatpush.msra.mxu3 %v5852_v62  ;;  %v5859_v56 = vld [vmem:[%s9505_s5 + $0xa0] sm:$0xff]  ;;  %v5864_v60 = vld [vmem:[%s9505_s5 + $0xa8] sm:$0xff]  ;;  %v5869_v7 = vld [vmem:[%s9505_s5 + $0xb0] sm:$0xff] }
  0xc8   : > { %9694 = vst [vmem:[#allocation88_spill] sm:$0xff] %v5847_v57  ;;  %v3874_v0 = vpop.eup %3873  ;;  %v3732_v61 = vmul.f32 -1.442695, %v814_v2  ;;  %v716_v57 = vld [vmem:[%s4993_s27 + $0x30] sm:$0xff]  ;;  %1046 = vmatpush.msra.mxu0 %v5859_v56  ;;  %1069 = vmatpush.msra.mxu1 %v5864_v60  ;;  %v5879_v54 = vld [vmem:[%s9505_s5 + $0xb8] sm:$0xff] }
  0xc9   : > { %9695 = vst [vmem:[#allocation89_spill] sm:$0xff] %v5852_v62  ;;  %v3876_v2 = vpop.eup %3875  ;;  %v5871_v58 = vadd.f32 1.0, %v3874_v0  ;;  %3877 = vpow2.f32 %v3731_v16  ;;  %v3733_v62 = vmul.f32 -1.442695, %v815_v1  ;;  %1092 = vmatpush.msra.mxu2 %v5869_v7  ;;  %1115 = vmatpush.msra.mxu3 %v5879_v54  ;;  %v5888_v1 = vld [vmem:[%s9505_s5 + $0x80] sm:$0xff]  ;;  %v5893_v0 = vld [vmem:[%s9505_s5 + $0x88] sm:$0xff] }
  0xca   : > { %9696 = vst [vmem:[#allocation90_spill] sm:$0xff] %v5859_v56  ;;  %v5881_v3 = vadd.f32 1.0, %v3876_v2  ;;  %3879 = vpow2.f32 %v3732_v61  ;;  %v5898_v16 = vld [vmem:[%s9505_s5 + $0x90] sm:$0xff]  ;;  %1047 = vmatpush.msra.mxu0 %v5888_v1  ;;  %1070 = vmatpush.msra.mxu1 %v5893_v0  ;;  %v5906_v61 = vld [vmem:[%s9505_s5 + $0x98] sm:$0xff] }
  0xcb   : > { %9697 = vst [vmem:[#allocation91_spill] sm:$0xff] %v5864_v60  ;;  %3881 = vrcp.f32 %v5871_v58  ;;  %1093 = vmatpush.msra.mxu2 %v5898_v16  ;;  %1116 = vmatpush.msra.mxu3 %v5906_v61  ;;  %v804_v60 = vpop.f32.mrf.mxu3  ;;  %v851_v53 = vand.u32 2147483647, %v5871_v58  ;;  %vm847_vm1 = vweird.f32 %v5871_v58 }
  0xcc   : > { %9698 = vst [vmem:[#allocation92_spill] sm:$0xff] %v5869_v7  ;;  %3883 = vrcp.f32 %v5881_v3  ;;  %v784_v2 = vpop.f32.mrf.mxu2  ;;  %v868_v50 = vand.u32 2147483648, %v5881_v3  ;;  %vm862_vm3 = vweird.f32 %v5881_v3 }
  0xcd   : > { %9699 = vst [vmem:[#allocation93_spill] sm:$0xff] %v5879_v54  ;;  %v5914_v54 = vld [vmem:[%s9505_s5 + $0x60] sm:$0xff]  ;;  %3885 = vpow2.f32 %v3733_v62  ;;  %v816_v7 = vadd.f32 %v784_v2, %v716_v57  ;;  %v5944_v57 = vld [vmem:[%s9505_s5 + $0x48] sm:$0xff]  ;;  %v5949_v2 = vld [vmem:[%s9505_s5 + $0x50] sm:$0xff]  ;;  %vm6035_vm4 = vcmp.eq.f32.partialorder %v851_v53, 8.507059e+37 }
  0xce   : > { %9700 = vst [vmem:[#allocation94_spill] sm:$0xff] %v5888_v1  ;;  %v5924_v1 = vld [vmem:[%s9505_s5 + $0x70] sm:$0xff]  ;;  %1048 = vmatpush.msra.mxu0 %v5914_v54  ;;  %v5939_v62 = vld [vmem:[%s9505_s5 + $0x40] sm:$0xff] }
  0xcf   : > { %9701 = vst [vmem:[#allocation95_spill] sm:$0xff] %v5893_v0  ;;  %v5919_v0 = vld [vmem:[%s9505_s5 + $0x68] sm:$0xff]  ;;  %1094 = vmatpush.msra.mxu2 %v5924_v1 }
  0xd0   : > { %9702 = vst [vmem:[#allocation96_spill] sm:$0xff] %v5898_v16  ;;  %v713_v16 = vld [vmem:[%s4993_s27 + $0x18] sm:$0xff]  ;;  %1071 = vmatpush.msra.mxu1 %v5919_v0  ;;  %1049 = vmatpush.msra.mxu0 %v5939_v62 }
  0xd1   : > { %9703 = vst [vmem:[#allocation97_spill] sm:$0xff] %v5906_v61  ;;  %v5932_v61 = vld [vmem:[%s9505_s5 + $0x78] sm:$0xff]  ;;  %1095 = vmatpush.msra.mxu2 %v5949_v2 }
  0xd2   : > { %9704 = vst [vmem:[#allocation98_spill] sm:$0xff] %v5914_v54  ;;  %1117 = vmatpush.msra.mxu3 %v5932_v61  ;;  %v3734_v54 = vmul.f32 -1.442695, %v816_v7  ;;  %1072 = vmatpush.msra.mxu1 %v5944_v57  ;;  %v5965_v7 = vld [vmem:[%s9505_s5 + $0x20] sm:$0xff] }
  0xd3   : > { %9705 = vst [vmem:[#allocation99_spill] sm:$0xff] %v5919_v0  ;;  %v3878_v0 = vpop.eup %3877  ;;  %1050 = vmatpush.msra.mxu0 %v5965_v7 }
  0xd4   : > { %9706 = vst [vmem:[#allocation100_spill] sm:$0xff] %v5924_v1  ;;  %v3880_v1 = vpop.eup %3879  ;;  %v5958_v56 = vadd.f32 1.0, %v3878_v0  ;;  %3887 = vpow2.f32 %v3734_v54  ;;  %v5996_v54 = vld [vmem:[%s9505_s5] sm:$0xff] }
  0xd5   : > { %9707 = vst [vmem:[#allocation101_spill] sm:$0xff] %v5932_v61  ;;  %v5956_v61 = vld [vmem:[%s9505_s5 + $0x58] sm:$0xff]  ;;  %v5977_v0 = vpop.eup %3881  ;;  %1051 = vmatpush.msra.mxu0 %v5996_v54 }
  0xd6   : > { %9708 = vst [vmem:[#allocation102_spill] sm:$0xff] %v5939_v62  ;;  %1118 = vmatpush.msra.mxu3 %v5956_v61  ;;  %v5975_v62 = vld [vmem:[%s9505_s5 + $0x30] sm:$0xff]  ;;  %v3884_v5 = vpop.eup %3883  ;;  %v843_v6 = vmul.f32 %v5977_v0, %v5871_v58  ;;  %3889 = vrcp.f32 %v5958_v56  ;;  %vm848_vm2 = vweird.f32 %v5977_v0  ;;  %vm877_vm6 = vweird.f32 %v5958_v56 }
  0xd7   : > { %9709 = vst [vmem:[#allocation103_spill] sm:$0xff] %v5944_v57  ;;  %v5970_v57 = vld [vmem:[%s9505_s5 + $0x28] sm:$0xff]  ;;  %1096 = vmatpush.msra.mxu2 %v5975_v62  ;;  %vm863_vm0 = vweird.f32 %v3884_v5  ;;  %vm849_vm7 = vmor %vm847_vm1, %vm848_vm2  ;;  %v881_v42 = vand.u32 2147483647, %v5958_v56 }
  0xd8   : > { %9710 = vst [vmem:[#allocation104_spill] sm:$0xff] %v5949_v2  ;;  %v5979_v2 = vadd.f32 1.0, %v3880_v1  ;;  %1073 = vmatpush.msra.mxu1 %v5970_v57  ;;  %1119 = vmatpush.msra.mxu3 %v5986_v9  ;;  %v6006_v1 = vld [vmem:[%s9505_s5 + $0x10] sm:$0xff]  ;;  %v6015_v9 = vld [vmem:[%s9505_s5 + $0x18] sm:$0xff]  ;;  %vm6039_vm5 = vmor %vm862_vm3, %vm863_vm0 }
  0xd9   : > { %9711 = vst [vmem:[#allocation105_spill] sm:$0xff] %v5956_v61  ;;  %v813_v61 = vadd.f32 %v804_v60, %v713_v16  ;;  %v6001_v60 = vld [vmem:[%s9505_s5 + $0x8] sm:$0xff]  ;;  %v3886_v16 = vpop.eup %3885  ;;  %1097 = vmatpush.msra.mxu2 %v6006_v1  ;;  %vm882_vm3 = vcmp.eq.f32.partialorder %v881_v42, 8.507059e+37 }
  0xda   : > { %9712 = vst [vmem:[#allocation106_spill] sm:$0xff] %v5965_v7  ;;  %3891 = vrcp.f32 %v5979_v2  ;;  %1074 = vmatpush.msra.mxu1 %v6001_v60  ;;  %v6017_v7 = vadd.f32 1.0, %v3886_v16  ;;  %1120 = vmatpush.msra.mxu3 %v6015_v9  ;;  %v3888_v16 = vpop.eup %3887  ;;  %vm892_vm9 = vweird.f32 %v5979_v2 }
  0xdb   : > { %9713 = vst [vmem:[#allocation107_spill] sm:$0xff] %v5970_v57  ;;  %v844_v57 = vsub.f32 1.0, %v843_v6  ;;  %3893 = vtanh.f32 %v813_v61  ;;  %v866_v6 = vand.u32 2147483647, %v5881_v3 }
  0xdc   : > { %9714 = vst [vmem:[#allocation108_spill] sm:$0xff] %v5975_v62  ;;  %v858_v62 = vmul.f32 %v3884_v5, %v5881_v3  ;;  %3895 = vrcp.f32 %v6017_v7  ;;  %v717_v3 = vld [vmem:[%s4993_s27 + $0x38] sm:$0xff]  ;;  %v913_v48 = vand.u32 2147483648, %v6017_v7  ;;  %vm907_vm15 = vweird.f32 %v6017_v7 }
  0xdd   : > { %9716 = vst [vmem:[#allocation110_spill] sm:$0xff] %v5996_v54  ;;  %v853_v54 = vand.u32 2147483648, %v5871_v58  ;;  %vm867_vm8 = vcmp.eq.f32.partialorder %v866_v6, 8.507059e+37 }
  0xde   : > { %9717 = vst [vmem:[#allocation111_spill] sm:$0xff] %v6001_v60  ;;  %v859_v52 = vsub.f32 1.0, %v858_v62  ;;  %v845_v60 = vmul.f32 %v5977_v0, %v844_v57  ;;  %v6029_v62 = vpop.eup %3889 }
  0xdf   : > { %9718 = vst [vmem:[#allocation112_spill] sm:$0xff] %v6006_v1  ;;  %v873_v47 = vmul.f32 %v6029_v62, %v5958_v56  ;;  %v854_v46 = vor.u32 1.1754944e-38, %v853_v54  ;;  %v704_v54 = vld [vmem:[#allocation3 + $0x8] sm:$0xff]  ;;  %vm878_vm11 = vweird.f32 %v6029_v62 }
  0xe0   : > { %9719 = vst [vmem:[#allocation113_spill] sm:$0xff] %v6015_v9  ;;  %v860_v49 = vmul.f32 %v3884_v5, %v859_v52  ;;  %v6032_v9 = vadd.f32 1.0, %v3888_v16  ;;  %v846_v61 = vadd.f32 %v5977_v0, %v845_v60  ;;  %v3892_v57 = vpop.eup %3891  ;;  %v869_v52 = vor.u32 1.1754944e-38, %v868_v50  ;;  %v807_v16 = vpop.f32.mrf.mxu3  ;;  %vm6080_vm14 = vmor %vm877_vm6, %vm878_vm11 }
  0xe1   : > { %v888_v53 = vmul.f32 %v3892_v57, %v5979_v2  ;;  %v3894_v50 = vpop.eup %3893  ;;  %v874_v60 = vsub.f32 1.0, %v873_v47  ;;  %v817_v35 = vadd.f32 %v807_v16, %v717_v3  ;;  %v898_v47 = vand.u32 2147483648, %v5979_v2 }
  0xe2   : > { %v861_v45 = vadd.f32 %v3884_v5, %v860_v49  ;;  %3897 = vrcp.f32 %v6032_v9  ;;  %v850_v49 = vsel %vm849_vm7, %v5977_v0, %v846_v61  ;;  %v3896_v39 = vpop.eup %3895  ;;  %vm893_vm10 = vweird.f32 %v3892_v57 }
  0xe3   : > { %v889_v44 = vsub.f32 1.0, %v888_v53  ;;  %v855_v38 = vsel %vm6035_vm4, %v854_v46, %v850_v49  ;;  %v875_v58 = vmul.f32 %v6029_v62, %v874_v60  ;;  %v903_v6 = vmul.f32 %v3896_v39, %v6017_v7  ;;  %vm894_vm13 = vmor %vm892_vm9, %vm893_vm10  ;;  %v705_v60 = vld [vmem:[#allocation3] sm:$0xff] }
  0xe4   : > { %v865_v41 = vsel %vm6039_vm5, %v3884_v5, %v861_v45  ;;  %v936_v0 = vmul.f32 %v3894_v50, %v855_v38  ;;  %v896_v5 = vand.u32 2147483647, %v5979_v2  ;;  %3899 = vtanh.f32 %v817_v35  ;;  %v6155_v35 = vld [vmem:[%s9503_s3 + $0x1d8] sm:$0xff] }
  0xe5   : > { %v870_v37 = vsel %vm867_vm8, %v869_v52, %v865_v41  ;;  %v890_v61 = vmul.f32 %v3892_v57, %v889_v44  ;;  %v904_v45 = vsub.f32 1.0, %v903_v6  ;;  %v911_v41 = vand.u32 2147483647, %v6017_v7 }
  0xe6   : > { %v934_v43 = vmul.f32 %v870_v37, %v704_v54  ;;  %v876_v37 = vadd.f32 %v6029_v62, %v875_v58  ;;  %vm908_vm12 = vweird.f32 %v3896_v39  ;;  %v883_v3 = vand.u32 2147483648, %v5958_v56 }
  0xe7   : > { %v891_v52 = vadd.f32 %v3892_v57, %v890_v61  ;;  %v905_v38 = vmul.f32 %v3896_v39, %v904_v45  ;;  %v899_v53 = vor.u32 1.1754944e-38, %v898_v47  ;;  %vm897_vm0 = vcmp.eq.f32.partialorder %v896_v5, 8.507059e+37  ;;  %vm909_vm1 = vmor %vm907_vm15, %vm908_vm12 }
  0xe8   : > { %v6066_v46 = vpop.eup %3897  ;;  %v6069_v1 = vadd.f32 %v936_v0, %v934_v43  ;;  %v914_v2 = vor.u32 1.1754944e-38, %v913_v48  ;;  %vm912_vm2 = vcmp.eq.f32.partialorder %v911_v41, 8.507059e+37  ;;  %v884_v58 = vor.u32 1.1754944e-38, %v883_v3  ;;  %v6110_v41 = vld [vmem:[%s9503_s3 + $0x1e0] sm:$0xff] }
  0xe9   : > { %v918_v44 = vmul.f32 %v6066_v46, %v6032_v9  ;;  %v895_v16 = vsel %vm894_vm13, %v3892_v57, %v891_v52  ;;  %v906_v50 = vadd.f32 %v3896_v39, %v905_v38  ;;  %v880_v57 = vsel %vm6080_vm14, %v6029_v62, %v876_v37  ;;  %v6116_v37 = vld [vmem:[%s9503_s3 + $0x1e8] sm:$0xff]  ;;  %v6125_v38 = vld [vmem:[%s9503_s3 + $0x1f0] sm:$0xff]  ;;  %v6257_v62 = vld [vmem:[%s9503_s3 + $0x158] sm:$0xff] }
  0xea   : > { %3901 = vtanh.f32 %v6069_v1  ;;  %v900_v54 = vsel %vm897_vm0, %v899_v53, %v895_v16  ;;  %v3900_v56 = vpop.eup %3899  ;;  %v885_v45 = vsel %vm882_vm3, %v884_v58, %v880_v57  ;;  %vm923_vm4 = vweird.f32 %v6066_v46  ;;  %v6137_v16 = vld [vmem:[%s9503_s3 + $0x1c0] sm:$0xff]  ;;  %v6149_v53 = vld [vmem:[%s9503_s3 + $0x1d0] sm:$0xff]  ;;  %v6193_v58 = vld [vmem:[%s9503_s3 + $0x188] sm:$0xff]  ;;  %9728 = vst [vmem:[#allocation114_spill] sm:$0xff] %v6257_v62 }
  0xeb   : > { %v919_v43 = vsub.f32 1.0, %v918_v44  ;;  %v910_v49 = vsel %vm909_vm1, %v3896_v39, %v906_v50  ;;  %v937_v0 = vmul.f32 %v3900_v56, %v900_v54  ;;  %v928_v39 = vand.u32 2147483648, %v6032_v9  ;;  %v6131_v44 = vld [vmem:[%s9503_s3 + $0x1f8] sm:$0xff]  ;;  %v6175_v57 = vld [vmem:[%s9503_s3 + $0x1b0] sm:$0xff]  ;;  %v6187_v56 = vld [vmem:[%s9503_s3 + $0x180] sm:$0xff] }
  0xec   : > { %v915_v47 = vsel %vm912_vm2, %v914_v2, %v910_v49  ;;  %vm922_vm5 = vweird.f32 %v6032_v9  ;;  %v926_v42 = vand.u32 2147483647, %v6032_v9  ;;  %v6161_v2 = vld [vmem:[%s9503_s3 + $0x1a0] sm:$0xff]  ;;  %v6181_v49 = vld [vmem:[%s9503_s3 + $0x1b8] sm:$0xff] }
  0xed   : > { %v920_v6 = vmul.f32 %v6066_v46, %v919_v43  ;;  %v935_v7 = vmul.f32 %v915_v47, %v705_v60  ;;  %vm6103_vm6 = vmor %vm922_vm5, %vm923_vm4  ;;  %v929_v3 = vor.u32 1.1754944e-38, %v928_v39  ;;  %v6167_v60 = vld [vmem:[%s9503_s3 + $0x1a8] sm:$0xff]  ;;  %v6205_v47 = vld [vmem:[%s9503_s3 + $0x198] sm:$0xff] }
  0xee   : > { %vm927_vm7 = vcmp.eq.f32.partialorder %v926_v42, 8.507059e+37  ;;  %v6245_v39 = vld [vmem:[%s9503_s3 + $0x148] sm:$0xff]  ;;  %v6251_v42 = vld [vmem:[%s9503_s3 + $0x150] sm:$0xff] }
  0xef   : > { %v6091_v48 = vadd.f32 %v937_v0, %v935_v7  ;;  %v921_v52 = vadd.f32 %v6066_v46, %v920_v6  ;;  %v6199_v6 = vld [vmem:[%s9503_s3 + $0x190] sm:$0xff]  ;;  %v6215_v7 = vld [vmem:[%s9503_s3 + $0x160] sm:$0xff]  ;;  %v6221_v0 = vld [vmem:[%s9503_s3 + $0x168] sm:$0xff] }
  0xf0   : > { %v3902_v61 = vpop.eup %3901 }
  0xf1   : > { %v6089_v5 = vmul.f32 %v3902_v61, %v885_v45  ;;  %3903 = vtanh.f32 %v6091_v48  ;;  %v925_v9 = vsel %vm6103_vm6, %v6066_v46, %v921_v52  ;;  %v6143_v46 = vld [vmem:[%s9503_s3 + $0x1c8] sm:$0xff]  ;;  %v6227_v61 = vld [vmem:[%s9503_s3 + $0x170] sm:$0xff]  ;;  %v6233_v45 = vld [vmem:[%s9503_s3 + $0x178] sm:$0xff] }
  0xf2   : > { %v930_v50 = vsel %vm927_vm7, %v929_v3, %v925_v9  ;;  %v6239_v52 = vld [vmem:[%s9503_s3 + $0x140] sm:$0xff]  ;;  %v4218_v3 = vld [vmem:[%s9503_s3 + $0x128] sm:$0xff] }
  0xf3   : > { %960 = vmatmul.f32.vlgmr.msrb.gmra.mxu0 %v6089_v5  ;;  %983 = vmatmul.f32.vlgmr.msrb.gmra.mxu1 %v6089_v5  ;;  %v4217_v9 = vld [vmem:[%s9503_s3 + $0x120] sm:$0xff] }
  0xf4   : > { %1006 = vmatmul.f32.vlgmr.msrb.gmra.mxu2 %v6089_v5  ;;  %1029 = vmatmul.f32.vlgmr.msrb.gmra.mxu3 %v6089_v5 }
  0xf5   : > { %1271 = vmatpush.msrb.mxu0 %v6110_v41  ;;  %1294 = vmatpush.msrb.mxu1 %v6116_v37 }
  0xf6   : > { %1317 = vmatpush.msrb.mxu2 %v6125_v38  ;;  %1340 = vmatpush.msrb.mxu3 %v6131_v44 }
  0xf7   : > { %1272 = vmatpush.msrb.mxu0 %v6137_v16  ;;  %1295 = vmatpush.msrb.mxu1 %v6143_v46  ;;  %v3904_v43 = vpop.eup %3903 }
  0xf8   : > { %1318 = vmatpush.msrb.mxu2 %v6149_v53  ;;  %1341 = vmatpush.msrb.mxu3 %v6155_v35  ;;  %v6170_v54 = vmul.f32 %v3904_v43, %v930_v50  ;;  %v4219_v43 = vld [vmem:[%s9503_s3 + $0x130] sm:$0xff]  ;;  %v4220_v50 = vld [vmem:[%s9503_s3 + $0x138] sm:$0xff] }
  0xf9   : > { %1273 = vmatpush.msrb.mxu0 %v6161_v2  ;;  %1296 = vmatpush.msrb.mxu1 %v6167_v60 }
  0xfa   : > { %1319 = vmatpush.msrb.mxu2 %v6175_v57  ;;  %1342 = vmatpush.msrb.mxu3 %v6181_v49 }
  0xfb   : > { %1274 = vmatpush.msrb.mxu0 %v6187_v56  ;;  %1297 = vmatpush.msrb.mxu1 %v6193_v58 }
  0xfc   : > { %1320 = vmatpush.msrb.mxu2 %v6199_v6  ;;  %1343 = vmatpush.msrb.mxu3 %v6205_v47 }
  0xfd   : > { %963 = vmatmul.f32.gmra.mxu0 %v6170_v54  ;;  %986 = vmatmul.f32.gmra.mxu1 %v6170_v54 }
  0xfe   : > { %1009 = vmatmul.f32.gmra.mxu2 %v6170_v54  ;;  %1032 = vmatmul.f32.gmra.mxu3 %v6170_v54 }
  0xff   : > { %1275 = vmatpush.msrb.mxu0 %v6215_v7  ;;  %1298 = vmatpush.msrb.mxu1 %v6221_v0 }
 0x100   : > { %1321 = vmatpush.msrb.mxu2 %v6227_v61  ;;  %1344 = vmatpush.msrb.mxu3 %v6233_v45 }
 0x101   : > { %1276 = vmatpush.msrb.mxu0 %v6239_v52  ;;  %1299 = vmatpush.msrb.mxu1 %v6245_v39 }
 0x102   : > { %1322 = vmatpush.msrb.mxu2 %v6251_v42  ;;  %1345 = vmatpush.msrb.mxu3 %v6257_v62  ;;  %v706_v62 = vld [vmem:[#allocation4 + $0x8] sm:$0xff] }
 0x103   : > { %1277 = vmatpush.msrb.mxu0 %v4217_v9  ;;  %1300 = vmatpush.msrb.mxu1 %v4218_v3  ;;  %v4221_v9 = vld [vmem:[%s9503_s3 + $0x100] sm:$0xff]  ;;  %v4222_v3 = vld [vmem:[%s9503_s3 + $0x108] sm:$0xff] }
 0x104   : > { %1323 = vmatpush.msrb.mxu2 %v4219_v43  ;;  %1346 = vmatpush.msrb.mxu3 %v4220_v50  ;;  %v4223_v43 = vld [vmem:[%s9503_s3 + $0x110] sm:$0xff]  ;;  %v4224_v50 = vld [vmem:[%s9503_s3 + $0xe0] sm:$0xff] }
 0x105   : > { %1278 = vmatpush.msrb.mxu0 %v4221_v9  ;;  %1301 = vmatpush.msrb.mxu1 %v4222_v3  ;;  %v4225_v9 = vld [vmem:[%s9503_s3 + $0xe8] sm:$0xff]  ;;  %v4226_v3 = vld [vmem:[%s9503_s3 + $0xf0] sm:$0xff] }
 0x106   : > { %1324 = vmatpush.msrb.mxu2 %v4223_v43  ;;  %1347 = vmatpush.msrb.mxu3 %v5152_v51  ;;  %v4227_v51 = vld [vmem:[%s9503_s3 + $0xc0] sm:$0xff]  ;;  %v4229_v43 = vld [vmem:[%s9503_s3 + $0xd0] sm:$0xff] }
 0x107   : > { %1052 = vmatmul.f32.vlgmr.msra.gmra.mxu0 %v706_v62  ;;  %1075 = vmatmul.f32.vlgmr.msra.gmra.mxu1 %v706_v62 }
 0x108   : > { %1098 = vmatmul.f32.vlgmr.msra.gmra.mxu2 %v706_v62  ;;  %1121 = vmatmul.f32.vlgmr.msra.gmra.mxu3 %v706_v62  ;;  %v4228_v62 = vld [vmem:[%s9503_s3 + $0xc8] sm:$0xff] }
 0x109   : > { %1279 = vmatpush.msrb.mxu0 %v4224_v50  ;;  %1302 = vmatpush.msrb.mxu1 %v4225_v9  ;;  %v4231_v50 = vld [vmem:[%s9503_s3 + $0xa8] sm:$0xff]  ;;  %v4232_v9 = vld [vmem:[%s9503_s3 + $0xb0] sm:$0xff] }
 0x10a   : > { %1325 = vmatpush.msrb.mxu2 %v4226_v3  ;;  %1348 = vmatpush.msrb.mxu3 %v5166_v55  ;;  %v4230_v55 = vld [vmem:[%s9503_s3 + $0xa0] sm:$0xff] }
 0x10b   : > { %1280 = vmatpush.msrb.mxu0 %v4227_v51  ;;  %1303 = vmatpush.msrb.mxu1 %v4228_v62  ;;  %v707_v3 = vld [vmem:[#allocation4] sm:$0xff]  ;;  %v4234_v51 = vld [vmem:[%s9503_s3 + $0x88] sm:$0xff]  ;;  %v4235_v62 = vld [vmem:[%s9503_s3 + $0x90] sm:$0xff] }
 0x10c   : > { %1326 = vmatpush.msrb.mxu2 %v4229_v43  ;;  %1349 = vmatpush.msrb.mxu3 %v5181_v59  ;;  %v4233_v59 = vld [vmem:[%s9503_s3 + $0x80] sm:$0xff]  ;;  %v4237_v43 = vld [vmem:[%s9503_s3 + $0x68] sm:$0xff] }
 0x10d   : > { %1281 = vmatpush.msrb.mxu0 %v4230_v55  ;;  %1304 = vmatpush.msrb.mxu1 %v4231_v50  ;;  %v4238_v55 = vld [vmem:[%s9503_s3 + $0x70] sm:$0xff]  ;;  %v4240_v50 = vld [vmem:[%s9503_s3 + $0x48] sm:$0xff] }
 0x10e   : > { %1327 = vmatpush.msrb.mxu2 %v4232_v9  ;;  %1350 = vmatpush.msrb.mxu3 %v5196_v63  ;;  %v4236_v63 = vld [vmem:[%s9503_s3 + $0x60] sm:$0xff]  ;;  %v4241_v9 = vld [vmem:[%s9503_s3 + $0x50] sm:$0xff] }
 0x10f   : > { %1282 = vmatpush.msrb.mxu0 %v4233_v59  ;;  %1305 = vmatpush.msrb.mxu1 %v4234_v51  ;;  %v4244_v59 = vld [vmem:[%s9503_s3 + $0x30] sm:$0xff]  ;;  %v4246_v51 = vld [vmem:[%s9503_s3 + $0x8] sm:$0xff] }
 0x110   : > { %1328 = vmatpush.msrb.mxu2 %v4235_v62  ;;  %1351 = vmatpush.msrb.mxu3 %v5212_v4  ;;  %v4239_v4 = vld [vmem:[%s9503_s3 + $0x40] sm:$0xff]  ;;  %v4247_v62 = vld [vmem:[%s9503_s3 + $0x10] sm:$0xff] }
 0x111   : > { %1055 = vmatmul.f32.gmra.mxu0 %v707_v3  ;;  %1078 = vmatmul.f32.gmra.mxu1 %v707_v3 }
 0x112   : > { %1101 = vmatmul.f32.gmra.mxu2 %v707_v3  ;;  %1124 = vmatmul.f32.gmra.mxu3 %v707_v3  ;;  %v4243_v3 = vld [vmem:[%s9503_s3 + $0x28] sm:$0xff] }
 0x113   : > { %1283 = vmatpush.msrb.mxu0 %v4236_v63  ;;  %1306 = vmatpush.msrb.mxu1 %v4237_v43  ;;  %v4249_v63 = vld [vmem:[%s9504_s4 + $0x1e8] sm:$0xff]  ;;  %v9753_v43 = vld [vmem:[#allocation37_spill] sm:$0xff] }
 0x114   : > { %1329 = vmatpush.msrb.mxu2 %v4238_v55  ;;  %1352 = vmatpush.msrb.mxu3 %v5226_v8  ;;  %v4242_v8 = vld [vmem:[%s9503_s3 + $0x20] sm:$0xff]  ;;  %v9754_v55 = vld [vmem:[#allocation38_spill] sm:$0xff] }
 0x115   : > { %1284 = vmatpush.msrb.mxu0 %v4239_v4  ;;  %1307 = vmatpush.msrb.mxu1 %v4240_v50  ;;  %v9755_v4 = vld [vmem:[#allocation39_spill] sm:$0xff]  ;;  %v9756_v50 = vld [vmem:[#allocation40_spill] sm:$0xff] }
 0x116   : > { %1330 = vmatpush.msrb.mxu2 %v4241_v9  ;;  %1353 = vmatpush.msrb.mxu3 %v5245_v12  ;;  %v4245_v12 = vld [vmem:[%s9503_s3] sm:$0xff] }
 0x117   : > { %1285 = vmatpush.msrb.mxu0 %v4242_v8  ;;  %1308 = vmatpush.msrb.mxu1 %v4243_v3  ;;  %v9757_v9 = vld [vmem:[#allocation41_spill] sm:$0xff]  ;;  %v9758_v8 = vld [vmem:[#allocation42_spill] sm:$0xff]  ;;  %v9759_v3 = vld [vmem:[#allocation43_spill] sm:$0xff] }
 0x118   : > { %1331 = vmatpush.msrb.mxu2 %v4244_v59  ;;  %1354 = vmatpush.msrb.mxu3 %v5266_v17  ;;  %v4248_v17 = vld [vmem:[%s9504_s4 + $0x1e0] sm:$0xff]  ;;  %v9760_v59 = vld [vmem:[#allocation44_spill] sm:$0xff] }
 0x119   : > { %1286 = vmatpush.msrb.mxu0 %v4245_v12  ;;  %1309 = vmatpush.msrb.mxu1 %v4246_v51  ;;  %v9761_v12 = vld [vmem:[#allocation45_spill] sm:$0xff]  ;;  %v9762_v51 = vld [vmem:[#allocation46_spill] sm:$0xff] }
 0x11a   : > { %1332 = vmatpush.msrb.mxu2 %v4247_v62  ;;  %1355 = vmatpush.msrb.mxu3 %v5275_v18  ;;  %v4250_v18 = vld [vmem:[%s9504_s4 + $0x1f0] sm:$0xff] }
 0x11b   : > { %1287 = vmatmul.f32.vlgmr.msrb.gmra.mxu0 %v6089_v5  ;;  %1310 = vmatmul.f32.vlgmr.msrb.gmra.mxu1 %v6089_v5  ;;  %v9763_v62 = vld [vmem:[#allocation47_spill] sm:$0xff] }
 0x11c   : > { %1333 = vmatmul.f32.vlgmr.msrb.gmra.mxu2 %v6089_v5  ;;  %1356 = vmatmul.f32.vlgmr.msrb.gmra.mxu3 %v6089_v5  ;;  %v4251_v5 = vld [vmem:[%s9504_s4 + $0x1c0] sm:$0xff] }
 0x11d   : > { %1497 = vmatpush.msra.mxu0 %v4248_v17  ;;  %1520 = vmatpush.msra.mxu1 %v4249_v63  ;;  %v9764_v17 = vld [vmem:[#allocation48_spill] sm:$0xff]  ;;  %v9765_v63 = vld [vmem:[#allocation49_spill] sm:$0xff] }
 0x11e   : > { %1543 = vmatpush.msra.mxu2 %v4250_v18  ;;  %1566 = vmatpush.msra.mxu3 %v5293_v21  ;;  %v9736_v21 = vld [vmem:[#allocation18_spill] sm:$0xff] }
 0x11f   : > { %1498 = vmatpush.msra.mxu0 %v4251_v5  ;;  %1521 = vmatpush.msra.mxu1 %v5235_v10  ;;  %v9729_v10 = vld [vmem:[#allocation19_spill] sm:$0xff]  ;;  %v9766_v18 = vld [vmem:[#allocation50_spill] sm:$0xff] }
 0x120   : > { %1544 = vmatpush.msra.mxu2 %v5240_v11  ;;  %1567 = vmatpush.msra.mxu3 %v5315_v25  ;;  %v9730_v11 = vld [vmem:[#allocation13_spill] sm:$0xff]  ;;  %v9740_v25 = vld [vmem:[#allocation24_spill] sm:$0xff]  ;;  %v9767_v5 = vld [vmem:[#allocation51_spill] sm:$0xff] }
 0x121   : > { %1499 = vmatpush.msra.mxu0 %v5250_v13  ;;  %1522 = vmatpush.msra.mxu1 %v5256_v14  ;;  %v9731_v13 = vld [vmem:[#allocation14_spill] sm:$0xff]  ;;  %v9732_v14 = vld [vmem:[#allocation15_spill] sm:$0xff] }
 0x122   : > { %1545 = vmatpush.msra.mxu2 %v5261_v15  ;;  %1568 = vmatpush.msra.mxu3 %v5338_v29  ;;  %v9733_v15 = vld [vmem:[#allocation20_spill] sm:$0xff] }
 0x123   : > { %1290 = vmatmul.f32.gmra.mxu0 %v6170_v54  ;;  %1313 = vmatmul.f32.gmra.mxu1 %v6170_v54  ;;  %v9744_v29 = vld [vmem:[#allocation28_spill] sm:$0xff] }
 0x124   : > { %1336 = vmatmul.f32.gmra.mxu2 %v6170_v54  ;;  %1359 = vmatmul.f32.gmra.mxu3 %v6170_v54  ;;  %v9752_v54 = vld [vmem:[#allocation36_spill] sm:$0xff] }
 0x125   : > { %1500 = vmatpush.msra.mxu0 %v5282_v19  ;;  %1523 = vmatpush.msra.mxu1 %v5288_v20  ;;  %v9734_v19 = vld [vmem:[#allocation16_spill] sm:$0xff]  ;;  %v9735_v20 = vld [vmem:[#allocation17_spill] sm:$0xff] }
 0x126   : > { %1546 = vmatpush.msra.mxu2 %v5298_v22  ;;  %1569 = vmatpush.msra.mxu3 %v5362_v33  ;;  %v9737_v22 = vld [vmem:[#allocation21_spill] sm:$0xff]  ;;  %v9748_v33 = vld [vmem:[#allocation32_spill] sm:$0xff] }
 0x127   : > { %1501 = vmatpush.msra.mxu0 %v5305_v23  ;;  %1524 = vmatpush.msra.mxu1 %v5310_v24  ;;  %v9738_v23 = vld [vmem:[#allocation22_spill] sm:$0xff]  ;;  %v9739_v24 = vld [vmem:[#allocation23_spill] sm:$0xff] }
 0x128   : > { %1547 = vmatpush.msra.mxu2 %v5321_v26  ;;  %1570 = vmatpush.msra.mxu3 %v5381_v36  ;;  %v9741_v26 = vld [vmem:[#allocation25_spill] sm:$0xff]  ;;  %v9750_v36 = vld [vmem:[#allocation34_spill] sm:$0xff] }
 0x129   : > { %1502 = vmatpush.msra.mxu0 %v5328_v27  ;;  %1525 = vmatpush.msra.mxu1 %v5333_v28  ;;  %v9742_v27 = vld [vmem:[#allocation26_spill] sm:$0xff]  ;;  %v9743_v28 = vld [vmem:[#allocation27_spill] sm:$0xff] }
 0x12a   : > { %1548 = vmatpush.msra.mxu2 %v5345_v30  ;;  %1571 = vmatpush.msra.mxu3 %v5405_v40  ;;  %v9745_v30 = vld [vmem:[#allocation29_spill] sm:$0xff]  ;;  %v9751_v40 = vld [vmem:[#allocation35_spill] sm:$0xff] }
 0x12b   : > { %1503 = vmatpush.msra.mxu0 %v5352_v31  ;;  %1526 = vmatpush.msra.mxu1 %v5357_v32  ;;  %v9746_v31 = vld [vmem:[#allocation30_spill] sm:$0xff]  ;;  %v9747_v32 = vld [vmem:[#allocation31_spill] sm:$0xff] }
 0x12c   : > { %1549 = vmatpush.msra.mxu2 %v5369_v34  ;;  %1572 = vmatpush.msra.mxu3 %v9729_v10  ;;  %v9749_v34 = vld [vmem:[#allocation33_spill] sm:$0xff]  ;;  %v9768_v10 = vld [vmem:[#allocation52_spill] sm:$0xff] }
 0x12d   : > { %1504 = vmatpush.msra.mxu0 %v9730_v11  ;;  %1527 = vmatpush.msra.mxu1 %v9731_v13  ;;  %v9769_v11 = vld [vmem:[#allocation53_spill] sm:$0xff]  ;;  %v9770_v13 = vld [vmem:[#allocation54_spill] sm:$0xff] }
 0x12e   : > { %1550 = vmatpush.msra.mxu2 %v9732_v14  ;;  %1573 = vmatpush.msra.mxu3 %v9733_v15  ;;  %v9771_v14 = vld [vmem:[#allocation55_spill] sm:$0xff]  ;;  %v9772_v15 = vld [vmem:[#allocation56_spill] sm:$0xff] }
 0x12f   : > { %1505 = vmatpush.msra.mxu0 %v9734_v19  ;;  %1528 = vmatpush.msra.mxu1 %v9735_v20  ;;  %v9773_v19 = vld [vmem:[#allocation57_spill] sm:$0xff]  ;;  %v9774_v20 = vld [vmem:[#allocation58_spill] sm:$0xff] }
 0x130   : > { %1551 = vmatpush.msra.mxu2 %v9736_v21  ;;  %1574 = vmatpush.msra.mxu3 %v9737_v22  ;;  %v9775_v21 = vld [vmem:[#allocation59_spill] sm:$0xff]  ;;  %v9776_v22 = vld [vmem:[#allocation60_spill] sm:$0xff] }
 0x131   : > { %1506 = vmatpush.msra.mxu0 %v9738_v23  ;;  %1529 = vmatpush.msra.mxu1 %v9739_v24  ;;  %v9777_v23 = vld [vmem:[#allocation61_spill] sm:$0xff]  ;;  %v9778_v24 = vld [vmem:[#allocation62_spill] sm:$0xff] }
 0x132   : > { %1552 = vmatpush.msra.mxu2 %v9740_v25  ;;  %1575 = vmatpush.msra.mxu3 %v9741_v26  ;;  %v9779_v25 = vld [vmem:[#allocation63_spill] sm:$0xff]  ;;  %v9780_v26 = vld [vmem:[#allocation64_spill] sm:$0xff] }
 0x133   : > { %1507 = vmatpush.msra.mxu0 %v9742_v27  ;;  %1530 = vmatpush.msra.mxu1 %v9743_v28  ;;  %v9781_v27 = vld [vmem:[#allocation65_spill] sm:$0xff]  ;;  %v9782_v28 = vld [vmem:[#allocation66_spill] sm:$0xff] }
 0x134   : > { %1553 = vmatpush.msra.mxu2 %v9744_v29  ;;  %1576 = vmatpush.msra.mxu3 %v9745_v30  ;;  %v9783_v29 = vld [vmem:[#allocation67_spill] sm:$0xff]  ;;  %v9784_v30 = vld [vmem:[#allocation68_spill] sm:$0xff] }
 0x135   : > { %1508 = vmatpush.msra.mxu0 %v9746_v31  ;;  %1531 = vmatpush.msra.mxu1 %v9747_v32  ;;  %v9785_v31 = vld [vmem:[#allocation69_spill] sm:$0xff]  ;;  %v9786_v32 = vld [vmem:[#allocation70_spill] sm:$0xff] }
 0x136   : > { %1554 = vmatpush.msra.mxu2 %v9748_v33  ;;  %1577 = vmatpush.msra.mxu3 %v9749_v34  ;;  %v9787_v33 = vld [vmem:[#allocation71_spill] sm:$0xff]  ;;  %v9788_v34 = vld [vmem:[#allocation72_spill] sm:$0xff] }
 0x137   : > { %1509 = vmatpush.msra.mxu0 %v9750_v36  ;;  %1532 = vmatpush.msra.mxu1 %v9751_v40  ;;  %v9789_v36 = vld [vmem:[#allocation73_spill] sm:$0xff]  ;;  %v9790_v40 = vld [vmem:[#allocation74_spill] sm:$0xff] }
 0x138   : > { %1555 = vmatpush.msra.mxu2 %v9752_v54  ;;  %1578 = vmatpush.msra.mxu3 %v9753_v43  ;;  %v9791_v54 = vld [vmem:[#allocation75_spill] sm:$0xff]  ;;  %v9792_v43 = vld [vmem:[#allocation76_spill] sm:$0xff] }
 0x139   : > { %1510 = vmatpush.msra.mxu0 %v9754_v55  ;;  %1533 = vmatpush.msra.mxu1 %v9755_v4  ;;  %v9793_v55 = vld [vmem:[#allocation77_spill] sm:$0xff]  ;;  %v9794_v4 = vld [vmem:[#allocation78_spill] sm:$0xff] }
 0x13a   : > { %1556 = vmatpush.msra.mxu2 %v9756_v50  ;;  %1579 = vmatpush.msra.mxu3 %v9757_v9  ;;  %v9795_v50 = vld [vmem:[#allocation79_spill] sm:$0xff]  ;;  %v9796_v9 = vld [vmem:[#allocation80_spill] sm:$0xff] }
 0x13b   : > { %1511 = vmatpush.msra.mxu0 %v9758_v8  ;;  %1534 = vmatpush.msra.mxu1 %v9759_v3  ;;  %v9797_v8 = vld [vmem:[#allocation81_spill] sm:$0xff]  ;;  %v9798_v3 = vld [vmem:[#allocation82_spill] sm:$0xff] }
 0x13c   : > { %1557 = vmatpush.msra.mxu2 %v9760_v59  ;;  %1580 = vmatpush.msra.mxu3 %v9761_v12  ;;  %v9799_v59 = vld [vmem:[#allocation83_spill] sm:$0xff]  ;;  %v9800_v12 = vld [vmem:[#allocation84_spill] sm:$0xff] }
 0x13d   : > { %1512 = vmatpush.msra.mxu0 %v9762_v51  ;;  %1535 = vmatpush.msra.mxu1 %v9763_v62  ;;  %v9801_v51 = vld [vmem:[#allocation85_spill] sm:$0xff]  ;;  %v9802_v62 = vld [vmem:[#allocation86_spill] sm:$0xff] }
 0x13e   : > { %1558 = vmatpush.msra.mxu2 %v9764_v17  ;;  %1581 = vmatpush.msra.mxu3 %v9765_v63  ;;  %v9803_v17 = vld [vmem:[#allocation87_spill] sm:$0xff]  ;;  %v9804_v63 = vld [vmem:[#allocation88_spill] sm:$0xff] }
 0x13f   : > { %1589 = vmatpush.msrb.mxu0 %v9766_v18  ;;  %1612 = vmatpush.msrb.mxu1 %v9767_v5  ;;  %v9805_v18 = vld [vmem:[#allocation89_spill] sm:$0xff]  ;;  %v9806_v5 = vld [vmem:[#allocation90_spill] sm:$0xff] }
 0x140   : > { %1635 = vmatpush.msrb.mxu2 %v9768_v10  ;;  %1658 = vmatpush.msrb.mxu3 %v9769_v11  ;;  %v9807_v10 = vld [vmem:[#allocation91_spill] sm:$0xff]  ;;  %v9808_v11 = vld [vmem:[#allocation92_spill] sm:$0xff] }
 0x141   : > { %1590 = vmatpush.msrb.mxu0 %v9770_v13  ;;  %1613 = vmatpush.msrb.mxu1 %v9771_v14  ;;  %v9809_v13 = vld [vmem:[#allocation93_spill] sm:$0xff]  ;;  %v9810_v14 = vld [vmem:[#allocation94_spill] sm:$0xff] }
 0x142   : > { %1636 = vmatpush.msrb.mxu2 %v9772_v15  ;;  %1659 = vmatpush.msrb.mxu3 %v9773_v19  ;;  %v9811_v15 = vld [vmem:[#allocation95_spill] sm:$0xff]  ;;  %v9812_v19 = vld [vmem:[#allocation96_spill] sm:$0xff] }
 0x143   : > { %1591 = vmatpush.msrb.mxu0 %v9774_v20  ;;  %1614 = vmatpush.msrb.mxu1 %v9775_v21  ;;  %v9813_v20 = vld [vmem:[#allocation97_spill] sm:$0xff]  ;;  %v9814_v21 = vld [vmem:[#allocation98_spill] sm:$0xff] }
 0x144   : > { %1637 = vmatpush.msrb.mxu2 %v9776_v22  ;;  %1660 = vmatpush.msrb.mxu3 %v9777_v23  ;;  %v9815_v22 = vld [vmem:[#allocation99_spill] sm:$0xff]  ;;  %v9816_v23 = vld [vmem:[#allocation100_spill] sm:$0xff] }
 0x145   : > { %1592 = vmatpush.msrb.mxu0 %v9778_v24  ;;  %1615 = vmatpush.msrb.mxu1 %v9779_v25  ;;  %v9817_v24 = vld [vmem:[#allocation101_spill] sm:$0xff]  ;;  %v9818_v25 = vld [vmem:[#allocation102_spill] sm:$0xff] }
 0x146   : > { %1638 = vmatpush.msrb.mxu2 %v9780_v26  ;;  %1661 = vmatpush.msrb.mxu3 %v9781_v27  ;;  %v9819_v26 = vld [vmem:[#allocation103_spill] sm:$0xff]  ;;  %v9820_v27 = vld [vmem:[#allocation104_spill] sm:$0xff] }
 0x147   : > { %1593 = vmatpush.msrb.mxu0 %v9782_v28  ;;  %1616 = vmatpush.msrb.mxu1 %v9783_v29  ;;  %v9821_v28 = vld [vmem:[#allocation105_spill] sm:$0xff]  ;;  %v9822_v29 = vld [vmem:[#allocation106_spill] sm:$0xff] }
 0x148   : > { %1639 = vmatpush.msrb.mxu2 %v9784_v30  ;;  %1662 = vmatpush.msrb.mxu3 %v9785_v31  ;;  %v9823_v30 = vld [vmem:[#allocation107_spill] sm:$0xff]  ;;  %v9824_v31 = vld [vmem:[#allocation108_spill] sm:$0xff] }
 0x149   : > { %1594 = vmatpush.msrb.mxu0 %v9786_v32  ;;  %1617 = vmatpush.msrb.mxu1 %v9787_v33  ;;  %v9825_v32 = vld [vmem:[#allocation109_spill] sm:$0xff]  ;;  %v9826_v33 = vld [vmem:[#allocation110_spill] sm:$0xff] }
 0x14a   : > { %1640 = vmatpush.msrb.mxu2 %v9788_v34  ;;  %1663 = vmatpush.msrb.mxu3 %v9789_v36  ;;  %v9827_v34 = vld [vmem:[#allocation111_spill] sm:$0xff]  ;;  %v9828_v36 = vld [vmem:[#allocation112_spill] sm:$0xff] }
 0x14b   : > { %1595 = vmatpush.msrb.mxu0 %v9790_v40  ;;  %1618 = vmatpush.msrb.mxu1 %v9791_v54  ;;  %v9829_v40 = vld [vmem:[#allocation113_spill] sm:$0xff] }
 0x14c   : > { %1641 = vmatpush.msrb.mxu2 %v9792_v43  ;;  %1664 = vmatpush.msrb.mxu3 %v9793_v55 }
 0x14d   : > { %1596 = vmatpush.msrb.mxu0 %v9794_v4  ;;  %1619 = vmatpush.msrb.mxu1 %v9795_v50 }
 0x14e   : > { %1642 = vmatpush.msrb.mxu2 %v9796_v9  ;;  %1665 = vmatpush.msrb.mxu3 %v9797_v8 }
 0x14f   : > { %1597 = vmatpush.msrb.mxu0 %v9798_v3  ;;  %1620 = vmatpush.msrb.mxu1 %v9799_v59  ;;  %v692_v3 = vld [vmem:[%s9506_s6] sm:$0xf] }
 0x150   : > { %1643 = vmatpush.msrb.mxu2 %v9800_v12  ;;  %1666 = vmatpush.msrb.mxu3 %v9801_v51  ;;  %v6509_v51 = vperm.slane %v692_v3, 0 }
 0x151   : > { %1598 = vmatpush.msrb.mxu0 %v9802_v62  ;;  %1621 = vmatpush.msrb.mxu1 %v9803_v17  ;;  %v6511_v17 = vperm.slane %v692_v3, 1 }
 0x152   : > { %1644 = vmatpush.msrb.mxu2 %v9804_v63  ;;  %1667 = vmatpush.msrb.mxu3 %v9805_v18 }
 0x153   : > { %1599 = vmatpush.msrb.mxu0 %v9806_v5  ;;  %1622 = vmatpush.msrb.mxu1 %v9807_v10 }
 0x154   : > { %1645 = vmatpush.msrb.mxu2 %v9808_v11  ;;  %1668 = vmatpush.msrb.mxu3 %v9809_v13 }
 0x155   : > { %1600 = vmatpush.msrb.mxu0 %v9810_v14  ;;  %1623 = vmatpush.msrb.mxu1 %v9811_v15 }
 0x156   : > { %1646 = vmatpush.msrb.mxu2 %v9812_v19  ;;  %1669 = vmatpush.msrb.mxu3 %v9813_v20  ;;  %v6517_v20 = vperm.slane %v692_v3, 2 }
 0x157   : > { %1601 = vmatpush.msrb.mxu0 %v9814_v21  ;;  %1624 = vmatpush.msrb.mxu1 %v9815_v22 }
 0x158   : > { %1647 = vmatpush.msrb.mxu2 %v9816_v23  ;;  %1670 = vmatpush.msrb.mxu3 %v9817_v24  ;;  %9830 = vst [vmem:[#allocation19_spill] sm:$0xff] %v6517_v20  ;;  %v3741_v24 = vld [vmem:[%s4993_s27 + $0x40] sm:$0xff] }
 0x159   : > { %1602 = vmatpush.msrb.mxu0 %v9818_v25  ;;  %1625 = vmatpush.msrb.mxu1 %v9819_v26 }
 0x15a   : > { %1648 = vmatpush.msrb.mxu2 %v9820_v27  ;;  %1671 = vmatpush.msrb.mxu3 %v9821_v28  ;;  %v3742_v27 = vld [vmem:[%s4993_s27 + $0x48] sm:$0xff] }
 0x15b   : > { %1603 = vmatpush.msrb.mxu0 %v9822_v29  ;;  %1626 = vmatpush.msrb.mxu1 %v9823_v30 }
 0x15c   : > { %1649 = vmatpush.msrb.mxu2 %v9824_v31  ;;  %1672 = vmatpush.msrb.mxu3 %v9825_v32 }
 0x15d   : > { %1604 = vmatpush.msrb.mxu0 %v9826_v33  ;;  %1627 = vmatpush.msrb.mxu1 %v9827_v34 }
 0x15e   : > { %1650 = vmatpush.msrb.mxu2 %v9828_v36  ;;  %1673 = vmatpush.msrb.mxu3 %v9829_v40 }
 0x170   : > { %v961_v54 = vpop.f32.mrf.mxu0  ;;  %v984_v43 = vpop.f32.mrf.mxu1 }
 0x177   : > { %v1007_v55 = vpop.f32.mrf.mxu2  ;;  %v1030_v9 = vpop.f32.mrf.mxu3 }
 0x17a   : > { %v964_v4 = vpop.f32.mrf.mxu0  ;;  %v987_v50 = vpop.f32.mrf.mxu1 }
 0x181   : > { %v1010_v8 = vpop.f32.mrf.mxu2  ;;  %v6515_v10 = vpop.f32.mrf.mxu3 }
 0x184   : > { %v1053_v59 = vpop.f32.mrf.mxu0  ;;  %v1076_v12 = vpop.f32.mrf.mxu1 }
 0x185   : > { %v1054_v62 = vadd.f32 %v1053_v59, %v961_v54  ;;  %v1077_v63 = vadd.f32 %v1076_v12, %v984_v43 }
 0x187   : > { %v1128_v18 = vadd.f32 %v1054_v62, %v6509_v51  ;;  %v1129_v5 = vadd.f32 %v1077_v63, %v6511_v17  ;;  %v6530_v62 = vperm.slane %v692_v3, 3 }
 0x189   : > { %v3735_v13 = vmul.f32 -1.442695, %v1128_v18  ;;  %v3736_v19 = vmul.f32 -1.442695, %v1129_v5  ;;  %9831 = vst [vmem:[#allocation13_spill] sm:$0xff] %v6530_v62  ;;  %v3743_v5 = vld [vmem:[%s4993_s27 + $0x50] sm:$0xff] }
 0x18b   : > { %v1099_v11 = vpop.f32.mrf.mxu2  ;;  %3905 = vpow2.f32 %v3735_v13  ;;  %v1122_v25 = vpop.f32.mrf.mxu3 }
 0x18c   : > { %v1100_v21 = vadd.f32 %v1099_v11, %v1007_v55  ;;  %3907 = vpow2.f32 %v3736_v19 }
 0x18e   : > { %v1056_v14 = vpop.f32.mrf.mxu0  ;;  %v1079_v15 = vpop.f32.mrf.mxu1  ;;  %v1130_v22 = vadd.f32 %v1100_v21, %v6517_v20 }
 0x18f   : > { %v1057_v23 = vadd.f32 %v1056_v14, %v964_v4  ;;  %v1080_v34 = vadd.f32 %v1079_v15, %v987_v50  ;;  %v1123_v50 = vadd.f32 %v1122_v25, %v1030_v9  ;;  %v3745_v25 = vld [vmem:[%s4993_s27 + $0x60] sm:$0xff] }
 0x190   : > { %v3737_v32 = vmul.f32 -1.442695, %v1130_v22 }
 0x191   : > { %v3906_v28 = vpop.eup %3905  ;;  %v1132_v33 = vadd.f32 %v1057_v23, %v6509_v51  ;;  %v1133_v59 = vadd.f32 %v1080_v34, %v6511_v17  ;;  %v1131_v22 = vadd.f32 %v1123_v50, %v6530_v62 }
 0x192   : > { %v3908_v31 = vpop.eup %3907  ;;  %v6523_v54 = vadd.f32 1.0, %v3906_v28  ;;  %3909 = vpow2.f32 %v3737_v32 }
 0x193   : > { %v6525_v55 = vadd.f32 1.0, %v3908_v31  ;;  %v3738_v4 = vmul.f32 -1.442695, %v1132_v33  ;;  %v3739_v63 = vmul.f32 -1.442695, %v1133_v59 }
 0x194   : > { %vm1165_vm10 = vweird.f32 %v6523_v54 }
 0x195   : > { %v1102_v26 = vpop.f32.mrf.mxu2  ;;  %v1125_v13 = vpop.f32.mrf.mxu3  ;;  %vm1180_vm12 = vweird.f32 %v6525_v55 }
 0x196   : > { %v1103_v18 = vadd.f32 %v1102_v26, %v1010_v8 }
 0x198   : > { %v1288_v29 = vpop.f32.mrf.mxu0  ;;  %v1311_v30 = vpop.f32.mrf.mxu1  ;;  %v1134_v3 = vadd.f32 %v1103_v18, %v6517_v20  ;;  %v3744_v18 = vld [vmem:[%s4993_s27 + $0x58] sm:$0xff] }
 0x199   : > { %v1363_v36 = vadd.f32 %v3741_v24, %v1288_v29  ;;  %v1364_v40 = vadd.f32 %v3742_v27, %v1311_v30  ;;  %v3910_v14 = vpop.eup %3909  ;;  %v3746_v27 = vld [vmem:[%s4993_s27 + $0x68] sm:$0xff] }
 0x19a   : > { %v6544_v30 = vadd.f32 1.0, %v3910_v14  ;;  %v3740_v31 = vmul.f32 -1.442695, %v1134_v3 }
 0x19b   : > { %v3749_v43 = vmul.f32 -1.442695, %v1363_v36  ;;  %v3750_v12 = vmul.f32 -1.442695, %v1364_v40 }
 0x19d   : > { %3911 = vpow2.f32 %v3749_v43 }
 0x19e   : > { %3913 = vrcp.f32 %v6523_v54 }
 0x19f   : > { %3915 = vrcp.f32 %v6525_v55  ;;  %v1334_v11 = vpop.f32.mrf.mxu2 }
 0x1a0   : > { %3917 = vpow2.f32 %v3738_v4  ;;  %v1365_v19 = vadd.f32 %v3743_v5, %v1334_v11  ;;  %v1291_v26 = vpop.f32.mrf.mxu0  ;;  %v1314_v28 = vpop.f32.mrf.mxu1 }
 0x1a1   : > { %3919 = vpow2.f32 %v3750_v12  ;;  %v1367_v36 = vadd.f32 %v3745_v25, %v1291_v26  ;;  %v1368_v40 = vadd.f32 %v3746_v27, %v1314_v28  ;;  %v1357_v5 = vpop.f32.mrf.mxu3 }
 0x1a2   : > { %3921 = vpow2.f32 %v3739_v63  ;;  %v3751_v8 = vmul.f32 -1.442695, %v1365_v19  ;;  %v1126_v63 = vadd.f32 %v1125_v13, %v6515_v10  ;;  %v1366_v26 = vadd.f32 %v3744_v18, %v1357_v5 }
 0x1a3   : > { %v3912_v15 = vpop.eup %3911  ;;  %v3753_v19 = vmul.f32 -1.442695, %v1368_v40 }
 0x1a4   : > { %v6533_v21 = vpop.eup %3913  ;;  %v6537_v9 = vadd.f32 1.0, %v3912_v15  ;;  %v3752_v15 = vmul.f32 -1.442695, %v1367_v36  ;;  %v6571_v27 = vadd.f32 %v1126_v63, %v6530_v62 }
 0x1a5   : > { %v6539_v23 = vpop.eup %3915  ;;  %v1161_v33 = vmul.f32 %v6533_v21, %v6523_v54  ;;  %vm1166_vm9 = vweird.f32 %v6533_v21 }
 0x1a6   : > { %v3918_v24 = vpop.eup %3917  ;;  %3923 = vrcp.f32 %v6537_v9  ;;  %v1176_v4 = vmul.f32 %v6539_v23, %v6525_v55  ;;  %vm1181_vm8 = vweird.f32 %v6539_v23  ;;  %v1406_v40 = vand.u32 2147483648, %v6537_v9  ;;  %vm6622_vm5 = vmor %vm1165_vm10, %vm1166_vm9 }
 0x1a7   : > { %v3920_v29 = vpop.eup %3919  ;;  %3925 = vpow2.f32 %v3751_v8  ;;  %v6550_v34 = vadd.f32 1.0, %v3918_v24  ;;  %v1162_v3 = vsub.f32 1.0, %v1161_v33  ;;  %v1337_v33 = vpop.f32.mrf.mxu2  ;;  %vm1400_vm13 = vweird.f32 %v6537_v9  ;;  %vm6634_vm6 = vmor %vm1180_vm12, %vm1181_vm8 }
 0x1a8   : > { %3927 = vtanh.f32 %v1131_v22  ;;  %v6546_v32 = vadd.f32 1.0, %v3920_v29  ;;  %v3922_v43 = vpop.eup %3921  ;;  %v1177_v10 = vsub.f32 1.0, %v1176_v4  ;;  %v1404_v29 = vand.u32 2147483647, %v6537_v9 }
 0x1a9   : > { %v6563_v8 = vadd.f32 1.0, %v3922_v43  ;;  %v1407_v12 = vor.u32 1.1754944e-38, %v1406_v40 }
 0x1aa   : > { %3929 = vrcp.f32 %v6546_v32  ;;  %v1178_v5 = vmul.f32 %v6539_v23, %v1177_v10  ;;  %vm1405_vm14 = vcmp.eq.f32.partialorder %v1404_v29, 8.507059e+37  ;;  %v1419_v10 = vand.u32 2147483647, %v6546_v32 }
 0x1ab   : > { %3931 = vrcp.f32 %v6544_v30  ;;  %vm1415_vm2 = vweird.f32 %v6546_v32 }
 0x1ac   : > { %v3924_v11 = vpop.eup %3923  ;;  %3933 = vpow2.f32 %v3740_v31  ;;  %v3747_v31 = vld [vmem:[%s4993_s27 + $0x70] sm:$0xff]  ;;  %vm1420_vm4 = vcmp.eq.f32.partialorder %v1419_v10, 8.507059e+37 }
 0x1ad   : > { %v3926_v22 = vpop.eup %3925  ;;  %3935 = vrcp.f32 %v6550_v34  ;;  %v1396_v24 = vmul.f32 %v3924_v11, %v6537_v9  ;;  %vm1401_vm11 = vweird.f32 %v3924_v11  ;;  %v9832_v9 = vand.u32 2147483647, %v6523_v54 }
 0x1ae   : > { %v6566_v25 = vpop.eup %3927  ;;  %v6568_v13 = vadd.f32 1.0, %v3926_v22  ;;  %3937 = vpow2.f32 %v3752_v15  ;;  %v1163_v15 = vmul.f32 %v6533_v21, %v1162_v3  ;;  %vm1402_vm15 = vmor %vm1400_vm13, %vm1401_vm11  ;;  %vm1210_vm11 = vweird.f32 %v6550_v34 }
 0x1af   : > { %v1397_v28 = vsub.f32 1.0, %v1396_v24  ;;  %3939 = vpow2.f32 %v3753_v19  ;;  %v1369_v19 = vadd.f32 %v3747_v31, %v1337_v33  ;;  %vm6599_vm1 = vcmp.eq.f32.partialorder %v9832_v9, 8.507059e+37 }
 0x1b0   : > { %v3930_v36 = vpop.eup %3929  ;;  %3941 = vrcp.f32 %v6568_v13  ;;  %v1164_v33 = vadd.f32 %v6533_v21, %v1163_v15  ;;  %vm1430_vm9 = vweird.f32 %v6568_v13 }
 0x1b1   : > { %v6579_v43 = vpop.eup %3931  ;;  %3943 = vrcp.f32 %v6563_v8  ;;  %v1411_v4 = vmul.f32 %v3930_v36, %v6546_v32  ;;  %v1398_v63 = vmul.f32 %v3924_v11, %v1397_v28  ;;  %v1421_v28 = vand.u32 2147483648, %v6546_v32 }
 0x1b2   : > { %v3934_v18 = vpop.eup %3933  ;;  %3945 = vtanh.f32 %v1366_v26  ;;  %v3754_v59 = vmul.f32 -1.442695, %v1369_v19  ;;  %vm1416_vm0 = vweird.f32 %v3930_v36  ;;  %v9835_v32 = vand.u32 2147483648, %v6525_v55 }
 0x1b3   : > { %v6587_v22 = vpop.eup %3935  ;;  %v1412_v24 = vsub.f32 1.0, %v1411_v4  ;;  %v1399_v14 = vadd.f32 %v3924_v11, %v1398_v63  ;;  %vm1417_vm3 = vmor %vm1415_vm2, %vm1416_vm0 }
 0x1b4   : > { %v3938_v50 = vpop.eup %3937  ;;  %3947 = vpow2.f32 %v3754_v59  ;;  %v1206_v19 = vmul.f32 %v6587_v22, %v6550_v34 }
 0x1b5   : > { %v3940_v62 = vpop.eup %3939  ;;  %v1413_v20 = vmul.f32 %v3930_v36, %v1412_v24  ;;  %v1403_v3 = vsel %vm1402_vm15, %v3924_v11, %v1399_v14  ;;  %v6592_v26 = vadd.f32 1.0, %v3938_v50  ;;  %v1179_v11 = vadd.f32 %v6539_v23, %v1178_v5 }
 0x1b6   : > { %v6594_v31 = vpop.eup %3941  ;;  %v1408_v40 = vsel %vm1405_vm14, %v1407_v12, %v1403_v3  ;;  %v6603_v4 = vadd.f32 1.0, %v3940_v62  ;;  %v1422_v12 = vor.u32 1.1754944e-38, %v1421_v28  ;;  %v1187_v24 = vor.u32 1.1754944e-38, %v9835_v32 }
 0x1b7   : > { %v6605_v63 = vpop.eup %3943  ;;  %v1426_v50 = vmul.f32 %v6594_v31, %v6568_v13  ;;  %v1414_v14 = vadd.f32 %v3930_v36, %v1413_v20  ;;  %3949 = vrcp.f32 %v6592_v26  ;;  %v9838_v28 = vand.u32 2147483648, %v6523_v54 }
 0x1b8   : > { %v3946_v15 = vpop.eup %3945  ;;  %3951 = vrcp.f32 %v6603_v4  ;;  %v6628_v3 = vadd.f32 1.0, %v3934_v18  ;;  %v1183_v32 = vsel %vm6634_vm6, %v6539_v23, %v1179_v11  ;;  %vm1431_vm8 = vweird.f32 %v6594_v31 }
 0x1b9   : > { %v1427_v62 = vsub.f32 1.0, %v1426_v50  ;;  %v1418_v59 = vsel %vm1417_vm3, %v3930_v36, %v1414_v14  ;;  %v1489_v5 = vmul.f32 %v3946_v15, %v1408_v40  ;;  %v1172_v10 = vor.u32 1.1754944e-38, %v9838_v28  ;;  %v3748_v14 = vld [vmem:[%s4993_s27 + $0x78] sm:$0xff]  ;;  %v1360_v15 = vpop.f32.mrf.mxu3  ;;  %vm6685_vm10 = vmor %vm1430_vm9, %vm1431_vm8 }
 0x1ba   : > { %v1423_v36 = vsel %vm1420_vm4, %v1422_v12, %v1418_v59  ;;  %v9841_v40 = vand.u32 2147483647, %v6525_v55  ;;  %3953 = vtanh.f32 %v6571_v27  ;;  %v3948_v12 = vpop.eup %3947  ;;  %v6650_v59 = vmul.f32 %v6579_v43, %v6544_v30 }
 0x1bb   : > { %v1428_v54 = vmul.f32 %v6594_v31, %v1427_v62  ;;  %v1487_v18 = vmul.f32 %v1423_v36, %v6069_v1  ;;  %v1168_v55 = vsel %vm6622_vm5, %v6533_v21, %v1164_v33  ;;  %v1221_v27 = vmul.f32 %v6605_v63, %v6563_v8 }
 0x1bc   : > { %vm6640_vm7 = vcmp.eq.f32.partialorder %v9841_v40, 8.507059e+37  ;;  %v1207_v62 = vsub.f32 1.0, %v1206_v19  ;;  %v1436_v1 = vand.u32 2147483648, %v6568_v13  ;;  %v6663_v36 = vadd.f32 1.0, %v3948_v12 }
 0x1bd   : > { %v6661_v28 = vadd.f32 %v1489_v5, %v1487_v18  ;;  %v3950_v40 = vpop.eup %3949  ;;  %3955 = vrcp.f32 %v6628_v3  ;;  %v1429_v20 = vadd.f32 %v6594_v31, %v1428_v54  ;;  %v1370_v21 = vadd.f32 %v3748_v14, %v1360_v15 }
 0x1be   : > { %v3952_v33 = vpop.eup %3951  ;;  %v6670_v23 = vsel %vm6599_vm1, %v1172_v10, %v1168_v55  ;;  %v6674_v11 = vsel %vm6640_vm7, %v1187_v24, %v1183_v32  ;;  %v1441_v19 = vmul.f32 %v3950_v40, %v6592_v26  ;;  %v1434_v5 = vand.u32 2147483647, %v6568_v13 }
 0x1bf   : > { %9844 = vst [vmem:[#allocation14_spill] sm:$0xff] %v6661_v28  ;;  %3957 = vtanh.f32 %v6661_v28  ;;  %v1456_v9 = vmul.f32 %v3952_v33, %v6603_v4  ;;  %v1222_v29 = vsub.f32 1.0, %v1221_v27  ;;  %v1208_v10 = vmul.f32 %v6587_v22, %v1207_v62 }
 0x1c0   : > { %3959 = vrcp.f32 %v6663_v36  ;;  %v6682_v54 = vpop.eup %3953  ;;  %v1437_v50 = vor.u32 1.1754944e-38, %v1436_v1  ;;  %v1442_v18 = vsub.f32 1.0, %v1441_v19  ;;  %v1433_v14 = vsel %vm6685_vm10, %v6594_v31, %v1429_v20 }
 0x1c1   : > { %v1457_v13 = vsub.f32 1.0, %v1456_v9  ;;  %v1451_v15 = vand.u32 2147483648, %v6592_v26  ;;  %3961 = vtanh.f32 %v1370_v21  ;;  %v1466_v12 = vand.u32 2147483648, %v6603_v4 }
 0x1c2   : > { %v1443_v55 = vmul.f32 %v3950_v40, %v1442_v18  ;;  %vm1446_vm12 = vweird.f32 %v3950_v40  ;;  %v1449_v32 = vand.u32 2147483647, %v6592_v26  ;;  %vm1435_vm13 = vcmp.eq.f32.partialorder %v1434_v5, 8.507059e+37 }
 0x1c3   : > { %v6696_v27 = vpop.eup %3955  ;;  %v1458_v62 = vmul.f32 %v3952_v33, %v1457_v13  ;;  %vm1461_vm14 = vweird.f32 %v3952_v33  ;;  %v1464_v1 = vand.u32 2147483647, %v6603_v4  ;;  %v1223_v20 = vmul.f32 %v6605_v63, %v1222_v29 }
 0x1c4   : > { %v1438_v19 = vsel %vm1435_vm13, %v1437_v50, %v1433_v14  ;;  %v1444_v21 = vadd.f32 %v3950_v40, %v1443_v55  ;;  %vm1445_vm15 = vweird.f32 %v6592_v26  ;;  %vm1460_vm0 = vweird.f32 %v6603_v4 }
 0x1c5   : > { %v3958_v31 = vpop.eup %3957  ;;  %vm1447_vm1 = vmor %vm1445_vm15, %vm1446_vm12  ;;  %v1452_v5 = vor.u32 1.1754944e-38, %v1451_v15  ;;  %v1459_v18 = vadd.f32 %v3952_v33, %v1458_v62  ;;  %v1467_v28 = vor.u32 1.1754944e-38, %v1466_v12  ;;  %vm1450_vm3 = vcmp.eq.f32.partialorder %v1449_v32, 8.507059e+37  ;;  %v708_v15 = vld [vmem:[#allocation5] sm:$0xff] }
 0x1c6   : > { %v6701_v9 = vpop.eup %3959  ;;  %v6703_v24 = vmul.f32 %v3958_v31, %v1438_v19  ;;  %vm6707_vm2 = vmor %vm1460_vm0, %vm1461_vm14  ;;  %v1448_v50 = vsel %vm1447_vm1, %v3950_v40, %v1444_v21  ;;  %vm1211_vm4 = vweird.f32 %v6587_v22  ;;  %vm1465_vm5 = vcmp.eq.f32.partialorder %v1464_v1, 8.507059e+37 }
 0x1c7   : > { %v1471_v29 = vmul.f32 %v6701_v9, %v6663_v36  ;;  %v3962_v26 = vpop.eup %3961  ;;  %v1453_v14 = vsel %vm1450_vm3, %v1452_v5, %v1448_v50  ;;  %v1463_v4 = vsel %vm6707_vm2, %v3952_v33, %v1459_v18  ;;  %v1209_v12 = vadd.f32 %v6587_v22, %v1208_v10  ;;  %vm6740_vm8 = vmor %vm1210_vm11, %vm1211_vm4  ;;  %v4255_v5 = vld [vmem:[%s9503_s3 + $0x138] sm:$0xff]  ;;  %v4257_v50 = vld [vmem:[%s9503_s3 + $0x108] sm:$0xff] }
 0x1c8   : > { %1513 = vmatmul.f32.vlgmr.msra.gmra.mxu0 %v6703_v24  ;;  %1536 = vmatmul.f32.vlgmr.msra.gmra.mxu1 %v6703_v24  ;;  %v1468_v62 = vsel %vm1465_vm5, %v1467_v28, %v1463_v4  ;;  %v1490_v31 = vmul.f32 %v3962_v26, %v1453_v14  ;;  %vm1226_vm6 = vweird.f32 %v6605_v63  ;;  %v1216_v40 = vand.u32 2147483648, %v6550_v34  ;;  %v4258_v14 = vld [vmem:[%s9503_s3 + $0x110] sm:$0xff] }
 0x1c9   : > { %v1472_v55 = vsub.f32 1.0, %v1471_v29  ;;  %1559 = vmatmul.f32.vlgmr.msra.gmra.mxu2 %v6703_v24  ;;  %1582 = vmatmul.f32.vlgmr.msra.gmra.mxu3 %v6703_v24  ;;  %v1224_v33 = vadd.f32 %v6605_v63, %v1223_v20  ;;  %v1488_v32 = vmul.f32 %v1468_v62, %v6091_v48  ;;  %vm1225_vm7 = vweird.f32 %v6563_v8  ;;  %v4256_v29 = vld [vmem:[%s9503_s3 + $0x100] sm:$0xff]  ;;  %v4262_v62 = vld [vmem:[%s9503_s3 + $0xf0] sm:$0xff] }
 0x1ca   : > { %1824 = vmatpush.msra.mxu0 %v6110_v41  ;;  %1847 = vmatpush.msra.mxu1 %v6116_v37  ;;  %v1231_v28 = vand.u32 2147483648, %v6563_v8  ;;  %v1214_v10 = vand.u32 2147483647, %v6550_v34  ;;  %v1252_v20 = vmul.f32 %v6674_v11, %v708_v15  ;;  %v1254_v48 = vmul.f32 %v6566_v25, %v6670_v23  ;;  %vm6751_vm9 = vmor %vm1225_vm7, %vm1226_vm6  ;;  %v4260_v15 = vld [vmem:[%s9503_s3 + $0xe0] sm:$0xff] }
 0x1cb   : > { %v1473_v1 = vmul.f32 %v6701_v9, %v1472_v55  ;;  %1870 = vmatpush.msra.mxu2 %v6125_v38  ;;  %1893 = vmatpush.msra.mxu3 %v6131_v44  ;;  %v1229_v37 = vand.u32 2147483647, %v6563_v8  ;;  %v6745_v19 = vadd.f32 %v1490_v31, %v1488_v32  ;;  %v1213_v44 = vsel %vm6740_vm8, %v6587_v22, %v1209_v12  ;;  %v4261_v12 = vld [vmem:[%s9503_s3 + $0xe8] sm:$0xff]  ;;  %v4263_v31 = vld [vmem:[%s9503_s3 + $0xf8] sm:$0xff] }
 0x1cc   : > { %1825 = vmatpush.msra.mxu0 %v6137_v16  ;;  %1848 = vmatpush.msra.mxu1 %v6143_v46  ;;  %vm1476_vm10 = vweird.f32 %v6701_v9  ;;  %v1192_v16 = vsub.f32 1.0, %v6650_v59  ;;  %v1217_v46 = vor.u32 1.1754944e-38, %v1216_v40  ;;  %v1228_v8 = vsel %vm6751_vm9, %v6605_v63, %v1224_v33  ;;  %v4264_v33 = vld [vmem:[%s9503_s3 + $0xc0] sm:$0xff]  ;;  %v4265_v32 = vld [vmem:[%s9503_s3 + $0xc8] sm:$0xff] }
 0x1cd   : > { %v1474_v34 = vadd.f32 %v6701_v9, %v1473_v1  ;;  %1871 = vmatpush.msra.mxu2 %v6149_v53  ;;  %1894 = vmatpush.msra.mxu3 %v6155_v35  ;;  %v1481_v25 = vand.u32 2147483648, %v6663_v36  ;;  %3963 = vtanh.f32 %v6745_v19  ;;  %v1232_v22 = vor.u32 1.1754944e-38, %v1231_v28  ;;  %v4269_v38 = vld [vmem:[%s9503_s3 + $0xa8] sm:$0xff]  ;;  %v4319_v1 = vld [vmem:[%s9504_s4 + $0x138] sm:$0xff] }
 0x1ce   : > { %1826 = vmatpush.msra.mxu0 %v6161_v2  ;;  %1849 = vmatpush.msra.mxu1 %v6167_v60  ;;  %vm1215_vm11 = vcmp.eq.f32.partialorder %v1214_v10, 8.507059e+37  ;;  %vm1475_vm12 = vweird.f32 %v6663_v36  ;;  %v1479_v53 = vand.u32 2147483647, %v6663_v36  ;;  %v6774_v35 = vadd.f32 %v1254_v48, %v1252_v20  ;;  %v709_v60 = vld [vmem:[#allocation5 + $0x8] sm:$0xff]  ;;  %v4266_v20 = vld [vmem:[%s9503_s3 + $0xd0] sm:$0xff] }
 0x1cf   : > { %1872 = vmatpush.msra.mxu2 %v6175_v57  ;;  %1895 = vmatpush.msra.mxu3 %v6181_v49  ;;  %v1236_v63 = vmul.f32 %v6696_v27, %v6628_v3  ;;  %v1218_v59 = vsel %vm1215_vm11, %v1217_v46, %v1213_v44  ;;  %vm1230_vm13 = vcmp.eq.f32.partialorder %v1229_v37, 8.507059e+37  ;;  %vm6780_vm14 = vmor %vm1475_vm12, %vm1476_vm10  ;;  %v1193_v36 = vmul.f32 %v6579_v43, %v1192_v16  ;;  %v4267_v48 = vld [vmem:[%s9503_s3 + $0xd8] sm:$0xff]  ;;  %v4268_v37 = vld [vmem:[%s9503_s3 + $0xa0] sm:$0xff] }
 0x1d0   : > { %1827 = vmatpush.msra.mxu0 %v6187_v56  ;;  %1850 = vmatpush.msra.mxu1 %v6193_v58  ;;  %v1233_v57 = vsel %vm1230_vm13, %v1232_v22, %v1228_v8  ;;  %v1478_v49 = vsel %vm6780_vm14, %v6701_v9, %v1474_v34  ;;  %v1482_v23 = vor.u32 1.1754944e-38, %v1481_v25  ;;  %vm1480_vm15 = vcmp.eq.f32.partialorder %v1479_v53, 8.507059e+37  ;;  %v4254_v9 = vld [vmem:[%s9503_s3 + $0x130] sm:$0xff]  ;;  %v4272_v16 = vld [vmem:[%s9503_s3 + $0x80] sm:$0xff]  ;;  %v4273_v46 = vld [vmem:[%s9503_s3 + $0x88] sm:$0xff] }
 0x1d1   : > { %1873 = vmatpush.msra.mxu2 %v6199_v6  ;;  %1896 = vmatpush.msra.mxu3 %v6205_v47  ;;  %v1253_v58 = vmul.f32 %v1233_v57, %v709_v60  ;;  %v1255_v11 = vmul.f32 %v6682_v54, %v1218_v59  ;;  %3965 = vtanh.f32 %v6774_v35  ;;  %v9855_v47 = vld [vmem:[#allocation114_spill] sm:$0xff]  ;;  %vm1196_vm0 = vweird.f32 %v6579_v43  ;;  %v4270_v34 = vld [vmem:[%s9503_s3 + $0xb0] sm:$0xff]  ;;  %v4275_v22 = vld [vmem:[%s9503_s3 + $0x98] sm:$0xff] }
 0x1d2   : > { %1828 = vmatpush.msra.mxu0 %v6215_v7  ;;  %1851 = vmatpush.msra.mxu1 %v6221_v0  ;;  %v1483_v21 = vsel %vm1480_vm15, %v1482_v23, %v1478_v49  ;;  %v1194_v7 = vadd.f32 %v6579_v43, %v1193_v36  ;;  %v1237_v0 = vsub.f32 1.0, %v1236_v63  ;;  %vm1195_vm1 = vweird.f32 %v6544_v30  ;;  %v4274_v25 = vld [vmem:[%s9503_s3 + $0x90] sm:$0xff]  ;;  %v4276_v63 = vld [vmem:[%s9503_s3 + $0x60] sm:$0xff]  ;;  %v4277_v59 = vld [vmem:[%s9503_s3 + $0x68] sm:$0xff] }
 0x1d3   : > { %1874 = vmatpush.msra.mxu2 %v6227_v61  ;;  %1897 = vmatpush.msra.mxu3 %v6233_v45  ;;  %v3964_v56 = vpop.eup %3963  ;;  %v4252_v61 = vld [vmem:[%s9503_s3 + $0x120] sm:$0xff]  ;;  %v4253_v45 = vld [vmem:[%s9503_s3 + $0x128] sm:$0xff]  ;;  %vm6821_vm2 = vmor %vm1195_vm1, %vm1196_vm0  ;;  %vm1241_vm4 = vweird.f32 %v6696_v27  ;;  %v1246_v28 = vand.u32 2147483648, %v6628_v3  ;;  %vm1240_vm5 = vweird.f32 %v6628_v3  ;;  %v1244_v10 = vand.u32 2147483647, %v6628_v3 }
 0x1d4   : > { %1829 = vmatpush.msra.mxu0 %v6239_v52  ;;  %1852 = vmatpush.msra.mxu1 %v6245_v39  ;;  %v6800_v6 = vmul.f32 %v3964_v56, %v1483_v21  ;;  %v1201_v52 = vand.u32 2147483648, %v6544_v30  ;;  %v1199_v39 = vand.u32 2147483647, %v6544_v30  ;;  %v1198_v30 = vsel %vm6821_vm2, %v6579_v43, %v1194_v7  ;;  %v4259_v43 = vld [vmem:[%s9503_s3 + $0x118] sm:$0xff]  ;;  %vm6871_vm6 = vmor %vm1240_vm5, %vm1241_vm4  ;;  %v4278_v2 = vld [vmem:[%s9503_s3 + $0x70] sm:$0xff] }
 0x1d5   : > { %1875 = vmatpush.msra.mxu2 %v6251_v42  ;;  %1898 = vmatpush.msra.mxu3 %v9855_v47  ;;  %v6817_v42 = vadd.f32 %v1255_v11, %v1253_v58  ;;  %v1238_v18 = vmul.f32 %v6696_v27, %v1237_v0  ;;  %v1247_v44 = vor.u32 1.1754944e-38, %v1246_v28  ;;  %vm1245_vm7 = vcmp.eq.f32.partialorder %v1244_v10, 8.507059e+37  ;;  %v4279_v60 = vld [vmem:[%s9503_s3 + $0x78] sm:$0xff]  ;;  %v4280_v57 = vld [vmem:[%s9503_s3 + $0x40] sm:$0xff]  ;;  %v4281_v49 = vld [vmem:[%s9503_s3 + $0x48] sm:$0xff] }
 0x1d6   : > { %1830 = vmatpush.msra.mxu0 %v4252_v61  ;;  %1853 = vmatpush.msra.mxu1 %v4253_v45  ;;  %v1202_v26 = vor.u32 1.1754944e-38, %v1201_v52  ;;  %vm1200_vm3 = vcmp.eq.f32.partialorder %v1199_v39, 8.507059e+37  ;;  %v4282_v36 = vld [vmem:[%s9503_s3 + $0x50] sm:$0xff]  ;;  %v4283_v23 = vld [vmem:[%s9503_s3 + $0x58] sm:$0xff]  ;;  %v4284_v56 = vld [vmem:[%s9503_s3 + $0x20] sm:$0xff] }
 0x1d7   : > { %1516 = vmatmul.f32.gmra.mxu0 %v6800_v6  ;;  %1539 = vmatmul.f32.gmra.mxu1 %v6800_v6  ;;  %v3966_v13 = vpop.eup %3965  ;;  %3967 = vtanh.f32 %v6817_v42  ;;  %v1239_v40 = vadd.f32 %v6696_v27, %v1238_v18  ;;  %v4285_v58 = vld [vmem:[%s9503_s3 + $0x28] sm:$0xff]  ;;  %v4286_v11 = vld [vmem:[%s9503_s3 + $0x30] sm:$0xff]  ;;  %v4287_v21 = vld [vmem:[%s9503_s3 + $0x38] sm:$0xff] }
 0x1d8   : > { %1562 = vmatmul.f32.gmra.mxu2 %v6800_v6  ;;  %1585 = vmatmul.f32.gmra.mxu3 %v6800_v6  ;;  %v1203_v4 = vsel %vm1200_vm3, %v1202_v26, %v1198_v30  ;;  %v4288_v47 = vld [vmem:[%s9503_s3] sm:$0xff]  ;;  %v4289_v7 = vld [vmem:[%s9503_s3 + $0x8] sm:$0xff]  ;;  %v4290_v0 = vld [vmem:[%s9503_s3 + $0x10] sm:$0xff] }
 0x1d9   : > { %1876 = vmatpush.msra.mxu2 %v4254_v9  ;;  %1899 = vmatpush.msra.mxu3 %v4255_v5  ;;  %v1260_v55 = vmul.f32 %v3966_v13, %v1203_v4  ;;  %v1243_v3 = vsel %vm6871_vm6, %v6696_v27, %v1239_v40  ;;  %v4271_v27 = vld [vmem:[%s9503_s3 + $0xb8] sm:$0xff]  ;;  %v4292_v45 = vld [vmem:[%s9504_s4 + $0x1e0] sm:$0xff]  ;;  %v4293_v52 = vld [vmem:[%s9504_s4 + $0x1e8] sm:$0xff] }
 0x1da   : > { %1831 = vmatpush.msra.mxu0 %v4256_v29  ;;  %1854 = vmatpush.msra.mxu1 %v4257_v50  ;;  %v1248_v8 = vsel %vm1245_vm7, %v1247_v44, %v1243_v3  ;;  %v4291_v61 = vld [vmem:[%s9503_s3 + $0x18] sm:$0xff]  ;;  %v4294_v39 = vld [vmem:[%s9504_s4 + $0x1f0] sm:$0xff]  ;;  %v4297_v9 = vld [vmem:[%s9504_s4 + $0x1c8] sm:$0xff] }
 0x1db   : > { %1877 = vmatpush.msra.mxu2 %v4258_v14  ;;  %1900 = vmatpush.msra.mxu3 %v4259_v43  ;;  %v4295_v54 = vld [vmem:[%s9504_s4 + $0x1f8] sm:$0xff]  ;;  %v4298_v5 = vld [vmem:[%s9504_s4 + $0x1d0] sm:$0xff]  ;;  %v4300_v18 = vld [vmem:[%s9504_s4 + $0x1a0] sm:$0xff] }
 0x1dc   : > { %1832 = vmatpush.msra.mxu0 %v4260_v15  ;;  %1855 = vmatpush.msra.mxu1 %v4261_v12  ;;  %v4299_v30 = vld [vmem:[%s9504_s4 + $0x1d8] sm:$0xff]  ;;  %v4301_v13 = vld [vmem:[%s9504_s4 + $0x1a8] sm:$0xff]  ;;  %v4302_v29 = vld [vmem:[%s9504_s4 + $0x1b0] sm:$0xff] }
 0x1dd   : > { %1878 = vmatpush.msra.mxu2 %v4262_v62  ;;  %1901 = vmatpush.msra.mxu3 %v4263_v31  ;;  %v3968_v41 = vpop.eup %3967  ;;  %v4303_v50 = vld [vmem:[%s9504_s4 + $0x1b8] sm:$0xff]  ;;  %v4304_v26 = vld [vmem:[%s9504_s4 + $0x180] sm:$0xff]  ;;  %v4305_v14 = vld [vmem:[%s9504_s4 + $0x188] sm:$0xff] }
 0x1de   : > { %1833 = vmatpush.msra.mxu0 %v4264_v33  ;;  %1856 = vmatpush.msra.mxu1 %v4265_v32  ;;  %v1261_v53 = vmul.f32 %v3968_v41, %v1248_v8  ;;  %v4306_v43 = vld [vmem:[%s9504_s4 + $0x190] sm:$0xff]  ;;  %v4307_v4 = vld [vmem:[%s9504_s4 + $0x198] sm:$0xff]  ;;  %v4309_v15 = vld [vmem:[%s9504_s4 + $0x168] sm:$0xff] }
 0x1df   : > { %1605 = vmatmul.f32.vlgmr.msrb.gmra.mxu0 %v1260_v55  ;;  %1628 = vmatmul.f32.vlgmr.msrb.gmra.mxu1 %v1260_v55  ;;  %v4310_v12 = vld [vmem:[%s9504_s4 + $0x170] sm:$0xff]  ;;  %v4312_v62 = vld [vmem:[%s9504_s4 + $0x140] sm:$0xff]  ;;  %v4313_v31 = vld [vmem:[%s9504_s4 + $0x148] sm:$0xff] }
 0x1e0   : > { %1651 = vmatmul.f32.vlgmr.msrb.gmra.mxu2 %v1260_v55  ;;  %1674 = vmatmul.f32.vlgmr.msrb.gmra.mxu3 %v1260_v55  ;;  %v4311_v55 = vld [vmem:[%s9504_s4 + $0x178] sm:$0xff]  ;;  %v4314_v40 = vld [vmem:[%s9504_s4 + $0x150] sm:$0xff]  ;;  %v4316_v32 = vld [vmem:[%s9504_s4 + $0x120] sm:$0xff] }
 0x1e1   : > { %1879 = vmatpush.msra.mxu2 %v4266_v20  ;;  %1902 = vmatpush.msra.mxu3 %v4267_v48  ;;  %v4315_v33 = vld [vmem:[%s9504_s4 + $0x158] sm:$0xff]  ;;  %v4317_v28 = vld [vmem:[%s9504_s4 + $0x128] sm:$0xff]  ;;  %v4318_v10 = vld [vmem:[%s9504_s4 + $0x130] sm:$0xff] }
 0x1e2   : > { %1834 = vmatpush.msra.mxu0 %v4268_v37  ;;  %1857 = vmatpush.msra.mxu1 %v4269_v38  ;;  %v4320_v20 = vld [vmem:[%s9504_s4 + $0x100] sm:$0xff]  ;;  %v4321_v48 = vld [vmem:[%s9504_s4 + $0x108] sm:$0xff]  ;;  %v4322_v3 = vld [vmem:[%s9504_s4 + $0x110] sm:$0xff] }
 0x1e3   : > { %1880 = vmatpush.msra.mxu2 %v4270_v34  ;;  %1903 = vmatpush.msra.mxu3 %v4271_v27  ;;  %v4323_v41 = vld [vmem:[%s9504_s4 + $0x118] sm:$0xff]  ;;  %v4324_v37 = vld [vmem:[%s9504_s4 + $0xe0] sm:$0xff]  ;;  %v4325_v38 = vld [vmem:[%s9504_s4 + $0xe8] sm:$0xff] }
 0x1e4   : > { %1835 = vmatpush.msra.mxu0 %v4272_v16  ;;  %1858 = vmatpush.msra.mxu1 %v4273_v46  ;;  %v4326_v44 = vld [vmem:[%s9504_s4 + $0xf0] sm:$0xff]  ;;  %v4327_v34 = vld [vmem:[%s9504_s4 + $0xf8] sm:$0xff]  ;;  %v4328_v27 = vld [vmem:[%s9504_s4 + $0xc0] sm:$0xff] }
 0x1e5   : > { %1881 = vmatpush.msra.mxu2 %v4274_v25  ;;  %1904 = vmatpush.msra.mxu3 %v4275_v22  ;;  %v4329_v16 = vld [vmem:[%s9504_s4 + $0xc8] sm:$0xff]  ;;  %v4330_v46 = vld [vmem:[%s9504_s4 + $0xd0] sm:$0xff]  ;;  %v4331_v8 = vld [vmem:[%s9504_s4 + $0xd8] sm:$0xff] }
 0x1e6   : > { %1836 = vmatpush.msra.mxu0 %v4276_v63  ;;  %1859 = vmatpush.msra.mxu1 %v4277_v59  ;;  %v4332_v25 = vld [vmem:[%s9504_s4 + $0xa0] sm:$0xff]  ;;  %v4333_v22 = vld [vmem:[%s9504_s4 + $0xa8] sm:$0xff]  ;;  %v4335_v63 = vld [vmem:[%s9504_s4 + $0xb8] sm:$0xff] }
 0x1e7   : > { %1608 = vmatmul.f32.gmra.mxu0 %v1261_v53  ;;  %1631 = vmatmul.f32.gmra.mxu1 %v1261_v53  ;;  %v4336_v59 = vld [vmem:[%s9504_s4 + $0x80] sm:$0xff] }
 0x1e8   : > { %1654 = vmatmul.f32.gmra.mxu2 %v1261_v53  ;;  %1677 = vmatmul.f32.gmra.mxu3 %v1261_v53  ;;  %v4334_v53 = vld [vmem:[%s9504_s4 + $0xb0] sm:$0xff] }
 0x1e9   : > { %1882 = vmatpush.msra.mxu2 %v4278_v2  ;;  %1905 = vmatpush.msra.mxu3 %v4279_v60  ;;  %v4337_v2 = vld [vmem:[%s9504_s4 + $0x88] sm:$0xff]  ;;  %v4338_v60 = vld [vmem:[%s9504_s4 + $0x90] sm:$0xff] }
 0x1ea   : > { %1837 = vmatpush.msra.mxu0 %v4280_v57  ;;  %1860 = vmatpush.msra.mxu1 %v4281_v49  ;;  %v4339_v57 = vld [vmem:[%s9504_s4 + $0x98] sm:$0xff]  ;;  %v4340_v49 = vld [vmem:[%s9504_s4 + $0x60] sm:$0xff] }
 0x1eb   : > { %1883 = vmatpush.msra.mxu2 %v4282_v36  ;;  %1906 = vmatpush.msra.mxu3 %v4283_v23  ;;  %v4341_v36 = vld [vmem:[%s9504_s4 + $0x68] sm:$0xff]  ;;  %v4342_v23 = vld [vmem:[%s9504_s4 + $0x70] sm:$0xff] }
 0x1ec   : > { %1838 = vmatpush.msra.mxu0 %v4284_v56  ;;  %1861 = vmatpush.msra.mxu1 %v4285_v58  ;;  %v4343_v56 = vld [vmem:[%s9504_s4 + $0x78] sm:$0xff]  ;;  %v4344_v58 = vld [vmem:[%s9504_s4 + $0x40] sm:$0xff] }
 0x1ed   : > { %1884 = vmatpush.msra.mxu2 %v4286_v11  ;;  %1907 = vmatpush.msra.mxu3 %v4287_v21  ;;  %v4345_v11 = vld [vmem:[%s9504_s4 + $0x48] sm:$0xff]  ;;  %v4346_v21 = vld [vmem:[%s9504_s4 + $0x50] sm:$0xff] }
 0x1ee   : > { %1839 = vmatpush.msra.mxu0 %v4288_v47  ;;  %1862 = vmatpush.msra.mxu1 %v4289_v7  ;;  %v4347_v47 = vld [vmem:[%s9504_s4 + $0x58] sm:$0xff]  ;;  %v4348_v7 = vld [vmem:[%s9504_s4 + $0x20] sm:$0xff] }
 0x1ef   : > { %1885 = vmatpush.msra.mxu2 %v4290_v0  ;;  %1908 = vmatpush.msra.mxu3 %v4291_v61  ;;  %v4349_v0 = vld [vmem:[%s9504_s4 + $0x28] sm:$0xff]  ;;  %v4350_v61 = vld [vmem:[%s9504_s4 + $0x30] sm:$0xff] }
 0x1f0   : > { %1840 = vmatmul.f32.vlgmr.msra.gmra.mxu0 %v6703_v24  ;;  %1863 = vmatmul.f32.vlgmr.msra.gmra.mxu1 %v6703_v24 }
 0x1f1   : > { %1886 = vmatmul.f32.vlgmr.msra.gmra.mxu2 %v6703_v24  ;;  %1909 = vmatmul.f32.vlgmr.msra.gmra.mxu3 %v6703_v24  ;;  %v4296_v24 = vld [vmem:[%s9504_s4 + $0x1c0] sm:$0xff] }
 0x1f2   : > { %2050 = vmatpush.msrb.mxu0 %v4292_v45  ;;  %2073 = vmatpush.msrb.mxu1 %v4293_v52  ;;  %v4351_v45 = vld [vmem:[%s9504_s4 + $0x38] sm:$0xff]  ;;  %v4352_v52 = vld [vmem:[%s9504_s4] sm:$0xff] }
 0x1f3   : > { %2096 = vmatpush.msrb.mxu2 %v4294_v39  ;;  %2119 = vmatpush.msrb.mxu3 %v4295_v54  ;;  %v4353_v39 = vld [vmem:[%s9504_s4 + $0x8] sm:$0xff]  ;;  %v4354_v54 = vld [vmem:[%s9504_s4 + $0x10] sm:$0xff] }
 0x1f4   : > { %2051 = vmatpush.msrb.mxu0 %v4296_v24  ;;  %2074 = vmatpush.msrb.mxu1 %v4297_v9  ;;  %v4355_v24 = vld [vmem:[%s9504_s4 + $0x18] sm:$0xff]  ;;  %v4356_v9 = vld [vmem:[%s9505_s5 + $0x1e0] sm:$0xff] }
 0x1f5   : > { %2097 = vmatpush.msrb.mxu2 %v4298_v5  ;;  %2120 = vmatpush.msrb.mxu3 %v4299_v30  ;;  %v4357_v5 = vld [vmem:[%s9505_s5 + $0x1e8] sm:$0xff]  ;;  %v4358_v30 = vld [vmem:[%s9505_s5 + $0x1f0] sm:$0xff] }
 0x1f6   : > { %2052 = vmatpush.msrb.mxu0 %v4300_v18  ;;  %2075 = vmatpush.msrb.mxu1 %v4301_v13  ;;  %v4359_v18 = vld [vmem:[%s9505_s5 + $0x1f8] sm:$0xff]  ;;  %v4360_v13 = vld [vmem:[%s9505_s5 + $0x1c0] sm:$0xff] }
 0x1f7   : > { %2098 = vmatpush.msrb.mxu2 %v4302_v29  ;;  %2121 = vmatpush.msrb.mxu3 %v4303_v50  ;;  %v4361_v29 = vld [vmem:[%s9505_s5 + $0x1c8] sm:$0xff]  ;;  %v4362_v50 = vld [vmem:[%s9505_s5 + $0x1d0] sm:$0xff] }
 0x1f8   : > { %1843 = vmatmul.f32.gmra.mxu0 %v6800_v6  ;;  %1866 = vmatmul.f32.gmra.mxu1 %v6800_v6 }
 0x1f9   : > { %1889 = vmatmul.f32.gmra.mxu2 %v6800_v6  ;;  %1912 = vmatmul.f32.gmra.mxu3 %v6800_v6  ;;  %v4308_v6 = vld [vmem:[%s9504_s4 + $0x160] sm:$0xff] }
 0x1fa   : > { %2053 = vmatpush.msrb.mxu0 %v4304_v26  ;;  %2076 = vmatpush.msrb.mxu1 %v4305_v14  ;;  %v4363_v26 = vld [vmem:[%s9505_s5 + $0x1d8] sm:$0xff]  ;;  %v4364_v14 = vld [vmem:[%s9505_s5 + $0x1a0] sm:$0xff] }
 0x1fb   : > { %2099 = vmatpush.msrb.mxu2 %v4306_v43  ;;  %2122 = vmatpush.msrb.mxu3 %v4307_v4  ;;  %v4365_v43 = vld [vmem:[%s9505_s5 + $0x1a8] sm:$0xff]  ;;  %v4366_v4 = vld [vmem:[%s9505_s5 + $0x1b0] sm:$0xff] }
 0x1fc   : > { %2054 = vmatpush.msrb.mxu0 %v4308_v6  ;;  %2077 = vmatpush.msrb.mxu1 %v4309_v15  ;;  %v4367_v6 = vld [vmem:[%s9505_s5 + $0x1b8] sm:$0xff]  ;;  %v4368_v15 = vld [vmem:[%s9505_s5 + $0x180] sm:$0xff] }
 0x1fd   : > { %2100 = vmatpush.msrb.mxu2 %v4310_v12  ;;  %2123 = vmatpush.msrb.mxu3 %v4311_v55  ;;  %v4369_v12 = vld [vmem:[%s9505_s5 + $0x188] sm:$0xff]  ;;  %v4370_v55 = vld [vmem:[%s9505_s5 + $0x190] sm:$0xff] }
 0x1fe   : > { %2055 = vmatpush.msrb.mxu0 %v4312_v62  ;;  %2078 = vmatpush.msrb.mxu1 %v4313_v31  ;;  %v4371_v62 = vld [vmem:[%s9505_s5 + $0x198] sm:$0xff]  ;;  %v4372_v31 = vld [vmem:[%s9505_s5 + $0x160] sm:$0xff] }
 0x1ff   : > { %2101 = vmatpush.msrb.mxu2 %v4314_v40  ;;  %2124 = vmatpush.msrb.mxu3 %v4315_v33  ;;  %v4373_v40 = vld [vmem:[%s9505_s5 + $0x168] sm:$0xff]  ;;  %v4374_v33 = vld [vmem:[%s9505_s5 + $0x170] sm:$0xff] }
 0x200   : > { %2056 = vmatpush.msrb.mxu0 %v4316_v32  ;;  %2079 = vmatpush.msrb.mxu1 %v4317_v28  ;;  %v4375_v32 = vld [vmem:[%s9505_s5 + $0x178] sm:$0xff]  ;;  %v4376_v28 = vld [vmem:[%s9505_s5 + $0x140] sm:$0xff] }
 0x201   : > { %2102 = vmatpush.msrb.mxu2 %v4318_v10  ;;  %2125 = vmatpush.msrb.mxu3 %v4319_v1  ;;  %v4377_v10 = vld [vmem:[%s9505_s5 + $0x148] sm:$0xff]  ;;  %v4378_v1 = vld [vmem:[%s9505_s5 + $0x150] sm:$0xff] }
 0x202   : > { %2057 = vmatpush.msrb.mxu0 %v4320_v20  ;;  %2080 = vmatpush.msrb.mxu1 %v4321_v48  ;;  %v4379_v20 = vld [vmem:[%s9505_s5 + $0x158] sm:$0xff]  ;;  %v4380_v48 = vld [vmem:[%s9505_s5 + $0x120] sm:$0xff] }
 0x203   : > { %2103 = vmatpush.msrb.mxu2 %v4322_v3  ;;  %2126 = vmatpush.msrb.mxu3 %v4323_v41  ;;  %v4381_v3 = vld [vmem:[%s9505_s5 + $0x128] sm:$0xff]  ;;  %v4382_v41 = vld [vmem:[%s9505_s5 + $0x130] sm:$0xff] }
 0x204   : > { %2058 = vmatpush.msrb.mxu0 %v4324_v37  ;;  %2081 = vmatpush.msrb.mxu1 %v4325_v38  ;;  %v4383_v37 = vld [vmem:[%s9505_s5 + $0x138] sm:$0xff]  ;;  %v4384_v38 = vld [vmem:[%s9505_s5 + $0x100] sm:$0xff] }
 0x205   : > { %2104 = vmatpush.msrb.mxu2 %v4326_v44  ;;  %2127 = vmatpush.msrb.mxu3 %v4327_v34  ;;  %v4385_v44 = vld [vmem:[%s9505_s5 + $0x108] sm:$0xff]  ;;  %v4386_v34 = vld [vmem:[%s9505_s5 + $0x110] sm:$0xff] }
 0x206   : > { %2059 = vmatpush.msrb.mxu0 %v4328_v27  ;;  %2082 = vmatpush.msrb.mxu1 %v4329_v16  ;;  %v4387_v27 = vld [vmem:[%s9505_s5 + $0x118] sm:$0xff]  ;;  %v4388_v16 = vld [vmem:[%s9505_s5 + $0xe0] sm:$0xff] }
 0x207   : > { %2105 = vmatpush.msrb.mxu2 %v4330_v46  ;;  %2128 = vmatpush.msrb.mxu3 %v4331_v8  ;;  %v4389_v46 = vld [vmem:[%s9505_s5 + $0xe8] sm:$0xff]  ;;  %v4390_v8 = vld [vmem:[%s9505_s5 + $0xf0] sm:$0xff] }
 0x208   : > { %2060 = vmatpush.msrb.mxu0 %v4332_v25  ;;  %2083 = vmatpush.msrb.mxu1 %v4333_v22  ;;  %v4391_v25 = vld [vmem:[%s9505_s5 + $0xf8] sm:$0xff]  ;;  %v4392_v22 = vld [vmem:[%s9505_s5 + $0xc0] sm:$0xff] }
 0x209   : > { %2106 = vmatpush.msrb.mxu2 %v4334_v53  ;;  %2129 = vmatpush.msrb.mxu3 %v4335_v63  ;;  %v4393_v53 = vld [vmem:[%s9505_s5 + $0xc8] sm:$0xff]  ;;  %v4394_v63 = vld [vmem:[%s9505_s5 + $0xd0] sm:$0xff] }
 0x20a   : > { %2061 = vmatpush.msrb.mxu0 %v4336_v59  ;;  %2084 = vmatpush.msrb.mxu1 %v4337_v2  ;;  %v4395_v59 = vld [vmem:[%s9505_s5 + $0xd8] sm:$0xff]  ;;  %v4396_v2 = vld [vmem:[%s9505_s5 + $0xa0] sm:$0xff] }
 0x20b   : > { %2107 = vmatpush.msrb.mxu2 %v4338_v60  ;;  %2130 = vmatpush.msrb.mxu3 %v4339_v57  ;;  %v4397_v60 = vld [vmem:[%s9505_s5 + $0xa8] sm:$0xff]  ;;  %v4398_v57 = vld [vmem:[%s9505_s5 + $0xb0] sm:$0xff] }
 0x20c   : > { %2062 = vmatpush.msrb.mxu0 %v4340_v49  ;;  %2085 = vmatpush.msrb.mxu1 %v4341_v36  ;;  %v4399_v49 = vld [vmem:[%s9505_s5 + $0xb8] sm:$0xff]  ;;  %v4400_v36 = vld [vmem:[%s9505_s5 + $0x80] sm:$0xff] }
 0x20d   : > { %2108 = vmatpush.msrb.mxu2 %v4342_v23  ;;  %2131 = vmatpush.msrb.mxu3 %v4343_v56  ;;  %v4401_v23 = vld [vmem:[%s9505_s5 + $0x88] sm:$0xff]  ;;  %v4402_v56 = vld [vmem:[%s9505_s5 + $0x90] sm:$0xff] }
 0x20e   : > { %2063 = vmatpush.msrb.mxu0 %v4344_v58  ;;  %2086 = vmatpush.msrb.mxu1 %v4345_v11  ;;  %v4403_v58 = vld [vmem:[%s9505_s5 + $0x98] sm:$0xff]  ;;  %v4404_v11 = vld [vmem:[%s9505_s5 + $0x60] sm:$0xff] }
 0x20f   : > { %2109 = vmatpush.msrb.mxu2 %v4346_v21  ;;  %2132 = vmatpush.msrb.mxu3 %v4347_v47  ;;  %v4405_v21 = vld [vmem:[%s9505_s5 + $0x68] sm:$0xff]  ;;  %v4406_v47 = vld [vmem:[%s9505_s5 + $0x70] sm:$0xff] }
 0x210   : > { %2064 = vmatpush.msrb.mxu0 %v4348_v7  ;;  %2087 = vmatpush.msrb.mxu1 %v4349_v0  ;;  %v4407_v7 = vld [vmem:[%s9505_s5 + $0x78] sm:$0xff]  ;;  %v4408_v0 = vld [vmem:[%s9505_s5 + $0x40] sm:$0xff] }
 0x211   : > { %2110 = vmatpush.msrb.mxu2 %v4350_v61  ;;  %2133 = vmatpush.msrb.mxu3 %v4351_v45  ;;  %v4409_v61 = vld [vmem:[%s9505_s5 + $0x48] sm:$0xff]  ;;  %v4410_v45 = vld [vmem:[%s9505_s5 + $0x50] sm:$0xff] }
 0x212   : > { %2065 = vmatpush.msrb.mxu0 %v4352_v52  ;;  %2088 = vmatpush.msrb.mxu1 %v4353_v39  ;;  %v4411_v52 = vld [vmem:[%s9505_s5 + $0x58] sm:$0xff]  ;;  %v4412_v39 = vld [vmem:[%s9505_s5 + $0x20] sm:$0xff] }
 0x213   : > { %2111 = vmatpush.msrb.mxu2 %v4354_v54  ;;  %2134 = vmatpush.msrb.mxu3 %v4355_v24  ;;  %v4413_v54 = vld [vmem:[%s9505_s5 + $0x28] sm:$0xff]  ;;  %v4414_v24 = vld [vmem:[%s9505_s5 + $0x30] sm:$0xff] }
 0x214   : > { %2142 = vmatpush.msra.mxu0 %v4356_v9  ;;  %2165 = vmatpush.msra.mxu1 %v4357_v5  ;;  %v4415_v9 = vld [vmem:[%s9505_s5 + $0x38] sm:$0xff]  ;;  %v4416_v5 = vld [vmem:[%s9505_s5] sm:$0xff] }
 0x215   : > { %2188 = vmatpush.msra.mxu2 %v4358_v30  ;;  %2211 = vmatpush.msra.mxu3 %v4359_v18  ;;  %v4417_v30 = vld [vmem:[%s9505_s5 + $0x8] sm:$0xff]  ;;  %v4418_v18 = vld [vmem:[%s9505_s5 + $0x10] sm:$0xff] }
 0x216   : > { %2143 = vmatpush.msra.mxu0 %v4360_v13  ;;  %2166 = vmatpush.msra.mxu1 %v4361_v29  ;;  %v4419_v13 = vld [vmem:[%s9505_s5 + $0x18] sm:$0xff] }
 0x217   : > { %2189 = vmatpush.msra.mxu2 %v4362_v50  ;;  %2212 = vmatpush.msra.mxu3 %v4363_v26 }
 0x218   : > { %2144 = vmatpush.msra.mxu0 %v4364_v14  ;;  %2167 = vmatpush.msra.mxu1 %v4365_v43 }
 0x219   : > { %2190 = vmatpush.msra.mxu2 %v4366_v4  ;;  %2213 = vmatpush.msra.mxu3 %v4367_v6 }
 0x21a   : > { %2145 = vmatpush.msra.mxu0 %v4368_v15  ;;  %2168 = vmatpush.msra.mxu1 %v4369_v12 }
 0x21b   : > { %2191 = vmatpush.msra.mxu2 %v4370_v55  ;;  %2214 = vmatpush.msra.mxu3 %v4371_v62 }
 0x21c   : > { %2146 = vmatpush.msra.mxu0 %v4372_v31  ;;  %2169 = vmatpush.msra.mxu1 %v4373_v40 }
 0x21d   : > { %2192 = vmatpush.msra.mxu2 %v4374_v33  ;;  %2215 = vmatpush.msra.mxu3 %v4375_v32 }
 0x21e   : > { %2147 = vmatpush.msra.mxu0 %v4376_v28  ;;  %2170 = vmatpush.msra.mxu1 %v4377_v10 }
 0x21f   : > { %2193 = vmatpush.msra.mxu2 %v4378_v1  ;;  %2216 = vmatpush.msra.mxu3 %v4379_v20 }
 0x220   : > { %2148 = vmatpush.msra.mxu0 %v4380_v48  ;;  %2171 = vmatpush.msra.mxu1 %v4381_v3 }
 0x221   : > { %2194 = vmatpush.msra.mxu2 %v4382_v41  ;;  %2217 = vmatpush.msra.mxu3 %v4383_v37 }
 0x222   : > { %2149 = vmatpush.msra.mxu0 %v4384_v38  ;;  %2172 = vmatpush.msra.mxu1 %v4385_v44 }
 0x223   : > { %2195 = vmatpush.msra.mxu2 %v4386_v34  ;;  %2218 = vmatpush.msra.mxu3 %v4387_v27  ;;  %v3761_v34 = vld [vmem:[%s4993_s27 + $0x80] sm:$0xff] }
 0x224   : > { %2150 = vmatpush.msra.mxu0 %v4388_v16  ;;  %2173 = vmatpush.msra.mxu1 %v4389_v46  ;;  %v3762_v46 = vld [vmem:[%s4993_s27 + $0x88] sm:$0xff] }
 0x225   : > { %2196 = vmatpush.msra.mxu2 %v4390_v8  ;;  %2219 = vmatpush.msra.mxu3 %v4391_v25 }
 0x226   : > { %2151 = vmatpush.msra.mxu0 %v4392_v22  ;;  %2174 = vmatpush.msra.mxu1 %v4393_v53  ;;  %v9860_v22 = vld [vmem:[#allocation19_spill] sm:$0xff] }
 0x227   : > { %2197 = vmatpush.msra.mxu2 %v4394_v63  ;;  %2220 = vmatpush.msra.mxu3 %v4395_v59 }
 0x228   : > { %2152 = vmatpush.msra.mxu0 %v4396_v2  ;;  %2175 = vmatpush.msra.mxu1 %v4397_v60 }
 0x229   : > { %2198 = vmatpush.msra.mxu2 %v4398_v57  ;;  %2221 = vmatpush.msra.mxu3 %v4399_v49 }
 0x22a   : > { %2153 = vmatpush.msra.mxu0 %v4400_v36  ;;  %2176 = vmatpush.msra.mxu1 %v4401_v23  ;;  %v3763_v23 = vld [vmem:[%s4993_s27 + $0x90] sm:$0xff] }
 0x22b   : > { %2199 = vmatpush.msra.mxu2 %v4402_v56  ;;  %2222 = vmatpush.msra.mxu3 %v4403_v58 }
 0x22c   : > { %2154 = vmatpush.msra.mxu0 %v4404_v11  ;;  %2177 = vmatpush.msra.mxu1 %v4405_v21 }
 0x22d   : > { %2200 = vmatpush.msra.mxu2 %v4406_v47  ;;  %2223 = vmatpush.msra.mxu3 %v4407_v7 }
 0x22e   : > { %2155 = vmatpush.msra.mxu0 %v4408_v0  ;;  %2178 = vmatpush.msra.mxu1 %v4409_v61 }
 0x22f   : > { %2201 = vmatpush.msra.mxu2 %v4410_v45  ;;  %2224 = vmatpush.msra.mxu3 %v4411_v52 }
 0x230   : > { %2156 = vmatpush.msra.mxu0 %v4412_v39  ;;  %2179 = vmatpush.msra.mxu1 %v4413_v54 }
 0x231   : > { %2202 = vmatpush.msra.mxu2 %v4414_v24  ;;  %2225 = vmatpush.msra.mxu3 %v4415_v9 }
 0x232   : > { %2157 = vmatpush.msra.mxu0 %v4416_v5  ;;  %2180 = vmatpush.msra.mxu1 %v4417_v30 }
 0x233   : > { %2203 = vmatpush.msra.mxu2 %v4418_v18  ;;  %2226 = vmatpush.msra.mxu3 %v4419_v13  ;;  %v3765_v18 = vld [vmem:[%s4993_s27 + $0xa0] sm:$0xff] }
 0x245   : > { %v1514_v29 = vpop.f32.mrf.mxu0  ;;  %v1537_v50 = vpop.f32.mrf.mxu1 }
 0x24c   : > { %v1560_v26 = vpop.f32.mrf.mxu2  ;;  %v1583_v55 = vpop.f32.mrf.mxu3 }
 0x254   : > { %v1517_v14 = vpop.f32.mrf.mxu0  ;;  %v1540_v43 = vpop.f32.mrf.mxu1 }
 0x25b   : > { %v1563_v4 = vpop.f32.mrf.mxu2  ;;  %v7350_v20 = vpop.f32.mrf.mxu3 }
 0x25c   : > { %v1606_v6 = vpop.f32.mrf.mxu0  ;;  %v1629_v15 = vpop.f32.mrf.mxu1 }
 0x25d   : > { %v1607_v12 = vadd.f32 %v1606_v6, %v1514_v29  ;;  %v1630_v62 = vadd.f32 %v1629_v15, %v1537_v50 }
 0x25f   : > { %v1681_v31 = vadd.f32 %v1607_v12, %v6509_v51  ;;  %v1682_v40 = vadd.f32 %v1630_v62, %v6511_v17 }
 0x261   : > { %v3755_v28 = vmul.f32 -1.442695, %v1681_v31  ;;  %v3756_v1 = vmul.f32 -1.442695, %v1682_v40  ;;  %v9861_v31 = vld [vmem:[#allocation13_spill] sm:$0xff] }
 0x263   : > { %v1652_v33 = vpop.f32.mrf.mxu2  ;;  %3969 = vpow2.f32 %v3755_v28  ;;  %v1675_v57 = vpop.f32.mrf.mxu3  ;;  %v3767_v28 = vld [vmem:[%s4993_s27 + $0xb0] sm:$0xff] }
 0x264   : > { %v1609_v32 = vpop.f32.mrf.mxu0  ;;  %v1632_v10 = vpop.f32.mrf.mxu1  ;;  %3971 = vpow2.f32 %v3756_v1  ;;  %v1653_v37 = vadd.f32 %v1652_v33, %v1560_v26  ;;  %v1676_v5 = vadd.f32 %v1675_v57, %v1583_v55  ;;  %v3766_v26 = vld [vmem:[%s4993_s27 + $0xa8] sm:$0xff] }
 0x265   : > { %v1610_v48 = vadd.f32 %v1609_v32, %v1517_v14  ;;  %v1633_v3 = vadd.f32 %v1632_v10, %v1540_v43 }
 0x266   : > { %v1683_v53 = vadd.f32 %v1653_v37, %v9860_v22  ;;  %v1684_v40 = vadd.f32 %v1676_v5, %v9861_v31 }
 0x267   : > { %v1685_v38 = vadd.f32 %v1610_v48, %v6509_v51  ;;  %v1686_v44 = vadd.f32 %v1633_v3, %v6511_v17 }
 0x268   : > { %v3757_v56 = vmul.f32 -1.442695, %v1683_v53 }
 0x269   : > { %v3970_v16 = vpop.eup %3969  ;;  %v3758_v63 = vmul.f32 -1.442695, %v1685_v38  ;;  %v3759_v59 = vmul.f32 -1.442695, %v1686_v44  ;;  %v3764_v44 = vld [vmem:[%s4993_s27 + $0x98] sm:$0xff] }
 0x26a   : > { %v3972_v25 = vpop.eup %3971  ;;  %v7357_v60 = vadd.f32 1.0, %v3970_v16 }
 0x26b   : > { %v1655_v41 = vpop.f32.mrf.mxu2  ;;  %v7359_v36 = vadd.f32 1.0, %v3972_v25  ;;  %3973 = vpow2.f32 %v3758_v63  ;;  %v1678_v39 = vpop.f32.mrf.mxu3 }
 0x26c   : > { %3975 = vpow2.f32 %v3759_v59  ;;  %v1656_v52 = vadd.f32 %v1655_v41, %v1563_v4  ;;  %v1724_v59 = vand.u32 2147483648, %v7357_v60  ;;  %vm1718_vm10 = vweird.f32 %v7357_v60 }
 0x26d   : > { %v1841_v27 = vpop.f32.mrf.mxu0  ;;  %v1864_v8 = vpop.f32.mrf.mxu1  ;;  %3977 = vrcp.f32 %v7357_v60  ;;  %v1739_v63 = vand.u32 2147483648, %v7359_v36  ;;  %v1737_v57 = vand.u32 2147483647, %v7359_v36  ;;  %vm1733_vm11 = vweird.f32 %v7359_v36 }
 0x26e   : > { %v1916_v2 = vadd.f32 %v3761_v34, %v1841_v27  ;;  %v1917_v49 = vadd.f32 %v3762_v46, %v1864_v8  ;;  %3979 = vrcp.f32 %v7359_v36  ;;  %v1687_v6 = vadd.f32 %v1656_v52, %v9860_v22 }
 0x26f   : > { %3981 = vpow2.f32 %v3757_v56  ;;  %v1722_v8 = vand.u32 2147483647, %v7357_v60  ;;  %vm1738_vm7 = vcmp.eq.f32.partialorder %v1737_v57, 8.507059e+37 }
 0x270   : > { %v3769_v11 = vmul.f32 -1.442695, %v1916_v2  ;;  %v3770_v21 = vmul.f32 -1.442695, %v1917_v49  ;;  %v3760_v41 = vmul.f32 -1.442695, %v1687_v6 }
 0x271   : > { %v3974_v0 = vpop.eup %3973  ;;  %vm7440_vm13 = vcmp.eq.f32.partialorder %v1722_v8, 8.507059e+37 }
 0x272   : > { %3983 = vpow2.f32 %v3769_v11  ;;  %v3976_v61 = vpop.eup %3975  ;;  %v7368_v24 = vadd.f32 1.0, %v3974_v0 }
 0x273   : > { %3985 = vpow2.f32 %v3770_v21  ;;  %v7364_v45 = vpop.eup %3977  ;;  %v7370_v30 = vadd.f32 1.0, %v3976_v61 }
 0x274   : > { %v1887_v58 = vpop.f32.mrf.mxu2  ;;  %v7366_v54 = vpop.eup %3979  ;;  %v1714_v50 = vmul.f32 %v7364_v45, %v7357_v60  ;;  %vm1719_vm8 = vweird.f32 %v7364_v45  ;;  %v1740_v60 = vor.u32 1.1754944e-38, %v1739_v63 }
 0x275   : > { %v1918_v47 = vadd.f32 %v3763_v23, %v1887_v58  ;;  %v3982_v9 = vpop.eup %3981  ;;  %v1844_v13 = vpop.f32.mrf.mxu0  ;;  %v1729_v4 = vmul.f32 %v7366_v54, %v7359_v36  ;;  %v7408_v58 = vadd.f32 %v1678_v39, %v7350_v20  ;;  %vm1734_vm9 = vweird.f32 %v7366_v54  ;;  %vm7460_vm5 = vmor %vm1718_vm10, %vm1719_vm8 }
 0x276   : > { %v1867_v14 = vpop.f32.mrf.mxu1  ;;  %v1920_v62 = vadd.f32 %v3765_v18, %v1844_v13  ;;  %v1715_v1 = vsub.f32 1.0, %v1714_v50  ;;  %v7389_v48 = vadd.f32 1.0, %v3982_v9  ;;  %v1910_v34 = vpop.f32.mrf.mxu3  ;;  %vm7470_vm6 = vmor %vm1733_vm11, %vm1734_vm9  ;;  %vm1763_vm11 = vweird.f32 %v7368_v24 }
 0x277   : > { %v3771_v7 = vmul.f32 -1.442695, %v1918_v47  ;;  %v1921_v32 = vadd.f32 %v3766_v26, %v1867_v14  ;;  %v1730_v3 = vsub.f32 1.0, %v1729_v4  ;;  %v1919_v49 = vadd.f32 %v3764_v44, %v1910_v34 }
 0x278   : > { %v3984_v29 = vpop.eup %3983  ;;  %v3772_v37 = vmul.f32 -1.442695, %v1920_v62  ;;  %v1716_v46 = vmul.f32 %v7364_v45, %v1715_v1  ;;  %v7491_v63 = vadd.f32 %v7408_v58, %v9861_v31 }
 0x279   : > { %3987 = vpow2.f32 %v3771_v7  ;;  %v3986_v43 = vpop.eup %3985  ;;  %v7379_v15 = vadd.f32 1.0, %v3984_v29  ;;  %v3773_v27 = vmul.f32 -1.442695, %v1921_v32  ;;  %v1731_v53 = vmul.f32 %v7366_v54, %v1730_v3 }
 0x27a   : > { %3989 = vrcp.f32 %v7368_v24  ;;  %v7382_v55 = vadd.f32 1.0, %v3986_v43  ;;  %v7415_v47 = vadd.f32 %v7364_v45, %v1716_v46  ;;  %v1725_v46 = vor.u32 1.1754944e-38, %v1724_v59 }
 0x27b   : > { %3991 = vrcp.f32 %v7370_v30  ;;  %v7423_v20 = vadd.f32 %v7366_v54, %v1731_v53  ;;  %v1959_v13 = vand.u32 2147483648, %v7379_v15  ;;  %v1957_v14 = vand.u32 2147483647, %v7379_v15 }
 0x27c   : > { %v1890_v10 = vpop.f32.mrf.mxu2  ;;  %3993 = vrcp.f32 %v7379_v15  ;;  %v1974_v18 = vand.u32 2147483648, %v7382_v55  ;;  %vm1953_vm15 = vweird.f32 %v7379_v15  ;;  %vm1968_vm0 = vweird.f32 %v7382_v55 }
 0x27d   : > { %3995 = vrcp.f32 %v7382_v55  ;;  %v1922_v38 = vadd.f32 %v3767_v28, %v1890_v10  ;;  %v1960_v3 = vor.u32 1.1754944e-38, %v1959_v13  ;;  %vm1958_vm3 = vcmp.eq.f32.partialorder %v1957_v14, 8.507059e+37 }
 0x27e   : > { %v1975_v1 = vor.u32 1.1754944e-38, %v1974_v18  ;;  %v1721_v59 = vsel %vm7460_vm5, %v7364_v45, %v7415_v47 }
 0x27f   : > { %v3988_v12 = vpop.eup %3987  ;;  %v3774_v23 = vmul.f32 -1.442695, %v1922_v38  ;;  %v7503_v36 = vsel %vm7440_vm13, %v1725_v46, %v1721_v59 }
 0x280   : > { %v7386_v33 = vadd.f32 1.0, %v3988_v12  ;;  %v7395_v16 = vpop.eup %3989  ;;  %v1972_v12 = vand.u32 2147483647, %v7382_v55 }
 0x281   : > { %v7400_v25 = vpop.eup %3991  ;;  %v7427_v61 = vmul.f32 %v7395_v16, %v7368_v24  ;;  %vm1764_vm5 = vweird.f32 %v7395_v16 }
 0x282   : > { %3997 = vrcp.f32 %v7386_v33  ;;  %v3994_v2 = vpop.eup %3993  ;;  %v7437_v50 = vmul.f32 %v7400_v25, %v7370_v30  ;;  %vm1973_vm4 = vcmp.eq.f32.partialorder %v1972_v12, 8.507059e+37  ;;  %v1989_v47 = vand.u32 2147483648, %v7386_v33 }
 0x283   : > { %3999 = vtanh.f32 %v1684_v40  ;;  %v3996_v56 = vpop.eup %3995  ;;  %v1949_v11 = vmul.f32 %v3994_v2, %v7379_v15  ;;  %vm1954_vm12 = vweird.f32 %v3994_v2  ;;  %vm1983_vm9 = vweird.f32 %v7386_v33 }
 0x284   : > { %4001 = vrcp.f32 %v7389_v48  ;;  %v1964_v7 = vmul.f32 %v3996_v56, %v7382_v55  ;;  %vm1969_vm14 = vweird.f32 %v3996_v56  ;;  %vm1955_vm1 = vmor %vm1953_vm15, %vm1954_vm12  ;;  %v1775_v45 = vsub.f32 1.0, %v7437_v50 }
 0x285   : > { %4003 = vpow2.f32 %v3760_v41  ;;  %v1950_v52 = vsub.f32 1.0, %v1949_v11  ;;  %vm1970_vm2 = vmor %vm1968_vm0, %vm1969_vm14  ;;  %v9868_v11 = vld [vmem:[#allocation14_spill] sm:$0xff]  ;;  %v1987_v14 = vand.u32 2147483647, %v7386_v33 }
 0x286   : > { %4005 = vpow2.f32 %v3772_v37  ;;  %v1965_v5 = vsub.f32 1.0, %v1964_v7 }
 0x287   : > { %4007 = vpow2.f32 %v3773_v27  ;;  %v1951_v26 = vmul.f32 %v3994_v2, %v1950_v52  ;;  %v1736_v52 = vsel %vm7470_vm6, %v7366_v54, %v7423_v20  ;;  %vm1988_vm13 = vcmp.eq.f32.partialorder %v1987_v14, 8.507059e+37 }
 0x288   : > { %v7411_v21 = vpop.eup %3997  ;;  %4009 = vpow2.f32 %v3774_v23  ;;  %v1966_v6 = vmul.f32 %v3996_v56, %v1965_v5  ;;  %v1913_v23 = vpop.f32.mrf.mxu3  ;;  %v7507_v20 = vsel %vm1738_vm7, %v1740_v60, %v1736_v52  ;;  %vm1779_vm6 = vweird.f32 %v7400_v25 }
 0x289   : > { %v7419_v0 = vpop.eup %3999  ;;  %v1979_v39 = vmul.f32 %v7411_v21, %v7386_v33  ;;  %4011 = vtanh.f32 %v1919_v49  ;;  %v1952_v32 = vadd.f32 %v3994_v2, %v1951_v26  ;;  %v3768_v49 = vld [vmem:[%s4993_s27 + $0xb8] sm:$0xff]  ;;  %vm1984_vm8 = vweird.f32 %v7411_v21 }
 0x28a   : > { %v7431_v9 = vpop.eup %4001  ;;  %v1967_v41 = vadd.f32 %v3996_v56, %v1966_v6  ;;  %v1923_v18 = vadd.f32 %v3768_v49, %v1913_v23  ;;  %v1776_v6 = vmul.f32 %v7400_v25, %v1775_v45  ;;  %vm7520_vm10 = vmor %vm1983_vm9, %vm1984_vm8  ;;  %v4420_v45 = vld [vmem:[%s9503_s3 + $0x1e0] sm:$0xff]  ;;  %vm1778_vm7 = vweird.f32 %v7370_v30 }
 0x28b   : > { %v4004_v29 = vpop.eup %4003  ;;  %v1980_v40 = vsub.f32 1.0, %v1979_v39  ;;  %v1956_v15 = vsel %vm1955_vm1, %v3994_v2, %v1952_v32  ;;  %v1760_v39 = vsub.f32 1.0, %v7427_v61  ;;  %v7499_v54 = vmul.f32 %v7431_v9, %v7389_v48  ;;  %vm7576_vm8 = vmor %vm1763_vm11, %vm1764_vm5 }
 0x28c   : > { %v4006_v43 = vpop.eup %4005  ;;  %v1961_v44 = vsel %vm1958_vm3, %v1960_v3, %v1956_v15  ;;  %v1971_v34 = vsel %vm1970_vm2, %v3996_v56, %v1967_v41  ;;  %v7509_v61 = vadd.f32 1.0, %v4004_v29  ;;  %v1990_v29 = vor.u32 1.1754944e-38, %v1989_v47  ;;  %v4421_v47 = vld [vmem:[%s9503_s3 + $0x1e8] sm:$0xff]  ;;  %vm7596_vm9 = vmor %vm1778_vm7, %vm1779_vm6 }
 0x28d   : > { %v4008_v62 = vpop.eup %4007  ;;  %v7447_v28 = vadd.f32 1.0, %v4006_v43  ;;  %v1981_v8 = vmul.f32 %v7411_v21, %v1980_v40  ;;  %v1976_v53 = vsel %vm1973_vm4, %v1975_v1, %v1971_v34  ;;  %v1761_v26 = vmul.f32 %v7395_v16, %v1760_v39 }
 0x28e   : > { %v4010_v10 = vpop.eup %4009  ;;  %v7450_v37 = vadd.f32 1.0, %v4008_v62  ;;  %v2040_v7 = vmul.f32 %v1976_v53, %v9868_v11  ;;  %v1777_v52 = vadd.f32 %v7400_v25, %v1776_v6  ;;  %vm1793_vm5 = vweird.f32 %v7509_v61 }
 0x28f   : > { %4013 = vrcp.f32 %v7447_v28  ;;  %v7453_v38 = vadd.f32 1.0, %v4010_v10  ;;  %v4012_v55 = vpop.eup %4011  ;;  %v1982_v57 = vadd.f32 %v7411_v21, %v1981_v8  ;;  %v2004_v10 = vand.u32 2147483648, %v7447_v28 }
 0x290   : > { %4015 = vrcp.f32 %v7450_v37  ;;  %v2042_v2 = vmul.f32 %v4012_v55, %v1961_v44  ;;  %v2019_v1 = vand.u32 2147483648, %v7450_v37  ;;  %v2002_v41 = vand.u32 2147483647, %v7447_v28 }
 0x291   : > { %4017 = vrcp.f32 %v7453_v38  ;;  %v1986_v40 = vsel %vm7520_vm10, %v7411_v21, %v1982_v57  ;;  %v2017_v55 = vand.u32 2147483647, %v7450_v37  ;;  %vm1998_vm15 = vweird.f32 %v7447_v28  ;;  %v4423_v57 = vld [vmem:[%s9503_s3 + $0x1f8] sm:$0xff] }
 0x292   : > { %v7495_v5 = vadd.f32 %v2042_v2, %v2040_v7  ;;  %v1991_v44 = vsel %vm1988_vm13, %v1990_v29, %v1986_v40  ;;  %vm2013_vm0 = vweird.f32 %v7450_v37  ;;  %v2005_v8 = vor.u32 1.1754944e-38, %v2004_v10  ;;  %v4429_v40 = vld [vmem:[%s9503_s3 + $0x1a8] sm:$0xff]  ;;  %v4431_v10 = vld [vmem:[%s9503_s3 + $0x1b8] sm:$0xff] }
 0x293   : > { %v2020_v49 = vor.u32 1.1754944e-38, %v2019_v1  ;;  %vm2003_vm3 = vcmp.eq.f32.partialorder %v2002_v41, 8.507059e+37  ;;  %v7540_v56 = vadd.f32 %v7395_v16, %v1761_v26  ;;  %vm2018_vm4 = vcmp.eq.f32.partialorder %v2017_v55, 8.507059e+37  ;;  %v4433_v55 = vld [vmem:[%s9503_s3 + $0x188] sm:$0xff] }
 0x294   : > { %4019 = vtanh.f32 %v7495_v5  ;;  %v1769_v7 = vand.u32 2147483648, %v7368_v24  ;;  %v1782_v26 = vand.u32 2147483647, %v7370_v30  ;;  %v1781_v29 = vsel %vm7596_vm9, %v7400_v25, %v1777_v52 }
 0x295   : > { %v4014_v13 = vpop.eup %4013  ;;  %4021 = vtanh.f32 %v1923_v18  ;;  %v1784_v18 = vand.u32 2147483648, %v7370_v30  ;;  %v4427_v30 = vld [vmem:[%s9503_s3 + $0x1d8] sm:$0xff]  ;;  %v2032_v25 = vand.u32 2147483647, %v7453_v38 }
 0x296   : > { %v4016_v58 = vpop.eup %4015  ;;  %v1994_v50 = vmul.f32 %v4014_v13, %v7447_v28  ;;  %vm1999_vm12 = vweird.f32 %v4014_v13  ;;  %4023 = vrcp.f32 %v7509_v61  ;;  %v1770_v12 = vor.u32 1.1754944e-38, %v1769_v7  ;;  %v4441_v7 = vld [vmem:[%s9503_s3 + $0x148] sm:$0xff] }
 0x297   : > { %v2009_v43 = vmul.f32 %v4016_v58, %v7450_v37  ;;  %v7517_v4 = vpop.eup %4017  ;;  %vm2014_vm14 = vweird.f32 %v4016_v58  ;;  %vm2000_vm1 = vmor %vm1998_vm15, %vm1999_vm12  ;;  %4025 = vtanh.f32 %v7491_v63  ;;  %vm2028_vm12 = vweird.f32 %v7453_v38  ;;  %v4446_v63 = vld [vmem:[%s9503_s3 + $0x130] sm:$0xff] }
 0x298   : > { %v1995_v62 = vsub.f32 1.0, %v1994_v50  ;;  %v2024_v33 = vmul.f32 %v7517_v4, %v7453_v38  ;;  %vm2015_vm2 = vmor %vm2013_vm0, %vm2014_vm14  ;;  %v1807_v50 = vmul.f32 %v7419_v0, %v7503_v36  ;;  %vm2029_vm10 = vweird.f32 %v7517_v4  ;;  %v4449_v36 = vld [vmem:[%s9503_s3 + $0x108] sm:$0xff] }
 0x299   : > { %v2010_v32 = vsub.f32 1.0, %v2009_v43  ;;  %v4424_v43 = vld [vmem:[%s9503_s3 + $0x1c0] sm:$0xff]  ;;  %vm1783_vm13 = vcmp.eq.f32.partialorder %v1782_v26, 8.507059e+37  ;;  %vm7637_vm14 = vmor %vm2028_vm12, %vm2029_vm10  ;;  %vm2033_vm15 = vcmp.eq.f32.partialorder %v2032_v25, 8.507059e+37  ;;  %vm1749_vm0 = vweird.f32 %v7431_v9  ;;  %v4447_v26 = vld [vmem:[%s9503_s3 + $0x138] sm:$0xff] }
 0x29a   : > { %v1996_v3 = vmul.f32 %v4014_v13, %v1995_v62  ;;  %v4020_v21 = vpop.eup %4019  ;;  %v2025_v34 = vsub.f32 1.0, %v2024_v33  ;;  %v4428_v62 = vld [vmem:[%s9503_s3 + $0x1a0] sm:$0xff]  ;;  %v4430_v33 = vld [vmem:[%s9503_s3 + $0x1b0] sm:$0xff]  ;;  %v4457_v25 = vld [vmem:[%s9503_s3 + $0xc8] sm:$0xff] }
 0x29b   : > { %v2011_v15 = vmul.f32 %v4016_v58, %v2010_v32  ;;  %v7535_v46 = vmul.f32 %v4020_v21, %v1991_v44  ;;  %v4022_v2 = vpop.eup %4021  ;;  %v1785_v32 = vor.u32 1.1754944e-38, %v1784_v18  ;;  %v4444_v18 = vld [vmem:[%s9503_s3 + $0x120] sm:$0xff] }
 0x29c   : > { %v1997_v27 = vadd.f32 %v4014_v13, %v1996_v3  ;;  %v2026_v28 = vmul.f32 %v7517_v4, %v2025_v34  ;;  %v7589_v0 = vpop.eup %4023 }
 0x29d   : > { %v2012_v53 = vadd.f32 %v4016_v58, %v2011_v15  ;;  %2066 = vmatmul.f32.vlgmr.msrb.gmra.mxu0 %v7535_v46  ;;  %2089 = vmatmul.f32.vlgmr.msrb.gmra.mxu1 %v7535_v46  ;;  %v1789_v3 = vmul.f32 %v7589_v0, %v7509_v61  ;;  %v4432_v15 = vld [vmem:[%s9503_s3 + $0x180] sm:$0xff]  ;;  %v4026_v21 = vpop.eup %4025  ;;  %v1786_v44 = vsel %vm1783_vm13, %v1785_v32, %v1781_v29 }
 0x29e   : > { %v2001_v23 = vsel %vm2000_vm1, %v4014_v13, %v1997_v27  ;;  %2112 = vmatmul.f32.vlgmr.msrb.gmra.mxu2 %v7535_v46  ;;  %2135 = vmatmul.f32.vlgmr.msrb.gmra.mxu3 %v7535_v46  ;;  %v1767_v13 = vand.u32 2147483647, %v7368_v24  ;;  %v1745_v24 = vsub.f32 1.0, %v7499_v54  ;;  %v2027_v6 = vadd.f32 %v7517_v4, %v2026_v28  ;;  %v4426_v54 = vld [vmem:[%s9503_s3 + $0x1d0] sm:$0xff]  ;;  %v4456_v32 = vld [vmem:[%s9503_s3 + $0xc0] sm:$0xff] }
 0x29f   : > { %v2006_v60 = vsel %vm2003_vm3, %v2005_v8, %v2001_v23  ;;  %v2016_v59 = vsel %vm2015_vm2, %v4016_v58, %v2012_v53  ;;  %2377 = vmatpush.msrb.mxu0 %v4420_v45  ;;  %2400 = vmatpush.msrb.mxu1 %v4421_v47  ;;  %v1805_v58 = vmul.f32 %v7507_v20, %v6774_v35  ;;  %v4425_v35 = vld [vmem:[%s9503_s3 + $0x1c8] sm:$0xff]  ;;  %v4434_v27 = vld [vmem:[%s9503_s3 + $0x190] sm:$0xff]  ;;  %v4435_v8 = vld [vmem:[%s9503_s3 + $0x198] sm:$0xff]  ;;  %v1790_v52 = vsub.f32 1.0, %v1789_v3 }
 0x2a0   : > { %v2021_v37 = vsel %vm2018_vm4, %v2020_v49, %v2016_v59  ;;  %v2043_v11 = vmul.f32 %v4022_v2, %v2006_v60  ;;  %2446 = vmatpush.msrb.mxu3 %v4423_v57  ;;  %v1766_v20 = vsel %vm7576_vm8, %v7395_v16, %v7540_v56  ;;  %v2034_v16 = vand.u32 2147483648, %v7453_v38  ;;  %v4436_v49 = vld [vmem:[%s9503_s3 + $0x160] sm:$0xff]  ;;  %v4438_v23 = vld [vmem:[%s9503_s3 + $0x170] sm:$0xff]  ;;  %v4439_v56 = vld [vmem:[%s9503_s3 + $0x178] sm:$0xff] }
 0x2a1   : > { %v2041_v39 = vmul.f32 %v2021_v37, %v6745_v19  ;;  %v4422_v19 = vld [vmem:[%s9503_s3 + $0x1f0] sm:$0xff]  ;;  %2378 = vmatpush.msrb.mxu0 %v4424_v43  ;;  %2401 = vmatpush.msrb.mxu1 %v4425_v35  ;;  %vm1768_vm11 = vcmp.eq.f32.partialorder %v1767_v13, 8.507059e+37  ;;  %v7631_v1 = vadd.f32 %v1807_v50, %v1805_v58  ;;  %v2031_v34 = vsel %vm7637_vm14, %v7517_v4, %v2027_v6  ;;  %v4437_v4 = vld [vmem:[%s9503_s3 + $0x168] sm:$0xff]  ;;  %v4459_v38 = vld [vmem:[%s9503_s3 + $0xd8] sm:$0xff] }
 0x2a2   : > { %2423 = vmatpush.msrb.mxu2 %v4422_v19  ;;  %2447 = vmatpush.msrb.mxu3 %v4427_v30  ;;  %v1771_v41 = vsel %vm1768_vm11, %v1770_v12, %v1766_v20  ;;  %v1746_v53 = vmul.f32 %v7431_v9, %v1745_v24  ;;  %v2035_v2 = vor.u32 1.1754944e-38, %v2034_v16  ;;  %v1806_v59 = vmul.f32 %v1786_v44, %v6817_v42  ;;  %v4442_v45 = vld [vmem:[%s9503_s3 + $0x150] sm:$0xff]  ;;  %v4443_v42 = vld [vmem:[%s9503_s3 + $0x158] sm:$0xff]  ;;  %v4445_v13 = vld [vmem:[%s9503_s3 + $0x128] sm:$0xff] }
 0x2a3   : > { %v7581_v14 = vadd.f32 %v2043_v11, %v2041_v39  ;;  %2379 = vmatpush.msrb.mxu0 %v4428_v62  ;;  %2402 = vmatpush.msrb.mxu1 %v4429_v40  ;;  %v1808_v28 = vmul.f32 %v4026_v21, %v1771_v41  ;;  %v4440_v11 = vld [vmem:[%s9503_s3 + $0x140] sm:$0xff]  ;;  %v1754_v19 = vand.u32 2147483648, %v7389_v48  ;;  %vm1748_vm1 = vweird.f32 %v7389_v48  ;;  %v4450_v6 = vld [vmem:[%s9503_s3 + $0x110] sm:$0xff]  ;;  %v4453_v12 = vld [vmem:[%s9503_s3 + $0xe8] sm:$0xff] }
 0x2a4   : > { %2424 = vmatpush.msrb.mxu2 %v4426_v54  ;;  %2448 = vmatpush.msrb.mxu3 %v4431_v10  ;;  %v2036_v37 = vsel %vm2033_vm15, %v2035_v2, %v2031_v34  ;;  %v1747_v47 = vadd.f32 %v7431_v9, %v1746_v53  ;;  %v1752_v57 = vand.u32 2147483647, %v7389_v48  ;;  %vm7702_vm2 = vmor %vm1748_vm1, %vm1749_vm0  ;;  %v1791_v43 = vmul.f32 %v7589_v0, %v1790_v52  ;;  %v4448_v24 = vld [vmem:[%s9503_s3 + $0x100] sm:$0xff]  ;;  %v4454_v16 = vld [vmem:[%s9503_s3 + $0xf0] sm:$0xff] }
 0x2a5   : > { %4027 = vtanh.f32 %v7581_v14  ;;  %2380 = vmatpush.msrb.mxu0 %v4432_v15  ;;  %2403 = vmatpush.msrb.mxu1 %v4433_v55  ;;  %v7698_v58 = vadd.f32 %v1808_v28, %v1806_v59  ;;  %v1755_v20 = vor.u32 1.1754944e-38, %v1754_v19  ;;  %v4452_v30 = vld [vmem:[%s9503_s3 + $0xe0] sm:$0xff]  ;;  %v4455_v62 = vld [vmem:[%s9503_s3 + $0xf8] sm:$0xff]  ;;  %vm1794_vm4 = vweird.f32 %v7589_v0  ;;  %v4458_v41 = vld [vmem:[%s9503_s3 + $0xd0] sm:$0xff] }
 0x2a6   : > { %2425 = vmatpush.msrb.mxu2 %v4430_v33  ;;  %2449 = vmatpush.msrb.mxu3 %v4435_v8  ;;  %4029 = vtanh.f32 %v7631_v1  ;;  %v1751_v48 = vsel %vm7702_vm2, %v7431_v9, %v1747_v47  ;;  %v4451_v9 = vld [vmem:[%s9503_s3 + $0x118] sm:$0xff]  ;;  %vm1753_vm3 = vcmp.eq.f32.partialorder %v1752_v57, 8.507059e+37  ;;  %v1792_v40 = vadd.f32 %v7589_v0, %v1791_v43  ;;  %vm7752_vm6 = vmor %vm1793_vm5, %vm1794_vm4  ;;  %v4460_v55 = vld [vmem:[%s9503_s3 + $0xa0] sm:$0xff] }
 0x2a7   : > { %2381 = vmatpush.msrb.mxu0 %v4436_v49  ;;  %2404 = vmatpush.msrb.mxu1 %v4437_v4  ;;  %4031 = vtanh.f32 %v7698_v58  ;;  %v1756_v54 = vsel %vm1753_vm3, %v1755_v20, %v1751_v48  ;;  %v1799_v33 = vand.u32 2147483648, %v7509_v61  ;;  %v1797_v10 = vand.u32 2147483647, %v7509_v61  ;;  %v4461_v21 = vld [vmem:[%s9503_s3 + $0xa8] sm:$0xff]  ;;  %v4462_v34 = vld [vmem:[%s9503_s3 + $0xb0] sm:$0xff]  ;;  %v4467_v49 = vld [vmem:[%s9503_s3 + $0x98] sm:$0xff] }
 0x2a8   : > { %2426 = vmatpush.msrb.mxu2 %v4434_v27  ;;  %2450 = vmatpush.msrb.mxu3 %v4439_v56  ;;  %v1796_v61 = vsel %vm7752_vm6, %v7589_v0, %v1792_v40  ;;  %v4463_v0 = vld [vmem:[%s9503_s3 + $0xb8] sm:$0xff]  ;;  %v4464_v27 = vld [vmem:[%s9503_s3 + $0x80] sm:$0xff]  ;;  %v4465_v8 = vld [vmem:[%s9503_s3 + $0x88] sm:$0xff] }
 0x2a9   : > { %2382 = vmatpush.msrb.mxu0 %v4440_v11  ;;  %2405 = vmatpush.msrb.mxu1 %v4441_v7  ;;  %v1800_v44 = vor.u32 1.1754944e-38, %v1799_v33  ;;  %vm1798_vm7 = vcmp.eq.f32.partialorder %v1797_v10, 8.507059e+37  ;;  %v4466_v2 = vld [vmem:[%s9503_s3 + $0x90] sm:$0xff]  ;;  %v4469_v56 = vld [vmem:[%s9503_s3 + $0x68] sm:$0xff]  ;;  %v4471_v59 = vld [vmem:[%s9503_s3 + $0x78] sm:$0xff] }
 0x2aa   : > { %2427 = vmatpush.msrb.mxu2 %v4438_v23  ;;  %2451 = vmatpush.msrb.mxu3 %v4443_v42  ;;  %v4468_v23 = vld [vmem:[%s9503_s3 + $0x60] sm:$0xff]  ;;  %v4474_v11 = vld [vmem:[%s9503_s3 + $0x50] sm:$0xff]  ;;  %v4475_v7 = vld [vmem:[%s9503_s3 + $0x58] sm:$0xff] }
 0x2ab   : > { %v4028_v60 = vpop.eup %4027  ;;  %2383 = vmatpush.msrb.mxu0 %v4444_v18  ;;  %2406 = vmatpush.msrb.mxu1 %v4445_v13  ;;  %v1801_v53 = vsel %vm1798_vm7, %v1800_v44, %v1796_v61  ;;  %v4472_v28 = vld [vmem:[%s9503_s3 + $0x40] sm:$0xff]  ;;  %v4478_v42 = vld [vmem:[%s9503_s3 + $0x30] sm:$0xff]  ;;  %v4479_v47 = vld [vmem:[%s9503_s3 + $0x38] sm:$0xff] }
 0x2ac   : > { %v7677_v39 = vmul.f32 %v4028_v60, %v2036_v37  ;;  %2428 = vmatpush.msrb.mxu2 %v4442_v45  ;;  %2452 = vmatpush.msrb.mxu3 %v4447_v26  ;;  %v4030_v35 = vpop.eup %4029  ;;  %v4470_v60 = vld [vmem:[%s9503_s3 + $0x70] sm:$0xff]  ;;  %v4473_v37 = vld [vmem:[%s9503_s3 + $0x48] sm:$0xff]  ;;  %v4476_v52 = vld [vmem:[%s9503_s3 + $0x20] sm:$0xff] }
 0x2ad   : > { %2384 = vmatpush.msrb.mxu0 %v4448_v24  ;;  %2407 = vmatpush.msrb.mxu1 %v4449_v36  ;;  %v1813_v29 = vmul.f32 %v4030_v35, %v1756_v54  ;;  %v4032_v15 = vpop.eup %4031  ;;  %v4477_v45 = vld [vmem:[%s9503_s3 + $0x28] sm:$0xff]  ;;  %v4480_v18 = vld [vmem:[%s9503_s3] sm:$0xff]  ;;  %v4482_v19 = vld [vmem:[%s9503_s3 + $0x10] sm:$0xff] }
 0x2ae   : > { %2069 = vmatmul.f32.gmra.mxu0 %v7677_v39  ;;  %2092 = vmatmul.f32.gmra.mxu1 %v7677_v39  ;;  %v1814_v4 = vmul.f32 %v4032_v15, %v1801_v53  ;;  %v4481_v13 = vld [vmem:[%s9503_s3 + $0x8] sm:$0xff]  ;;  %v4483_v57 = vld [vmem:[%s9503_s3 + $0x18] sm:$0xff]  ;;  %v4484_v50 = vld [vmem:[%s9504_s4 + $0x1e0] sm:$0xff] }
 0x2af   : > { %2115 = vmatmul.f32.gmra.mxu2 %v7677_v39  ;;  %2138 = vmatmul.f32.gmra.mxu3 %v7677_v39  ;;  %v4486_v26 = vld [vmem:[%s9504_s4 + $0x1f0] sm:$0xff]  ;;  %v4487_v48 = vld [vmem:[%s9504_s4 + $0x1f8] sm:$0xff]  ;;  %v4489_v43 = vld [vmem:[%s9504_s4 + $0x1c8] sm:$0xff] }
 0x2b0   : > { %2429 = vmatpush.msrb.mxu2 %v4446_v63  ;;  %2453 = vmatpush.msrb.mxu3 %v4451_v9  ;;  %v4485_v63 = vld [vmem:[%s9504_s4 + $0x1e8] sm:$0xff]  ;;  %v4490_v35 = vld [vmem:[%s9504_s4 + $0x1d0] sm:$0xff]  ;;  %v4491_v24 = vld [vmem:[%s9504_s4 + $0x1d8] sm:$0xff] }
 0x2b1   : > { %2385 = vmatpush.msrb.mxu0 %v4452_v30  ;;  %2408 = vmatpush.msrb.mxu1 %v4453_v12  ;;  %v4492_v36 = vld [vmem:[%s9504_s4 + $0x1a0] sm:$0xff]  ;;  %v4493_v20 = vld [vmem:[%s9504_s4 + $0x1a8] sm:$0xff]  ;;  %v4495_v9 = vld [vmem:[%s9504_s4 + $0x1b8] sm:$0xff] }
 0x2b2   : > { %2430 = vmatpush.msrb.mxu2 %v4450_v6  ;;  %2454 = vmatpush.msrb.mxu3 %v4455_v62  ;;  %v4494_v6 = vld [vmem:[%s9504_s4 + $0x1b0] sm:$0xff]  ;;  %v4496_v54 = vld [vmem:[%s9504_s4 + $0x180] sm:$0xff]  ;;  %v4497_v30 = vld [vmem:[%s9504_s4 + $0x188] sm:$0xff] }
 0x2b3   : > { %2386 = vmatpush.msrb.mxu0 %v4456_v32  ;;  %2409 = vmatpush.msrb.mxu1 %v4457_v25  ;;  %v4498_v12 = vld [vmem:[%s9504_s4 + $0x190] sm:$0xff]  ;;  %v4503_v40 = vld [vmem:[%s9504_s4 + $0x178] sm:$0xff]  ;;  %v4504_v32 = vld [vmem:[%s9504_s4 + $0x140] sm:$0xff] }
 0x2b4   : > { %2431 = vmatpush.msrb.mxu2 %v4454_v16  ;;  %2455 = vmatpush.msrb.mxu3 %v4459_v38  ;;  %v4501_v16 = vld [vmem:[%s9504_s4 + $0x168] sm:$0xff]  ;;  %v4502_v62 = vld [vmem:[%s9504_s4 + $0x170] sm:$0xff]  ;;  %v4507_v10 = vld [vmem:[%s9504_s4 + $0x158] sm:$0xff] }
 0x2b5   : > { %2387 = vmatpush.msrb.mxu0 %v4460_v55  ;;  %2410 = vmatpush.msrb.mxu1 %v4461_v21  ;;  %v4505_v25 = vld [vmem:[%s9504_s4 + $0x148] sm:$0xff]  ;;  %v4506_v33 = vld [vmem:[%s9504_s4 + $0x150] sm:$0xff]  ;;  %v4508_v3 = vld [vmem:[%s9504_s4 + $0x120] sm:$0xff] }
 0x2b6   : > { %2158 = vmatmul.f32.vlgmr.msra.gmra.mxu0 %v1813_v29  ;;  %2181 = vmatmul.f32.vlgmr.msra.gmra.mxu1 %v1813_v29  ;;  %v4510_v38 = vld [vmem:[%s9504_s4 + $0x130] sm:$0xff]  ;;  %v4511_v61 = vld [vmem:[%s9504_s4 + $0x138] sm:$0xff]  ;;  %v4512_v15 = vld [vmem:[%s9504_s4 + $0x100] sm:$0xff] }
 0x2b7   : > { %2204 = vmatmul.f32.vlgmr.msra.gmra.mxu2 %v1813_v29  ;;  %2227 = vmatmul.f32.vlgmr.msra.gmra.mxu3 %v1813_v29  ;;  %v4499_v29 = vld [vmem:[%s9504_s4 + $0x198] sm:$0xff]  ;;  %v4513_v55 = vld [vmem:[%s9504_s4 + $0x108] sm:$0xff]  ;;  %v4514_v21 = vld [vmem:[%s9504_s4 + $0x110] sm:$0xff] }
 0x2b8   : > { %2432 = vmatpush.msrb.mxu2 %v4458_v41  ;;  %2456 = vmatpush.msrb.mxu3 %v4463_v0  ;;  %v4509_v41 = vld [vmem:[%s9504_s4 + $0x128] sm:$0xff]  ;;  %v4515_v44 = vld [vmem:[%s9504_s4 + $0x118] sm:$0xff]  ;;  %v4520_v53 = vld [vmem:[%s9504_s4 + $0xc0] sm:$0xff] }
 0x2b9   : > { %2388 = vmatpush.msrb.mxu0 %v4464_v27  ;;  %2411 = vmatpush.msrb.mxu1 %v4465_v8  ;;  %v4517_v0 = vld [vmem:[%s9504_s4 + $0xe8] sm:$0xff]  ;;  %v4518_v27 = vld [vmem:[%s9504_s4 + $0xf0] sm:$0xff]  ;;  %v4519_v8 = vld [vmem:[%s9504_s4 + $0xf8] sm:$0xff] }
 0x2ba   : > { %2433 = vmatpush.msrb.mxu2 %v4462_v34  ;;  %2457 = vmatpush.msrb.mxu3 %v4467_v49  ;;  %v4516_v34 = vld [vmem:[%s9504_s4 + $0xe0] sm:$0xff]  ;;  %v4522_v49 = vld [vmem:[%s9504_s4 + $0xd0] sm:$0xff] }
 0x2bb   : > { %2389 = vmatpush.msrb.mxu0 %v4468_v23  ;;  %2412 = vmatpush.msrb.mxu1 %v4469_v56  ;;  %v4524_v23 = vld [vmem:[%s9504_s4 + $0xa0] sm:$0xff]  ;;  %v4525_v56 = vld [vmem:[%s9504_s4 + $0xa8] sm:$0xff] }
 0x2bc   : > { %2434 = vmatpush.msrb.mxu2 %v4466_v2  ;;  %2458 = vmatpush.msrb.mxu3 %v4471_v59  ;;  %v4521_v2 = vld [vmem:[%s9504_s4 + $0xc8] sm:$0xff]  ;;  %v4527_v59 = vld [vmem:[%s9504_s4 + $0xb8] sm:$0xff] }
 0x2bd   : > { %2390 = vmatpush.msrb.mxu0 %v4472_v28  ;;  %2413 = vmatpush.msrb.mxu1 %v4473_v37  ;;  %v4528_v28 = vld [vmem:[%s9504_s4 + $0x80] sm:$0xff]  ;;  %v4529_v37 = vld [vmem:[%s9504_s4 + $0x88] sm:$0xff] }
 0x2be   : > { %2161 = vmatmul.f32.gmra.mxu0 %v1814_v4  ;;  %2184 = vmatmul.f32.gmra.mxu1 %v1814_v4 }
 0x2bf   : > { %2207 = vmatmul.f32.gmra.mxu2 %v1814_v4  ;;  %2230 = vmatmul.f32.gmra.mxu3 %v1814_v4  ;;  %v4523_v4 = vld [vmem:[%s9504_s4 + $0xd8] sm:$0xff] }
 0x2c0   : > { %2435 = vmatpush.msrb.mxu2 %v4470_v60  ;;  %2459 = vmatpush.msrb.mxu3 %v4475_v7  ;;  %v4526_v60 = vld [vmem:[%s9504_s4 + $0xb0] sm:$0xff]  ;;  %v4531_v7 = vld [vmem:[%s9504_s4 + $0x98] sm:$0xff] }
 0x2c1   : > { %2391 = vmatpush.msrb.mxu0 %v4476_v52  ;;  %2414 = vmatpush.msrb.mxu1 %v4477_v45  ;;  %v4532_v52 = vld [vmem:[%s9504_s4 + $0x60] sm:$0xff]  ;;  %v4533_v45 = vld [vmem:[%s9504_s4 + $0x68] sm:$0xff] }
 0x2c2   : > { %2436 = vmatpush.msrb.mxu2 %v4474_v11  ;;  %2460 = vmatpush.msrb.mxu3 %v4479_v47  ;;  %v4530_v11 = vld [vmem:[%s9504_s4 + $0x90] sm:$0xff]  ;;  %v4535_v47 = vld [vmem:[%s9504_s4 + $0x78] sm:$0xff] }
 0x2c3   : > { %2392 = vmatpush.msrb.mxu0 %v4480_v18  ;;  %2415 = vmatpush.msrb.mxu1 %v4481_v13  ;;  %v4536_v18 = vld [vmem:[%s9504_s4 + $0x40] sm:$0xff]  ;;  %v4537_v13 = vld [vmem:[%s9504_s4 + $0x48] sm:$0xff] }
 0x2c4   : > { %2437 = vmatpush.msrb.mxu2 %v4478_v42  ;;  %2461 = vmatpush.msrb.mxu3 %v4483_v57  ;;  %v4534_v42 = vld [vmem:[%s9504_s4 + $0x70] sm:$0xff]  ;;  %v4539_v57 = vld [vmem:[%s9504_s4 + $0x58] sm:$0xff] }
 0x2c5   : > { %2603 = vmatpush.msra.mxu0 %v4484_v50  ;;  %2626 = vmatpush.msra.mxu1 %v4485_v63  ;;  %v4540_v50 = vld [vmem:[%s9504_s4 + $0x20] sm:$0xff]  ;;  %v4541_v63 = vld [vmem:[%s9504_s4 + $0x28] sm:$0xff] }
 0x2c6   : > { %2438 = vmatpush.msrb.mxu2 %v4482_v19  ;;  %2393 = vmatmul.f32.vlgmr.msrb.gmra.mxu0 %v7535_v46  ;;  %v4538_v19 = vld [vmem:[%s9504_s4 + $0x50] sm:$0xff] }
 0x2c7   : > { %2416 = vmatmul.f32.vlgmr.msrb.gmra.mxu1 %v7535_v46  ;;  %2439 = vmatmul.f32.vlgmr.msrb.gmra.mxu2 %v7535_v46 }
 0x2c8   : > { %2462 = vmatmul.f32.vlgmr.msrb.gmra.mxu3 %v7535_v46  ;;  %2649 = vmatpush.msra.mxu2 %v4486_v26  ;;  %v4488_v46 = vld [vmem:[%s9504_s4 + $0x1c0] sm:$0xff]  ;;  %v4542_v26 = vld [vmem:[%s9504_s4 + $0x30] sm:$0xff] }
 0x2c9   : > { %2672 = vmatpush.msra.mxu3 %v4487_v48  ;;  %2604 = vmatpush.msra.mxu0 %v4488_v46  ;;  %v4543_v48 = vld [vmem:[%s9504_s4 + $0x38] sm:$0xff]  ;;  %v4544_v46 = vld [vmem:[%s9504_s4] sm:$0xff] }
 0x2ca   : > { %2627 = vmatpush.msra.mxu1 %v4489_v43  ;;  %2650 = vmatpush.msra.mxu2 %v4490_v35  ;;  %v4545_v43 = vld [vmem:[%s9504_s4 + $0x8] sm:$0xff]  ;;  %v4546_v35 = vld [vmem:[%s9504_s4 + $0x10] sm:$0xff] }
 0x2cb   : > { %2673 = vmatpush.msra.mxu3 %v4491_v24  ;;  %2605 = vmatpush.msra.mxu0 %v4492_v36  ;;  %v4547_v24 = vld [vmem:[%s9504_s4 + $0x18] sm:$0xff]  ;;  %v4548_v36 = vld [vmem:[%s9505_s5 + $0x1e0] sm:$0xff] }
 0x2cc   : > { %2628 = vmatpush.msra.mxu1 %v4493_v20  ;;  %2651 = vmatpush.msra.mxu2 %v4494_v6  ;;  %v4549_v20 = vld [vmem:[%s9505_s5 + $0x1e8] sm:$0xff]  ;;  %v4550_v6 = vld [vmem:[%s9505_s5 + $0x1f0] sm:$0xff] }
 0x2cd   : > { %2674 = vmatpush.msra.mxu3 %v4495_v9  ;;  %2606 = vmatpush.msra.mxu0 %v4496_v54  ;;  %v4551_v9 = vld [vmem:[%s9505_s5 + $0x1f8] sm:$0xff]  ;;  %v4552_v54 = vld [vmem:[%s9505_s5 + $0x1c0] sm:$0xff] }
 0x2ce   : > { %2396 = vmatmul.f32.gmra.mxu0 %v7677_v39  ;;  %2629 = vmatpush.msra.mxu1 %v4497_v30  ;;  %v4553_v30 = vld [vmem:[%s9505_s5 + $0x1c8] sm:$0xff] }
 0x2cf   : > { %2419 = vmatmul.f32.gmra.mxu1 %v7677_v39  ;;  %2442 = vmatmul.f32.gmra.mxu2 %v7677_v39 }
 0x2d0   : > { %2465 = vmatmul.f32.gmra.mxu3 %v7677_v39  ;;  %2652 = vmatpush.msra.mxu2 %v4498_v12  ;;  %v4500_v39 = vld [vmem:[%s9504_s4 + $0x160] sm:$0xff]  ;;  %v4554_v12 = vld [vmem:[%s9505_s5 + $0x1d0] sm:$0xff] }
 0x2d1   : > { %2675 = vmatpush.msra.mxu3 %v4499_v29  ;;  %2607 = vmatpush.msra.mxu0 %v4500_v39  ;;  %v4555_v29 = vld [vmem:[%s9505_s5 + $0x1d8] sm:$0xff]  ;;  %v4556_v39 = vld [vmem:[%s9505_s5 + $0x1a0] sm:$0xff] }
 0x2d2   : > { %2630 = vmatpush.msra.mxu1 %v4501_v16  ;;  %2653 = vmatpush.msra.mxu2 %v4502_v62  ;;  %v4557_v16 = vld [vmem:[%s9505_s5 + $0x1a8] sm:$0xff]  ;;  %v4558_v62 = vld [vmem:[%s9505_s5 + $0x1b0] sm:$0xff] }
 0x2d3   : > { %2676 = vmatpush.msra.mxu3 %v4503_v40  ;;  %2608 = vmatpush.msra.mxu0 %v4504_v32  ;;  %v4559_v40 = vld [vmem:[%s9505_s5 + $0x1b8] sm:$0xff]  ;;  %v4560_v32 = vld [vmem:[%s9505_s5 + $0x180] sm:$0xff] }
 0x2d4   : > { %2631 = vmatpush.msra.mxu1 %v4505_v25  ;;  %2654 = vmatpush.msra.mxu2 %v4506_v33  ;;  %v4561_v25 = vld [vmem:[%s9505_s5 + $0x188] sm:$0xff]  ;;  %v4562_v33 = vld [vmem:[%s9505_s5 + $0x190] sm:$0xff] }
 0x2d5   : > { %2677 = vmatpush.msra.mxu3 %v4507_v10  ;;  %2609 = vmatpush.msra.mxu0 %v4508_v3  ;;  %v4563_v10 = vld [vmem:[%s9505_s5 + $0x198] sm:$0xff]  ;;  %v4564_v3 = vld [vmem:[%s9505_s5 + $0x160] sm:$0xff] }
 0x2d6   : > { %2632 = vmatpush.msra.mxu1 %v4509_v41  ;;  %2655 = vmatpush.msra.mxu2 %v4510_v38  ;;  %v4565_v41 = vld [vmem:[%s9505_s5 + $0x168] sm:$0xff]  ;;  %v4566_v38 = vld [vmem:[%s9505_s5 + $0x170] sm:$0xff] }
 0x2d7   : > { %2678 = vmatpush.msra.mxu3 %v4511_v61  ;;  %2610 = vmatpush.msra.mxu0 %v4512_v15  ;;  %v4567_v61 = vld [vmem:[%s9505_s5 + $0x178] sm:$0xff]  ;;  %v4568_v15 = vld [vmem:[%s9505_s5 + $0x140] sm:$0xff] }
 0x2d8   : > { %2633 = vmatpush.msra.mxu1 %v4513_v55  ;;  %2656 = vmatpush.msra.mxu2 %v4514_v21  ;;  %v4569_v55 = vld [vmem:[%s9505_s5 + $0x148] sm:$0xff]  ;;  %v4570_v21 = vld [vmem:[%s9505_s5 + $0x150] sm:$0xff] }
 0x2d9   : > { %2679 = vmatpush.msra.mxu3 %v4515_v44  ;;  %2611 = vmatpush.msra.mxu0 %v4516_v34  ;;  %v4571_v44 = vld [vmem:[%s9505_s5 + $0x158] sm:$0xff]  ;;  %v4572_v34 = vld [vmem:[%s9505_s5 + $0x120] sm:$0xff] }
 0x2da   : > { %2634 = vmatpush.msra.mxu1 %v4517_v0  ;;  %2657 = vmatpush.msra.mxu2 %v4518_v27  ;;  %v4573_v0 = vld [vmem:[%s9505_s5 + $0x128] sm:$0xff]  ;;  %v4574_v27 = vld [vmem:[%s9505_s5 + $0x130] sm:$0xff] }
 0x2db   : > { %2680 = vmatpush.msra.mxu3 %v4519_v8  ;;  %2612 = vmatpush.msra.mxu0 %v4520_v53  ;;  %v4575_v8 = vld [vmem:[%s9505_s5 + $0x138] sm:$0xff]  ;;  %v4576_v53 = vld [vmem:[%s9505_s5 + $0x100] sm:$0xff] }
 0x2dc   : > { %2635 = vmatpush.msra.mxu1 %v4521_v2  ;;  %2658 = vmatpush.msra.mxu2 %v4522_v49  ;;  %v4577_v2 = vld [vmem:[%s9505_s5 + $0x108] sm:$0xff]  ;;  %v4578_v49 = vld [vmem:[%s9505_s5 + $0x110] sm:$0xff] }
 0x2dd   : > { %2681 = vmatpush.msra.mxu3 %v4523_v4  ;;  %2613 = vmatpush.msra.mxu0 %v4524_v23  ;;  %v4579_v4 = vld [vmem:[%s9505_s5 + $0x118] sm:$0xff]  ;;  %v4580_v23 = vld [vmem:[%s9505_s5 + $0xe0] sm:$0xff] }
 0x2de   : > { %2636 = vmatpush.msra.mxu1 %v4525_v56  ;;  %2659 = vmatpush.msra.mxu2 %v4526_v60  ;;  %v4581_v56 = vld [vmem:[%s9505_s5 + $0xe8] sm:$0xff]  ;;  %v4582_v60 = vld [vmem:[%s9505_s5 + $0xf0] sm:$0xff] }
 0x2df   : > { %2682 = vmatpush.msra.mxu3 %v4527_v59  ;;  %2614 = vmatpush.msra.mxu0 %v4528_v28  ;;  %v4583_v59 = vld [vmem:[%s9505_s5 + $0xf8] sm:$0xff]  ;;  %v4584_v28 = vld [vmem:[%s9505_s5 + $0xc0] sm:$0xff] }
 0x2e0   : > { %2637 = vmatpush.msra.mxu1 %v4529_v37  ;;  %2660 = vmatpush.msra.mxu2 %v4530_v11  ;;  %v4585_v37 = vld [vmem:[%s9505_s5 + $0xc8] sm:$0xff]  ;;  %v4586_v11 = vld [vmem:[%s9505_s5 + $0xd0] sm:$0xff] }
 0x2e1   : > { %2683 = vmatpush.msra.mxu3 %v4531_v7  ;;  %2615 = vmatpush.msra.mxu0 %v4532_v52  ;;  %v4587_v7 = vld [vmem:[%s9505_s5 + $0xd8] sm:$0xff]  ;;  %v4588_v52 = vld [vmem:[%s9505_s5 + $0xa0] sm:$0xff] }
 0x2e2   : > { %2638 = vmatpush.msra.mxu1 %v4533_v45  ;;  %2661 = vmatpush.msra.mxu2 %v4534_v42  ;;  %v4589_v45 = vld [vmem:[%s9505_s5 + $0xa8] sm:$0xff]  ;;  %v4590_v42 = vld [vmem:[%s9505_s5 + $0xb0] sm:$0xff] }
 0x2e3   : > { %2684 = vmatpush.msra.mxu3 %v4535_v47  ;;  %2616 = vmatpush.msra.mxu0 %v4536_v18  ;;  %v4591_v47 = vld [vmem:[%s9505_s5 + $0xb8] sm:$0xff]  ;;  %v4592_v18 = vld [vmem:[%s9505_s5 + $0x80] sm:$0xff] }
 0x2e4   : > { %2639 = vmatpush.msra.mxu1 %v4537_v13  ;;  %2662 = vmatpush.msra.mxu2 %v4538_v19  ;;  %v4593_v13 = vld [vmem:[%s9505_s5 + $0x88] sm:$0xff]  ;;  %v4594_v19 = vld [vmem:[%s9505_s5 + $0x90] sm:$0xff] }
 0x2e5   : > { %2685 = vmatpush.msra.mxu3 %v4539_v57  ;;  %2617 = vmatpush.msra.mxu0 %v4540_v50  ;;  %v4595_v57 = vld [vmem:[%s9505_s5 + $0x98] sm:$0xff]  ;;  %v4596_v50 = vld [vmem:[%s9505_s5 + $0x60] sm:$0xff] }
 0x2e6   : > { %2640 = vmatpush.msra.mxu1 %v4541_v63  ;;  %2663 = vmatpush.msra.mxu2 %v4542_v26  ;;  %v4597_v63 = vld [vmem:[%s9505_s5 + $0x68] sm:$0xff]  ;;  %v4598_v26 = vld [vmem:[%s9505_s5 + $0x70] sm:$0xff] }
 0x2e7   : > { %2686 = vmatpush.msra.mxu3 %v4543_v48  ;;  %2618 = vmatpush.msra.mxu0 %v4544_v46  ;;  %v4599_v48 = vld [vmem:[%s9505_s5 + $0x78] sm:$0xff]  ;;  %v4600_v46 = vld [vmem:[%s9505_s5 + $0x40] sm:$0xff] }
 0x2e8   : > { %2641 = vmatpush.msra.mxu1 %v4545_v43  ;;  %2664 = vmatpush.msra.mxu2 %v4546_v35  ;;  %v4601_v43 = vld [vmem:[%s9505_s5 + $0x48] sm:$0xff]  ;;  %v4602_v35 = vld [vmem:[%s9505_s5 + $0x50] sm:$0xff] }
 0x2e9   : > { %2687 = vmatpush.msra.mxu3 %v4547_v24  ;;  %2695 = vmatpush.msrb.mxu0 %v4548_v36  ;;  %v4603_v24 = vld [vmem:[%s9505_s5 + $0x58] sm:$0xff]  ;;  %v4604_v36 = vld [vmem:[%s9505_s5 + $0x20] sm:$0xff] }
 0x2ea   : > { %2718 = vmatpush.msrb.mxu1 %v4549_v20  ;;  %2741 = vmatpush.msrb.mxu2 %v4550_v6  ;;  %v4605_v20 = vld [vmem:[%s9505_s5 + $0x28] sm:$0xff]  ;;  %v4606_v6 = vld [vmem:[%s9505_s5 + $0x30] sm:$0xff] }
 0x2eb   : > { %2764 = vmatpush.msrb.mxu3 %v4551_v9  ;;  %2696 = vmatpush.msrb.mxu0 %v4552_v54  ;;  %v4607_v9 = vld [vmem:[%s9505_s5 + $0x38] sm:$0xff]  ;;  %v4608_v54 = vld [vmem:[%s9505_s5] sm:$0xff] }
 0x2ec   : > { %2719 = vmatpush.msrb.mxu1 %v4553_v30  ;;  %2742 = vmatpush.msrb.mxu2 %v4554_v12  ;;  %v4609_v30 = vld [vmem:[%s9505_s5 + $0x8] sm:$0xff]  ;;  %v4610_v12 = vld [vmem:[%s9505_s5 + $0x10] sm:$0xff] }
 0x2ed   : > { %2765 = vmatpush.msrb.mxu3 %v4555_v29  ;;  %2697 = vmatpush.msrb.mxu0 %v4556_v39  ;;  %v4611_v29 = vld [vmem:[%s9505_s5 + $0x18] sm:$0xff] }
 0x2ee   : > { %2720 = vmatpush.msrb.mxu1 %v4557_v16  ;;  %2743 = vmatpush.msrb.mxu2 %v4558_v62 }
 0x2ef   : > { %2766 = vmatpush.msrb.mxu3 %v4559_v40  ;;  %2698 = vmatpush.msrb.mxu0 %v4560_v32 }
 0x2f0   : > { %2721 = vmatpush.msrb.mxu1 %v4561_v25  ;;  %2744 = vmatpush.msrb.mxu2 %v4562_v33 }
 0x2f1   : > { %2767 = vmatpush.msrb.mxu3 %v4563_v10  ;;  %2699 = vmatpush.msrb.mxu0 %v4564_v3 }
 0x2f2   : > { %2722 = vmatpush.msrb.mxu1 %v4565_v41  ;;  %2745 = vmatpush.msrb.mxu2 %v4566_v38 }
 0x2f3   : > { %2768 = vmatpush.msrb.mxu3 %v4567_v61  ;;  %2700 = vmatpush.msrb.mxu0 %v4568_v15 }
 0x2f4   : > { %2723 = vmatpush.msrb.mxu1 %v4569_v55  ;;  %2746 = vmatpush.msrb.mxu2 %v4570_v21 }
 0x2f5   : > { %2769 = vmatpush.msrb.mxu3 %v4571_v44  ;;  %2701 = vmatpush.msrb.mxu0 %v4572_v34 }
 0x2f6   : > { %2724 = vmatpush.msrb.mxu1 %v4573_v0  ;;  %2747 = vmatpush.msrb.mxu2 %v4574_v27 }
 0x2f7   : > { %2770 = vmatpush.msrb.mxu3 %v4575_v8  ;;  %2702 = vmatpush.msrb.mxu0 %v4576_v53 }
 0x2f8   : > { %2725 = vmatpush.msrb.mxu1 %v4577_v2  ;;  %2748 = vmatpush.msrb.mxu2 %v4578_v49 }
 0x2f9   : > { %2771 = vmatpush.msrb.mxu3 %v4579_v4  ;;  %2703 = vmatpush.msrb.mxu0 %v4580_v23 }
 0x2fa   : > { %2726 = vmatpush.msrb.mxu1 %v4581_v56  ;;  %2749 = vmatpush.msrb.mxu2 %v4582_v60  ;;  %v3781_v56 = vld [vmem:[%s4993_s27 + $0xc0] sm:$0xff] }
 0x2fb   : > { %2772 = vmatpush.msrb.mxu3 %v4583_v59  ;;  %2704 = vmatpush.msrb.mxu0 %v4584_v28  ;;  %v3782_v28 = vld [vmem:[%s4993_s27 + $0xc8] sm:$0xff] }
 0x2fc   : > { %2727 = vmatpush.msrb.mxu1 %v4585_v37  ;;  %2750 = vmatpush.msrb.mxu2 %v4586_v11 }
 0x2fd   : > { %2773 = vmatpush.msrb.mxu3 %v4587_v7  ;;  %2705 = vmatpush.msrb.mxu0 %v4588_v52 }
 0x2fe   : > { %2728 = vmatpush.msrb.mxu1 %v4589_v45  ;;  %2751 = vmatpush.msrb.mxu2 %v4590_v42 }
 0x2ff   : > { %2774 = vmatpush.msrb.mxu3 %v4591_v47  ;;  %2706 = vmatpush.msrb.mxu0 %v4592_v18 }
 0x300   : > { %2729 = vmatpush.msrb.mxu1 %v4593_v13  ;;  %2752 = vmatpush.msrb.mxu2 %v4594_v19 }
 0x301   : > { %2775 = vmatpush.msrb.mxu3 %v4595_v57  ;;  %2707 = vmatpush.msrb.mxu0 %v4596_v50  ;;  %v3783_v57 = vld [vmem:[%s4993_s27 + $0xd0] sm:$0xff] }
 0x302   : > { %2730 = vmatpush.msrb.mxu1 %v4597_v63  ;;  %2753 = vmatpush.msrb.mxu2 %v4598_v26 }
 0x303   : > { %2776 = vmatpush.msrb.mxu3 %v4599_v48  ;;  %2708 = vmatpush.msrb.mxu0 %v4600_v46 }
 0x304   : > { %2731 = vmatpush.msrb.mxu1 %v4601_v43  ;;  %2754 = vmatpush.msrb.mxu2 %v4602_v35 }
 0x305   : > { %2777 = vmatpush.msrb.mxu3 %v4603_v24  ;;  %2709 = vmatpush.msrb.mxu0 %v4604_v36 }
 0x306   : > { %2732 = vmatpush.msrb.mxu1 %v4605_v20  ;;  %2755 = vmatpush.msrb.mxu2 %v4606_v6 }
 0x307   : > { %2778 = vmatpush.msrb.mxu3 %v4607_v9  ;;  %2710 = vmatpush.msrb.mxu0 %v4608_v54 }
 0x308   : > { %2733 = vmatpush.msrb.mxu1 %v4609_v30  ;;  %2756 = vmatpush.msrb.mxu2 %v4610_v12 }
 0x309   : > { %2779 = vmatpush.msrb.mxu3 %v4611_v29 }
 0x31a   : > { %v2067_v39 = vpop.f32.mrf.mxu0  ;;  %v2090_v16 = vpop.f32.mrf.mxu1 }
 0x321   : > { %v2113_v62 = vpop.f32.mrf.mxu2  ;;  %v2136_v41 = vpop.f32.mrf.mxu3 }
 0x32b   : > { %v2070_v40 = vpop.f32.mrf.mxu0  ;;  %v2093_v32 = vpop.f32.mrf.mxu1 }
 0x332   : > { %v2116_v25 = vpop.f32.mrf.mxu2  ;;  %v8231_v27 = vpop.f32.mrf.mxu3 }
 0x333   : > { %v2159_v33 = vpop.f32.mrf.mxu0  ;;  %v2182_v10 = vpop.f32.mrf.mxu1 }
 0x334   : > { %v2160_v3 = vadd.f32 %v2159_v33, %v2067_v39  ;;  %v2183_v38 = vadd.f32 %v2182_v10, %v2090_v16  ;;  %v3785_v39 = vld [vmem:[%s4993_s27 + $0xe0] sm:$0xff] }
 0x336   : > { %v2234_v61 = vadd.f32 %v2160_v3, %v6509_v51  ;;  %v2235_v15 = vadd.f32 %v2183_v38, %v6511_v17 }
 0x338   : > { %v3775_v44 = vmul.f32 -1.442695, %v2234_v61  ;;  %v3776_v0 = vmul.f32 -1.442695, %v2235_v15 }
 0x33a   : > { %v2205_v55 = vpop.f32.mrf.mxu2  ;;  %4033 = vpow2.f32 %v3775_v44  ;;  %v2228_v18 = vpop.f32.mrf.mxu3 }
 0x33b   : > { %v2162_v21 = vpop.f32.mrf.mxu0  ;;  %v2185_v34 = vpop.f32.mrf.mxu1  ;;  %4035 = vpow2.f32 %v3776_v0  ;;  %v2206_v49 = vadd.f32 %v2205_v55, %v2113_v62  ;;  %v2229_v12 = vadd.f32 %v2228_v18, %v2136_v41 }
 0x33c   : > { %v2163_v8 = vadd.f32 %v2162_v21, %v2070_v40  ;;  %v2186_v53 = vadd.f32 %v2185_v34, %v2093_v32  ;;  %v3786_v32 = vld [vmem:[%s4993_s27 + $0xe8] sm:$0xff]  ;;  %v3787_v34 = vld [vmem:[%s4993_s27 + $0xf0] sm:$0xff] }
 0x33d   : > { %v2236_v7 = vadd.f32 %v2206_v49, %v9860_v22  ;;  %v2237_v55 = vadd.f32 %v2229_v12, %v9861_v31 }
 0x33e   : > { %v2238_v4 = vadd.f32 %v2163_v8, %v6509_v51  ;;  %v2239_v23 = vadd.f32 %v2186_v53, %v6511_v17 }
 0x33f   : > { %v3777_v50 = vmul.f32 -1.442695, %v2236_v7 }
 0x340   : > { %v4034_v59 = vpop.eup %4033  ;;  %v3778_v52 = vmul.f32 -1.442695, %v2238_v4  ;;  %v3779_v45 = vmul.f32 -1.442695, %v2239_v23 }
 0x341   : > { %v4036_v11 = vpop.eup %4035  ;;  %v8238_v47 = vadd.f32 1.0, %v4034_v59 }
 0x342   : > { %v2208_v2 = vpop.f32.mrf.mxu2  ;;  %v8240_v19 = vadd.f32 1.0, %v4036_v11  ;;  %4037 = vpow2.f32 %v3778_v52  ;;  %v2231_v6 = vpop.f32.mrf.mxu3 }
 0x343   : > { %v2394_v60 = vpop.f32.mrf.mxu0  ;;  %4039 = vpow2.f32 %v3779_v45  ;;  %v2209_v20 = vadd.f32 %v2208_v2, %v2116_v25  ;;  %v2275_v11 = vand.u32 2147483647, %v8238_v47  ;;  %vm2271_vm10 = vweird.f32 %v8238_v47 }
 0x344   : > { %v2417_v37 = vpop.f32.mrf.mxu1  ;;  %v2469_v42 = vadd.f32 %v3781_v56, %v2394_v60  ;;  %4041 = vrcp.f32 %v8238_v47  ;;  %v3784_v56 = vld [vmem:[%s4993_s27 + $0xd8] sm:$0xff]  ;;  %v2292_v45 = vand.u32 2147483648, %v8240_v19  ;;  %vm2286_vm11 = vweird.f32 %v8240_v19 }
 0x345   : > { %v2470_v13 = vadd.f32 %v3782_v28, %v2417_v37  ;;  %4043 = vrcp.f32 %v8240_v19  ;;  %v2240_v3 = vadd.f32 %v2209_v20, %v9860_v22  ;;  %vm8321_vm13 = vcmp.eq.f32.partialorder %v2275_v11, 8.507059e+37 }
 0x346   : > { %v3789_v26 = vmul.f32 -1.442695, %v2469_v42  ;;  %4045 = vpow2.f32 %v3777_v50  ;;  %v2277_v42 = vand.u32 2147483648, %v8238_v47 }
 0x347   : > { %v3790_v48 = vmul.f32 -1.442695, %v2470_v13  ;;  %v3780_v49 = vmul.f32 -1.442695, %v2240_v3  ;;  %v2290_v13 = vand.u32 2147483647, %v8240_v19 }
 0x348   : > { %4047 = vpow2.f32 %v3789_v26  ;;  %v4038_v35 = vpop.eup %4037  ;;  %v8289_v26 = vadd.f32 %v2231_v6, %v8231_v27  ;;  %v2278_v11 = vor.u32 1.1754944e-38, %v2277_v42 }
 0x349   : > { %4049 = vpow2.f32 %v3790_v48  ;;  %v4040_v24 = vpop.eup %4039  ;;  %v8249_v54 = vadd.f32 1.0, %v4038_v35  ;;  %vm2291_vm7 = vcmp.eq.f32.partialorder %v2290_v13, 8.507059e+37 }
 0x34a   : > { %v2440_v63 = vpop.f32.mrf.mxu2  ;;  %v8245_v36 = vpop.eup %4041  ;;  %v8251_v29 = vadd.f32 1.0, %v4040_v24 }
 0x34b   : > { %v2471_v46 = vadd.f32 %v3783_v57, %v2440_v63  ;;  %v8247_v9 = vpop.eup %4043  ;;  %v2397_v16 = vpop.f32.mrf.mxu0  ;;  %v2267_v40 = vmul.f32 %v8245_v36, %v8238_v47  ;;  %vm2272_vm8 = vweird.f32 %v8245_v36  ;;  %v2293_v47 = vor.u32 1.1754944e-38, %v2292_v45 }
 0x34c   : > { %v4046_v30 = vpop.eup %4045  ;;  %v2420_v33 = vpop.f32.mrf.mxu1  ;;  %v2282_v25 = vmul.f32 %v8247_v9, %v8240_v19  ;;  %v2473_v15 = vadd.f32 %v3785_v39, %v2397_v16  ;;  %vm2287_vm9 = vweird.f32 %v8247_v9  ;;  %vm8341_vm5 = vmor %vm2271_vm10, %vm2272_vm8  ;;  %v8372_v45 = vadd.f32 %v8289_v26, %v9861_v31 }
 0x34d   : > { %v3791_v43 = vmul.f32 -1.442695, %v2471_v46  ;;  %v2474_v44 = vadd.f32 %v3786_v32, %v2420_v33  ;;  %v2268_v8 = vsub.f32 1.0, %v2267_v40  ;;  %v8270_v53 = vadd.f32 1.0, %v4046_v30  ;;  %v2463_v60 = vpop.f32.mrf.mxu3  ;;  %vm8351_vm6 = vmor %vm2286_vm11, %vm2287_vm9 }
 0x34e   : > { %v4048_v62 = vpop.eup %4047  ;;  %v2283_v2 = vsub.f32 1.0, %v2282_v25  ;;  %v3792_v4 = vmul.f32 -1.442695, %v2473_v15  ;;  %v2472_v57 = vadd.f32 %v3784_v56, %v2463_v60  ;;  %vm2316_vm11 = vweird.f32 %v8249_v54 }
 0x34f   : > { %4051 = vpow2.f32 %v3791_v43  ;;  %v4050_v10 = vpop.eup %4049  ;;  %v8260_v38 = vadd.f32 1.0, %v4048_v62  ;;  %v3793_v59 = vmul.f32 -1.442695, %v2474_v44  ;;  %v2269_v37 = vmul.f32 %v8245_v36, %v2268_v8 }
 0x350   : > { %4053 = vrcp.f32 %v8249_v54  ;;  %v8263_v61 = vadd.f32 1.0, %v4050_v10  ;;  %v2284_v52 = vmul.f32 %v8247_v9, %v2283_v2 }
 0x351   : > { %4055 = vrcp.f32 %v8251_v29  ;;  %v8296_v43 = vadd.f32 %v8245_v36, %v2269_v37  ;;  %v2512_v62 = vand.u32 2147483648, %v8260_v38  ;;  %v2510_v10 = vand.u32 2147483647, %v8260_v38 }
 0x352   : > { %v2443_v0 = vpop.f32.mrf.mxu2  ;;  %4057 = vrcp.f32 %v8260_v38  ;;  %v8304_v27 = vadd.f32 %v8247_v9, %v2284_v52  ;;  %v2527_v16 = vand.u32 2147483648, %v8263_v61  ;;  %vm2506_vm15 = vweird.f32 %v8260_v38 }
 0x353   : > { %4059 = vrcp.f32 %v8263_v61  ;;  %v2475_v23 = vadd.f32 %v3787_v34, %v2443_v0  ;;  %v2525_v15 = vand.u32 2147483647, %v8263_v61  ;;  %vm2521_vm0 = vweird.f32 %v8263_v61 }
 0x354   : > { %v2528_v2 = vor.u32 1.1754944e-38, %v2527_v16  ;;  %vm2511_vm3 = vcmp.eq.f32.partialorder %v2510_v10, 8.507059e+37  ;;  %v2274_v42 = vsel %vm8341_vm5, %v8245_v36, %v8296_v43 }
 0x355   : > { %v4052_v41 = vpop.eup %4051  ;;  %v3794_v50 = vmul.f32 -1.442695, %v2475_v23  ;;  %vm2526_vm4 = vcmp.eq.f32.partialorder %v2525_v15, 8.507059e+37  ;;  %v8384_v19 = vsel %vm8321_vm13, %v2278_v11, %v2274_v42 }
 0x356   : > { %v8267_v21 = vadd.f32 1.0, %v4052_v41  ;;  %v8276_v28 = vpop.eup %4053 }
 0x357   : > { %v8281_v7 = vpop.eup %4055  ;;  %v8308_v20 = vmul.f32 %v8276_v28, %v8249_v54  ;;  %vm2317_vm5 = vweird.f32 %v8276_v28 }
 0x358   : > { %4061 = vrcp.f32 %v8267_v21  ;;  %v4058_v18 = vpop.eup %4057  ;;  %v8318_v32 = vmul.f32 %v8281_v7, %v8251_v29  ;;  %vm2536_vm9 = vweird.f32 %v8267_v21 }
 0x359   : > { %4063 = vtanh.f32 %v2237_v55  ;;  %v4060_v63 = vpop.eup %4059  ;;  %v2502_v48 = vmul.f32 %v4058_v18, %v8260_v38  ;;  %vm2507_vm12 = vweird.f32 %v4058_v18 }
 0x35a   : > { %4065 = vrcp.f32 %v8270_v53  ;;  %v2517_v35 = vmul.f32 %v4060_v63, %v8263_v61  ;;  %vm2522_vm14 = vweird.f32 %v4060_v63  ;;  %vm2508_vm1 = vmor %vm2506_vm15, %vm2507_vm12  ;;  %v2328_v36 = vsub.f32 1.0, %v8318_v32 }
 0x35b   : > { %4067 = vpow2.f32 %v3780_v49  ;;  %v2503_v6 = vsub.f32 1.0, %v2502_v48  ;;  %v2513_v49 = vor.u32 1.1754944e-38, %v2512_v62  ;;  %vm2523_vm2 = vmor %vm2521_vm0, %vm2522_vm14  ;;  %v2466_v48 = vpop.f32.mrf.mxu3 }
 0x35c   : > { %4069 = vpow2.f32 %v3792_v4  ;;  %v2518_v39 = vsub.f32 1.0, %v2517_v35  ;;  %v2329_v3 = vmul.f32 %v8281_v7, %v2328_v36  ;;  %v4612_v36 = vld [vmem:[%s9503_s3 + $0x1e0] sm:$0xff] }
 0x35d   : > { %4071 = vpow2.f32 %v3793_v59  ;;  %v2504_v33 = vmul.f32 %v4058_v18, %v2503_v6  ;;  %v2289_v6 = vsel %vm8351_vm6, %v8247_v9, %v8304_v27  ;;  %vm2332_vm6 = vweird.f32 %v8281_v7 }
 0x35e   : > { %v8292_v46 = vpop.eup %4061  ;;  %4073 = vpow2.f32 %v3794_v50  ;;  %v2519_v41 = vmul.f32 %v4060_v63, %v2518_v39  ;;  %v3788_v50 = vld [vmem:[%s4993_s27 + $0xf8] sm:$0xff]  ;;  %v8388_v27 = vsel %vm2291_vm7, %v2293_v47, %v2289_v6  ;;  %v2330_v6 = vadd.f32 %v8281_v7, %v2329_v3 }
 0x35f   : > { %v8300_v24 = vpop.eup %4063  ;;  %v2532_v30 = vmul.f32 %v8292_v46, %v8267_v21  ;;  %4075 = vtanh.f32 %v2472_v57  ;;  %v2505_v34 = vadd.f32 %v4058_v18, %v2504_v33  ;;  %v2476_v39 = vadd.f32 %v3788_v50, %v2466_v48 }
 0x360   : > { %v8312_v12 = vpop.eup %4065  ;;  %v2520_v4 = vadd.f32 %v4060_v63, %v2519_v41  ;;  %vm2537_vm8 = vweird.f32 %v8292_v46  ;;  %v2540_v33 = vand.u32 2147483647, %v8267_v21  ;;  %vm2331_vm7 = vweird.f32 %v8251_v29 }
 0x361   : > { %v4068_v40 = vpop.eup %4067  ;;  %v2533_v44 = vsub.f32 1.0, %v2532_v30  ;;  %v2509_v38 = vsel %vm2508_vm1, %v4058_v18, %v2505_v34  ;;  %v2313_v30 = vsub.f32 1.0, %v8308_v20  ;;  %v8380_v9 = vmul.f32 %v8312_v12, %v8270_v53  ;;  %vm8401_vm10 = vmor %vm2536_vm9, %vm2537_vm8 }
 0x362   : > { %v4070_v25 = vpop.eup %4069  ;;  %v2514_v60 = vsel %vm2511_vm3, %v2513_v49, %v2509_v38  ;;  %v2524_v59 = vsel %vm2523_vm2, %v4060_v63, %v2520_v4  ;;  %v8390_v20 = vadd.f32 1.0, %v4068_v40  ;;  %vm2541_vm13 = vcmp.eq.f32.partialorder %v2540_v33, 8.507059e+37  ;;  %vm8457_vm8 = vmor %vm2316_vm11, %vm2317_vm5 }
 0x363   : > { %v4072_v55 = vpop.eup %4071  ;;  %v8328_v0 = vadd.f32 1.0, %v4070_v25  ;;  %v2534_v52 = vmul.f32 %v8292_v46, %v2533_v44  ;;  %v2529_v18 = vsel %vm2526_vm4, %v2528_v2, %v2524_v59  ;;  %v2314_v32 = vmul.f32 %v8276_v28, %v2313_v30  ;;  %vm8477_vm9 = vmor %vm2331_vm7, %vm2332_vm6 }
 0x364   : > { %v4074_v8 = vpop.eup %4073  ;;  %v8331_v23 = vadd.f32 1.0, %v4072_v55  ;;  %v2593_v35 = vmul.f32 %v2529_v18, %v7495_v5  ;;  %v2542_v5 = vand.u32 2147483648, %v8267_v21  ;;  %vm2346_vm5 = vweird.f32 %v8390_v20 }
 0x365   : > { %4077 = vrcp.f32 %v8328_v0  ;;  %v8334_v56 = vadd.f32 1.0, %v4074_v8  ;;  %v4076_v61 = vpop.eup %4075  ;;  %v2535_v13 = vadd.f32 %v8292_v46, %v2534_v52  ;;  %v2557_v34 = vand.u32 2147483648, %v8328_v0 }
 0x366   : > { %4079 = vrcp.f32 %v8331_v23  ;;  %v2595_v57 = vmul.f32 %v4076_v61, %v2514_v60  ;;  %v2543_v40 = vor.u32 1.1754944e-38, %v2542_v5  ;;  %v2572_v8 = vand.u32 2147483648, %v8331_v23  ;;  %v4613_v5 = vld [vmem:[%s9503_s3 + $0x1e8] sm:$0xff] }
 0x367   : > { %4081 = vrcp.f32 %v8334_v56  ;;  %v2539_v55 = vsel %vm8401_vm10, %v8292_v46, %v2535_v13  ;;  %v2555_v49 = vand.u32 2147483647, %v8328_v0  ;;  %v2570_v38 = vand.u32 2147483647, %v8331_v23  ;;  %v4615_v13 = vld [vmem:[%s9503_s3 + $0x1f8] sm:$0xff] }
 0x368   : > { %v8376_v43 = vadd.f32 %v2595_v57, %v2593_v35  ;;  %v2544_v61 = vsel %vm2541_vm13, %v2543_v40, %v2539_v55  ;;  %vm2551_vm15 = vweird.f32 %v8328_v0  ;;  %vm2566_vm0 = vweird.f32 %v8331_v23  ;;  %v4621_v55 = vld [vmem:[%s9503_s3 + $0x1a8] sm:$0xff] }
 0x369   : > { %v2558_v11 = vor.u32 1.1754944e-38, %v2557_v34  ;;  %v2573_v57 = vor.u32 1.1754944e-38, %v2572_v8  ;;  %vm2556_vm3 = vcmp.eq.f32.partialorder %v2555_v49, 8.507059e+37  ;;  %v8421_v48 = vadd.f32 %v8276_v28, %v2314_v32  ;;  %v4623_v34 = vld [vmem:[%s9503_s3 + $0x1b8] sm:$0xff] }
 0x36a   : > { %4083 = vtanh.f32 %v8376_v43  ;;  %vm2571_vm4 = vcmp.eq.f32.partialorder %v2570_v38, 8.507059e+37  ;;  %v2322_v35 = vand.u32 2147483648, %v8249_v54  ;;  %v2335_v32 = vand.u32 2147483647, %v8251_v29  ;;  %v4625_v38 = vld [vmem:[%s9503_s3 + $0x188] sm:$0xff] }
 0x36b   : > { %v4078_v16 = vpop.eup %4077  ;;  %4085 = vtanh.f32 %v2476_v39  ;;  %v2337_v39 = vand.u32 2147483648, %v8251_v29  ;;  %v4619_v29 = vld [vmem:[%s9503_s3 + $0x1d8] sm:$0xff]  ;;  %v2334_v40 = vsel %vm8477_vm9, %v8281_v7, %v2330_v6  ;;  %v2585_v7 = vand.u32 2147483647, %v8334_v56 }
 0x36c   : > { %v4080_v26 = vpop.eup %4079  ;;  %v2547_v62 = vmul.f32 %v4078_v16, %v8328_v0  ;;  %vm2552_vm12 = vweird.f32 %v4078_v16  ;;  %4087 = vrcp.f32 %v8390_v20  ;;  %v2323_v41 = vor.u32 1.1754944e-38, %v2322_v35  ;;  %v4633_v35 = vld [vmem:[%s9503_s3 + $0x148] sm:$0xff] }
 0x36d   : > { %v2562_v10 = vmul.f32 %v4080_v26, %v8331_v23  ;;  %v8398_v25 = vpop.eup %4081  ;;  %vm2567_vm14 = vweird.f32 %v4080_v26  ;;  %vm2553_vm1 = vmor %vm2551_vm15, %vm2552_vm12  ;;  %4089 = vtanh.f32 %v8372_v45  ;;  %vm2581_vm12 = vweird.f32 %v8334_v56  ;;  %v4638_v45 = vld [vmem:[%s9503_s3 + $0x130] sm:$0xff] }
 0x36e   : > { %v2548_v15 = vsub.f32 1.0, %v2547_v62  ;;  %v2577_v21 = vmul.f32 %v8398_v25, %v8334_v56  ;;  %vm2568_vm2 = vmor %vm2566_vm0, %vm2567_vm14  ;;  %v2360_v62 = vmul.f32 %v8300_v24, %v8384_v19  ;;  %vm2582_vm10 = vweird.f32 %v8398_v25  ;;  %v4641_v19 = vld [vmem:[%s9503_s3 + $0x108] sm:$0xff] }
 0x36f   : > { %v2563_v44 = vsub.f32 1.0, %v2562_v10  ;;  %v4616_v10 = vld [vmem:[%s9503_s3 + $0x1c0] sm:$0xff]  ;;  %vm2336_vm13 = vcmp.eq.f32.partialorder %v2335_v32, 8.507059e+37  ;;  %vm8518_vm14 = vmor %vm2581_vm12, %vm2582_vm10  ;;  %vm2586_vm15 = vcmp.eq.f32.partialorder %v2585_v7, 8.507059e+37  ;;  %vm2302_vm0 = vweird.f32 %v8312_v12  ;;  %v4639_v32 = vld [vmem:[%s9503_s3 + $0x138] sm:$0xff] }
 0x370   : > { %v2549_v2 = vmul.f32 %v4078_v16, %v2548_v15  ;;  %v4084_v46 = vpop.eup %4083  ;;  %v2578_v60 = vsub.f32 1.0, %v2577_v21  ;;  %v4620_v15 = vld [vmem:[%s9503_s3 + $0x1a0] sm:$0xff]  ;;  %v4622_v21 = vld [vmem:[%s9503_s3 + $0x1b0] sm:$0xff]  ;;  %v4649_v7 = vld [vmem:[%s9503_s3 + $0xc8] sm:$0xff] }
 0x371   : > { %v2564_v4 = vmul.f32 %v4080_v26, %v2563_v44  ;;  %v8416_v37 = vmul.f32 %v4084_v46, %v2544_v61  ;;  %v4086_v18 = vpop.eup %4085  ;;  %v2338_v44 = vor.u32 1.1754944e-38, %v2337_v39  ;;  %v4636_v39 = vld [vmem:[%s9503_s3 + $0x120] sm:$0xff] }
 0x372   : > { %v2550_v59 = vadd.f32 %v4078_v16, %v2549_v2  ;;  %v2579_v0 = vmul.f32 %v8398_v25, %v2578_v60  ;;  %v8470_v24 = vpop.eup %4087 }
 0x373   : > { %v2565_v52 = vadd.f32 %v4080_v26, %v2564_v4  ;;  %2619 = vmatmul.f32.vlgmr.msra.gmra.mxu0 %v8416_v37  ;;  %2642 = vmatmul.f32.vlgmr.msra.gmra.mxu1 %v8416_v37  ;;  %v2342_v2 = vmul.f32 %v8470_v24, %v8390_v20  ;;  %v4624_v4 = vld [vmem:[%s9503_s3 + $0x180] sm:$0xff]  ;;  %v4090_v46 = vpop.eup %4089  ;;  %v2339_v61 = vsel %vm2336_vm13, %v2338_v44, %v2334_v40 }
 0x374   : > { %v2554_v50 = vsel %vm2553_vm1, %v4078_v16, %v2550_v59  ;;  %2665 = vmatmul.f32.vlgmr.msra.gmra.mxu2 %v8416_v37  ;;  %2688 = vmatmul.f32.vlgmr.msra.gmra.mxu3 %v8416_v37  ;;  %v2320_v16 = vand.u32 2147483647, %v8249_v54  ;;  %v2298_v54 = vsub.f32 1.0, %v8380_v9  ;;  %v2580_v3 = vadd.f32 %v8398_v25, %v2579_v0  ;;  %v4618_v9 = vld [vmem:[%s9503_s3 + $0x1d0] sm:$0xff]  ;;  %v4648_v44 = vld [vmem:[%s9503_s3 + $0xc0] sm:$0xff] }
 0x375   : > { %v2559_v63 = vsel %vm2556_vm3, %v2558_v11, %v2554_v50  ;;  %v2569_v47 = vsel %vm2568_vm2, %v4080_v26, %v2565_v52  ;;  %2930 = vmatpush.msra.mxu0 %v4612_v36  ;;  %2953 = vmatpush.msra.mxu1 %v4613_v5  ;;  %v2358_v26 = vmul.f32 %v8388_v27, %v7631_v1  ;;  %v4617_v1 = vld [vmem:[%s9503_s3 + $0x1c8] sm:$0xff]  ;;  %v4626_v59 = vld [vmem:[%s9503_s3 + $0x190] sm:$0xff]  ;;  %v4627_v11 = vld [vmem:[%s9503_s3 + $0x198] sm:$0xff]  ;;  %v2343_v6 = vsub.f32 1.0, %v2342_v2 }
 0x376   : > { %v2574_v23 = vsel %vm2571_vm4, %v2573_v57, %v2569_v47  ;;  %v2596_v42 = vmul.f32 %v4086_v18, %v2559_v63  ;;  %2999 = vmatpush.msra.mxu3 %v4615_v13  ;;  %v2319_v27 = vsel %vm8457_vm8, %v8276_v28, %v8421_v48  ;;  %v2587_v28 = vand.u32 2147483648, %v8334_v56  ;;  %v4628_v57 = vld [vmem:[%s9503_s3 + $0x160] sm:$0xff]  ;;  %v4630_v50 = vld [vmem:[%s9503_s3 + $0x170] sm:$0xff]  ;;  %v4631_v48 = vld [vmem:[%s9503_s3 + $0x178] sm:$0xff] }
 0x377   : > { %v2594_v30 = vmul.f32 %v2574_v23, %v7581_v14  ;;  %v4614_v14 = vld [vmem:[%s9503_s3 + $0x1f0] sm:$0xff]  ;;  %2931 = vmatpush.msra.mxu0 %v4616_v10  ;;  %2954 = vmatpush.msra.mxu1 %v4617_v1  ;;  %vm2321_vm11 = vcmp.eq.f32.partialorder %v2320_v16, 8.507059e+37  ;;  %v8512_v8 = vadd.f32 %v2360_v62, %v2358_v26  ;;  %v2584_v60 = vsel %vm8518_vm14, %v8398_v25, %v2580_v3  ;;  %v4629_v25 = vld [vmem:[%s9503_s3 + $0x168] sm:$0xff]  ;;  %v4651_v56 = vld [vmem:[%s9503_s3 + $0xd8] sm:$0xff] }
 0x378   : > { %2976 = vmatpush.msra.mxu2 %v4614_v14  ;;  %3000 = vmatpush.msra.mxu3 %v4619_v29  ;;  %v2324_v49 = vsel %vm2321_vm11, %v2323_v41, %v2319_v27  ;;  %v2299_v52 = vmul.f32 %v8312_v12, %v2298_v54  ;;  %v2588_v18 = vor.u32 1.1754944e-38, %v2587_v28  ;;  %v2359_v47 = vmul.f32 %v2339_v61, %v7698_v58  ;;  %v4634_v36 = vld [vmem:[%s9503_s3 + $0x150] sm:$0xff]  ;;  %v4635_v58 = vld [vmem:[%s9503_s3 + $0x158] sm:$0xff]  ;;  %v4637_v16 = vld [vmem:[%s9503_s3 + $0x128] sm:$0xff] }
 0x379   : > { %v8462_v33 = vadd.f32 %v2596_v42, %v2594_v30  ;;  %2932 = vmatpush.msra.mxu0 %v4620_v15  ;;  %2955 = vmatpush.msra.mxu1 %v4621_v55  ;;  %v2361_v0 = vmul.f32 %v4090_v46, %v2324_v49  ;;  %v4632_v42 = vld [vmem:[%s9503_s3 + $0x140] sm:$0xff]  ;;  %v2307_v14 = vand.u32 2147483648, %v8270_v53  ;;  %vm2301_vm1 = vweird.f32 %v8270_v53  ;;  %v4642_v3 = vld [vmem:[%s9503_s3 + $0x110] sm:$0xff]  ;;  %v4645_v41 = vld [vmem:[%s9503_s3 + $0xe8] sm:$0xff] }
 0x37a   : > { %2977 = vmatpush.msra.mxu2 %v4618_v9  ;;  %3001 = vmatpush.msra.mxu3 %v4623_v34  ;;  %v2589_v23 = vsel %vm2586_vm15, %v2588_v18, %v2584_v60  ;;  %v2300_v5 = vadd.f32 %v8312_v12, %v2299_v52  ;;  %v2305_v13 = vand.u32 2147483647, %v8270_v53  ;;  %vm8583_vm2 = vmor %vm2301_vm1, %vm2302_vm0  ;;  %v2344_v10 = vmul.f32 %v8470_v24, %v2343_v6  ;;  %v4640_v54 = vld [vmem:[%s9503_s3 + $0x100] sm:$0xff]  ;;  %v4646_v28 = vld [vmem:[%s9503_s3 + $0xf0] sm:$0xff] }
 0x37b   : > { %4091 = vtanh.f32 %v8462_v33  ;;  %2933 = vmatpush.msra.mxu0 %v4624_v4  ;;  %2956 = vmatpush.msra.mxu1 %v4625_v38  ;;  %v8579_v26 = vadd.f32 %v2361_v0, %v2359_v47  ;;  %v2308_v27 = vor.u32 1.1754944e-38, %v2307_v14  ;;  %v4644_v29 = vld [vmem:[%s9503_s3 + $0xe0] sm:$0xff]  ;;  %v4647_v15 = vld [vmem:[%s9503_s3 + $0xf8] sm:$0xff]  ;;  %vm2347_vm4 = vweird.f32 %v8470_v24  ;;  %v4650_v49 = vld [vmem:[%s9503_s3 + $0xd0] sm:$0xff] }
 0x37c   : > { %2978 = vmatpush.msra.mxu2 %v4622_v21  ;;  %3002 = vmatpush.msra.mxu3 %v4627_v11  ;;  %4093 = vtanh.f32 %v8512_v8  ;;  %v2304_v53 = vsel %vm8583_vm2, %v8312_v12, %v2300_v5  ;;  %v4643_v12 = vld [vmem:[%s9503_s3 + $0x118] sm:$0xff]  ;;  %vm2306_vm3 = vcmp.eq.f32.partialorder %v2305_v13, 8.507059e+37  ;;  %v2345_v55 = vadd.f32 %v8470_v24, %v2344_v10  ;;  %vm8633_vm6 = vmor %vm2346_vm5, %vm2347_vm4  ;;  %v4652_v38 = vld [vmem:[%s9503_s3 + $0xa0] sm:$0xff] }
 0x37d   : > { %2934 = vmatpush.msra.mxu0 %v4628_v57  ;;  %2957 = vmatpush.msra.mxu1 %v4629_v25  ;;  %4095 = vtanh.f32 %v8579_v26  ;;  %v2309_v9 = vsel %vm2306_vm3, %v2308_v27, %v2304_v53  ;;  %v2352_v21 = vand.u32 2147483648, %v8390_v20  ;;  %v2350_v34 = vand.u32 2147483647, %v8390_v20  ;;  %v4653_v46 = vld [vmem:[%s9503_s3 + $0xa8] sm:$0xff]  ;;  %v4654_v60 = vld [vmem:[%s9503_s3 + $0xb0] sm:$0xff]  ;;  %v4659_v57 = vld [vmem:[%s9503_s3 + $0x98] sm:$0xff] }
 0x37e   : > { %2979 = vmatpush.msra.mxu2 %v4626_v59  ;;  %3003 = vmatpush.msra.mxu3 %v4631_v48  ;;  %v2349_v20 = vsel %vm8633_vm6, %v8470_v24, %v2345_v55  ;;  %v4655_v24 = vld [vmem:[%s9503_s3 + $0xb8] sm:$0xff]  ;;  %v4656_v59 = vld [vmem:[%s9503_s3 + $0x80] sm:$0xff]  ;;  %v4657_v11 = vld [vmem:[%s9503_s3 + $0x88] sm:$0xff] }
 0x37f   : > { %2935 = vmatpush.msra.mxu0 %v4632_v42  ;;  %2958 = vmatpush.msra.mxu1 %v4633_v35  ;;  %v2353_v61 = vor.u32 1.1754944e-38, %v2352_v21  ;;  %vm2351_vm7 = vcmp.eq.f32.partialorder %v2350_v34, 8.507059e+37  ;;  %v4658_v18 = vld [vmem:[%s9503_s3 + $0x90] sm:$0xff]  ;;  %v4661_v48 = vld [vmem:[%s9503_s3 + $0x68] sm:$0xff]  ;;  %v4663_v47 = vld [vmem:[%s9503_s3 + $0x78] sm:$0xff] }
 0x380   : > { %2980 = vmatpush.msra.mxu2 %v4630_v50  ;;  %3004 = vmatpush.msra.mxu3 %v4635_v58  ;;  %v4660_v50 = vld [vmem:[%s9503_s3 + $0x60] sm:$0xff]  ;;  %v4666_v42 = vld [vmem:[%s9503_s3 + $0x50] sm:$0xff]  ;;  %v4667_v35 = vld [vmem:[%s9503_s3 + $0x58] sm:$0xff] }
 0x381   : > { %v4092_v63 = vpop.eup %4091  ;;  %2936 = vmatpush.msra.mxu0 %v4636_v39  ;;  %2959 = vmatpush.msra.mxu1 %v4637_v16  ;;  %v2354_v52 = vsel %vm2351_vm7, %v2353_v61, %v2349_v20  ;;  %v4664_v0 = vld [vmem:[%s9503_s3 + $0x40] sm:$0xff]  ;;  %v4670_v58 = vld [vmem:[%s9503_s3 + $0x30] sm:$0xff]  ;;  %v4671_v5 = vld [vmem:[%s9503_s3 + $0x38] sm:$0xff] }
 0x382   : > { %v8558_v30 = vmul.f32 %v4092_v63, %v2589_v23  ;;  %2981 = vmatpush.msra.mxu2 %v4634_v36  ;;  %3005 = vmatpush.msra.mxu3 %v4639_v32  ;;  %v4094_v1 = vpop.eup %4093  ;;  %v4662_v63 = vld [vmem:[%s9503_s3 + $0x70] sm:$0xff]  ;;  %v4665_v23 = vld [vmem:[%s9503_s3 + $0x48] sm:$0xff]  ;;  %v4668_v6 = vld [vmem:[%s9503_s3 + $0x20] sm:$0xff] }
 0x383   : > { %2937 = vmatpush.msra.mxu0 %v4640_v54  ;;  %2960 = vmatpush.msra.mxu1 %v4641_v19  ;;  %v2366_v40 = vmul.f32 %v4094_v1, %v2309_v9  ;;  %v4096_v4 = vpop.eup %4095  ;;  %v4669_v36 = vld [vmem:[%s9503_s3 + $0x28] sm:$0xff]  ;;  %v4672_v39 = vld [vmem:[%s9503_s3] sm:$0xff]  ;;  %v4674_v14 = vld [vmem:[%s9503_s3 + $0x10] sm:$0xff] }
 0x384   : > { %2622 = vmatmul.f32.gmra.mxu0 %v8558_v30  ;;  %2645 = vmatmul.f32.gmra.mxu1 %v8558_v30  ;;  %v2367_v25 = vmul.f32 %v4096_v4, %v2354_v52  ;;  %v4673_v16 = vld [vmem:[%s9503_s3 + $0x8] sm:$0xff]  ;;  %v4675_v13 = vld [vmem:[%s9503_s3 + $0x18] sm:$0xff]  ;;  %v4676_v62 = vld [vmem:[%s9504_s4 + $0x1e0] sm:$0xff] }
 0x385   : > { %2668 = vmatmul.f32.gmra.mxu2 %v8558_v30  ;;  %2691 = vmatmul.f32.gmra.mxu3 %v8558_v30  ;;  %v4678_v32 = vld [vmem:[%s9504_s4 + $0x1f0] sm:$0xff]  ;;  %v4679_v53 = vld [vmem:[%s9504_s4 + $0x1f8] sm:$0xff]  ;;  %v4681_v10 = vld [vmem:[%s9504_s4 + $0x1c8] sm:$0xff] }
 0x386   : > { %2982 = vmatpush.msra.mxu2 %v4638_v45  ;;  %3006 = vmatpush.msra.mxu3 %v4643_v12  ;;  %v4677_v45 = vld [vmem:[%s9504_s4 + $0x1e8] sm:$0xff]  ;;  %v4682_v1 = vld [vmem:[%s9504_s4 + $0x1d0] sm:$0xff]  ;;  %v4683_v54 = vld [vmem:[%s9504_s4 + $0x1d8] sm:$0xff] }
 0x387   : > { %2938 = vmatpush.msra.mxu0 %v4644_v29  ;;  %2961 = vmatpush.msra.mxu1 %v4645_v41  ;;  %v4684_v19 = vld [vmem:[%s9504_s4 + $0x1a0] sm:$0xff]  ;;  %v4685_v27 = vld [vmem:[%s9504_s4 + $0x1a8] sm:$0xff]  ;;  %v4687_v12 = vld [vmem:[%s9504_s4 + $0x1b8] sm:$0xff] }
 0x388   : > { %2983 = vmatpush.msra.mxu2 %v4642_v3  ;;  %3007 = vmatpush.msra.mxu3 %v4647_v15  ;;  %v4686_v3 = vld [vmem:[%s9504_s4 + $0x1b0] sm:$0xff]  ;;  %v4688_v9 = vld [vmem:[%s9504_s4 + $0x180] sm:$0xff]  ;;  %v4689_v29 = vld [vmem:[%s9504_s4 + $0x188] sm:$0xff] }
 0x389   : > { %2939 = vmatpush.msra.mxu0 %v4648_v44  ;;  %2962 = vmatpush.msra.mxu1 %v4649_v7  ;;  %v4690_v41 = vld [vmem:[%s9504_s4 + $0x190] sm:$0xff]  ;;  %v4695_v55 = vld [vmem:[%s9504_s4 + $0x178] sm:$0xff]  ;;  %v4696_v44 = vld [vmem:[%s9504_s4 + $0x140] sm:$0xff] }
 0x38a   : > { %2984 = vmatpush.msra.mxu2 %v4646_v28  ;;  %3008 = vmatpush.msra.mxu3 %v4651_v56  ;;  %v4693_v28 = vld [vmem:[%s9504_s4 + $0x168] sm:$0xff]  ;;  %v4694_v15 = vld [vmem:[%s9504_s4 + $0x170] sm:$0xff]  ;;  %v4699_v34 = vld [vmem:[%s9504_s4 + $0x158] sm:$0xff] }
 0x38b   : > { %2940 = vmatpush.msra.mxu0 %v4652_v38  ;;  %2963 = vmatpush.msra.mxu1 %v4653_v46  ;;  %v4697_v7 = vld [vmem:[%s9504_s4 + $0x148] sm:$0xff]  ;;  %v4698_v21 = vld [vmem:[%s9504_s4 + $0x150] sm:$0xff]  ;;  %v4700_v2 = vld [vmem:[%s9504_s4 + $0x120] sm:$0xff] }
 0x38c   : > { %2711 = vmatmul.f32.vlgmr.msrb.gmra.mxu0 %v2366_v40  ;;  %2734 = vmatmul.f32.vlgmr.msrb.gmra.mxu1 %v2366_v40  ;;  %v4702_v56 = vld [vmem:[%s9504_s4 + $0x130] sm:$0xff]  ;;  %v4703_v20 = vld [vmem:[%s9504_s4 + $0x138] sm:$0xff]  ;;  %v4704_v4 = vld [vmem:[%s9504_s4 + $0x100] sm:$0xff] }
 0x38d   : > { %2757 = vmatmul.f32.vlgmr.msrb.gmra.mxu2 %v2366_v40  ;;  %2780 = vmatmul.f32.vlgmr.msrb.gmra.mxu3 %v2366_v40  ;;  %v4691_v40 = vld [vmem:[%s9504_s4 + $0x198] sm:$0xff]  ;;  %v4705_v38 = vld [vmem:[%s9504_s4 + $0x108] sm:$0xff]  ;;  %v4706_v46 = vld [vmem:[%s9504_s4 + $0x110] sm:$0xff] }
 0x38e   : > { %2985 = vmatpush.msra.mxu2 %v4650_v49  ;;  %3009 = vmatpush.msra.mxu3 %v4655_v24  ;;  %v4701_v49 = vld [vmem:[%s9504_s4 + $0x128] sm:$0xff]  ;;  %v4707_v61 = vld [vmem:[%s9504_s4 + $0x118] sm:$0xff]  ;;  %v4712_v52 = vld [vmem:[%s9504_s4 + $0xc0] sm:$0xff] }
 0x38f   : > { %2941 = vmatpush.msra.mxu0 %v4656_v59  ;;  %2964 = vmatpush.msra.mxu1 %v4657_v11  ;;  %v4709_v24 = vld [vmem:[%s9504_s4 + $0xe8] sm:$0xff]  ;;  %v4710_v59 = vld [vmem:[%s9504_s4 + $0xf0] sm:$0xff]  ;;  %v4711_v11 = vld [vmem:[%s9504_s4 + $0xf8] sm:$0xff] }
 0x390   : > { %2986 = vmatpush.msra.mxu2 %v4654_v60  ;;  %3010 = vmatpush.msra.mxu3 %v4659_v57  ;;  %v4708_v60 = vld [vmem:[%s9504_s4 + $0xe0] sm:$0xff]  ;;  %v4714_v57 = vld [vmem:[%s9504_s4 + $0xd0] sm:$0xff] }
 0x391   : > { %2942 = vmatpush.msra.mxu0 %v4660_v50  ;;  %2965 = vmatpush.msra.mxu1 %v4661_v48  ;;  %v4716_v50 = vld [vmem:[%s9504_s4 + $0xa0] sm:$0xff]  ;;  %v4717_v48 = vld [vmem:[%s9504_s4 + $0xa8] sm:$0xff] }
 0x392   : > { %2987 = vmatpush.msra.mxu2 %v4658_v18  ;;  %3011 = vmatpush.msra.mxu3 %v4663_v47  ;;  %v4713_v18 = vld [vmem:[%s9504_s4 + $0xc8] sm:$0xff]  ;;  %v4719_v47 = vld [vmem:[%s9504_s4 + $0xb8] sm:$0xff] }
 0x393   : > { %2943 = vmatpush.msra.mxu0 %v4664_v0  ;;  %2966 = vmatpush.msra.mxu1 %v4665_v23  ;;  %v4720_v0 = vld [vmem:[%s9504_s4 + $0x80] sm:$0xff]  ;;  %v4721_v23 = vld [vmem:[%s9504_s4 + $0x88] sm:$0xff] }
 0x394   : > { %2714 = vmatmul.f32.gmra.mxu0 %v2367_v25  ;;  %2737 = vmatmul.f32.gmra.mxu1 %v2367_v25 }
 0x395   : > { %2760 = vmatmul.f32.gmra.mxu2 %v2367_v25  ;;  %2783 = vmatmul.f32.gmra.mxu3 %v2367_v25  ;;  %v4715_v25 = vld [vmem:[%s9504_s4 + $0xd8] sm:$0xff] }
 0x396   : > { %2988 = vmatpush.msra.mxu2 %v4662_v63  ;;  %3012 = vmatpush.msra.mxu3 %v4667_v35  ;;  %v4718_v63 = vld [vmem:[%s9504_s4 + $0xb0] sm:$0xff]  ;;  %v4723_v35 = vld [vmem:[%s9504_s4 + $0x98] sm:$0xff] }
 0x397   : > { %2944 = vmatpush.msra.mxu0 %v4668_v6  ;;  %2967 = vmatpush.msra.mxu1 %v4669_v36  ;;  %v4724_v6 = vld [vmem:[%s9504_s4 + $0x60] sm:$0xff]  ;;  %v4725_v36 = vld [vmem:[%s9504_s4 + $0x68] sm:$0xff] }
 0x398   : > { %2989 = vmatpush.msra.mxu2 %v4666_v42  ;;  %3013 = vmatpush.msra.mxu3 %v4671_v5  ;;  %v4722_v42 = vld [vmem:[%s9504_s4 + $0x90] sm:$0xff]  ;;  %v4727_v5 = vld [vmem:[%s9504_s4 + $0x78] sm:$0xff] }
 0x399   : > { %2945 = vmatpush.msra.mxu0 %v4672_v39  ;;  %2968 = vmatpush.msra.mxu1 %v4673_v16  ;;  %v4728_v39 = vld [vmem:[%s9504_s4 + $0x40] sm:$0xff]  ;;  %v4729_v16 = vld [vmem:[%s9504_s4 + $0x48] sm:$0xff] }
 0x39a   : > { %2990 = vmatpush.msra.mxu2 %v4670_v58  ;;  %3014 = vmatpush.msra.mxu3 %v4675_v13  ;;  %v4726_v58 = vld [vmem:[%s9504_s4 + $0x70] sm:$0xff]  ;;  %v4731_v13 = vld [vmem:[%s9504_s4 + $0x58] sm:$0xff] }
 0x39b   : > { %3156 = vmatpush.msrb.mxu0 %v4676_v62  ;;  %3179 = vmatpush.msrb.mxu1 %v4677_v45  ;;  %v4732_v62 = vld [vmem:[%s9504_s4 + $0x20] sm:$0xff]  ;;  %v4733_v45 = vld [vmem:[%s9504_s4 + $0x28] sm:$0xff] }
 0x39c   : > { %2991 = vmatpush.msra.mxu2 %v4674_v14  ;;  %2946 = vmatmul.f32.vlgmr.msra.gmra.mxu0 %v8416_v37  ;;  %v4730_v14 = vld [vmem:[%s9504_s4 + $0x50] sm:$0xff] }
 0x39d   : > { %2969 = vmatmul.f32.vlgmr.msra.gmra.mxu1 %v8416_v37  ;;  %2992 = vmatmul.f32.vlgmr.msra.gmra.mxu2 %v8416_v37 }
 0x39e   : > { %3015 = vmatmul.f32.vlgmr.msra.gmra.mxu3 %v8416_v37  ;;  %3202 = vmatpush.msrb.mxu2 %v4678_v32  ;;  %v4680_v37 = vld [vmem:[%s9504_s4 + $0x1c0] sm:$0xff]  ;;  %v4734_v32 = vld [vmem:[%s9504_s4 + $0x30] sm:$0xff] }
 0x39f   : > { %3225 = vmatpush.msrb.mxu3 %v4679_v53  ;;  %3157 = vmatpush.msrb.mxu0 %v4680_v37  ;;  %v4735_v53 = vld [vmem:[%s9504_s4 + $0x38] sm:$0xff]  ;;  %v4736_v37 = vld [vmem:[%s9504_s4] sm:$0xff] }
 0x3a0   : > { %3180 = vmatpush.msrb.mxu1 %v4681_v10  ;;  %3203 = vmatpush.msrb.mxu2 %v4682_v1  ;;  %v4737_v10 = vld [vmem:[%s9504_s4 + $0x8] sm:$0xff]  ;;  %v4738_v1 = vld [vmem:[%s9504_s4 + $0x10] sm:$0xff] }
 0x3a1   : > { %3226 = vmatpush.msrb.mxu3 %v4683_v54  ;;  %3158 = vmatpush.msrb.mxu0 %v4684_v19  ;;  %v4739_v54 = vld [vmem:[%s9504_s4 + $0x18] sm:$0xff]  ;;  %v4740_v19 = vld [vmem:[%s9505_s5 + $0x1e0] sm:$0xff] }
 0x3a2   : > { %3181 = vmatpush.msrb.mxu1 %v4685_v27  ;;  %3204 = vmatpush.msrb.mxu2 %v4686_v3  ;;  %v4741_v27 = vld [vmem:[%s9505_s5 + $0x1e8] sm:$0xff]  ;;  %v4742_v3 = vld [vmem:[%s9505_s5 + $0x1f0] sm:$0xff] }
 0x3a3   : > { %3227 = vmatpush.msrb.mxu3 %v4687_v12  ;;  %3159 = vmatpush.msrb.mxu0 %v4688_v9  ;;  %v4743_v12 = vld [vmem:[%s9505_s5 + $0x1f8] sm:$0xff]  ;;  %v4744_v9 = vld [vmem:[%s9505_s5 + $0x1c0] sm:$0xff] }
 0x3a4   : > { %2949 = vmatmul.f32.gmra.mxu0 %v8558_v30  ;;  %3182 = vmatpush.msrb.mxu1 %v4689_v29  ;;  %v4745_v29 = vld [vmem:[%s9505_s5 + $0x1c8] sm:$0xff] }
 0x3a5   : > { %2972 = vmatmul.f32.gmra.mxu1 %v8558_v30  ;;  %2995 = vmatmul.f32.gmra.mxu2 %v8558_v30 }
 0x3a6   : > { %3018 = vmatmul.f32.gmra.mxu3 %v8558_v30  ;;  %3205 = vmatpush.msrb.mxu2 %v4690_v41  ;;  %v4692_v30 = vld [vmem:[%s9504_s4 + $0x160] sm:$0xff]  ;;  %v4746_v41 = vld [vmem:[%s9505_s5 + $0x1d0] sm:$0xff] }
 0x3a7   : > { %3228 = vmatpush.msrb.mxu3 %v4691_v40  ;;  %3160 = vmatpush.msrb.mxu0 %v4692_v30  ;;  %v4747_v40 = vld [vmem:[%s9505_s5 + $0x1d8] sm:$0xff]  ;;  %v4748_v30 = vld [vmem:[%s9505_s5 + $0x1a0] sm:$0xff] }
 0x3a8   : > { %3183 = vmatpush.msrb.mxu1 %v4693_v28  ;;  %3206 = vmatpush.msrb.mxu2 %v4694_v15  ;;  %v4749_v28 = vld [vmem:[%s9505_s5 + $0x1a8] sm:$0xff]  ;;  %v4750_v15 = vld [vmem:[%s9505_s5 + $0x1b0] sm:$0xff] }
 0x3a9   : > { %3229 = vmatpush.msrb.mxu3 %v4695_v55  ;;  %3161 = vmatpush.msrb.mxu0 %v4696_v44  ;;  %v4751_v55 = vld [vmem:[%s9505_s5 + $0x1b8] sm:$0xff]  ;;  %v4752_v44 = vld [vmem:[%s9505_s5 + $0x180] sm:$0xff] }
 0x3aa   : > { %3184 = vmatpush.msrb.mxu1 %v4697_v7  ;;  %3207 = vmatpush.msrb.mxu2 %v4698_v21  ;;  %v4753_v7 = vld [vmem:[%s9505_s5 + $0x188] sm:$0xff]  ;;  %v4754_v21 = vld [vmem:[%s9505_s5 + $0x190] sm:$0xff] }
 0x3ab   : > { %3230 = vmatpush.msrb.mxu3 %v4699_v34  ;;  %3162 = vmatpush.msrb.mxu0 %v4700_v2  ;;  %v4755_v34 = vld [vmem:[%s9505_s5 + $0x198] sm:$0xff]  ;;  %v4756_v2 = vld [vmem:[%s9505_s5 + $0x160] sm:$0xff] }
 0x3ac   : > { %3185 = vmatpush.msrb.mxu1 %v4701_v49  ;;  %3208 = vmatpush.msrb.mxu2 %v4702_v56  ;;  %v4757_v49 = vld [vmem:[%s9505_s5 + $0x168] sm:$0xff]  ;;  %v4758_v56 = vld [vmem:[%s9505_s5 + $0x170] sm:$0xff] }
 0x3ad   : > { %3231 = vmatpush.msrb.mxu3 %v4703_v20  ;;  %3163 = vmatpush.msrb.mxu0 %v4704_v4  ;;  %v4759_v20 = vld [vmem:[%s9505_s5 + $0x178] sm:$0xff]  ;;  %v4760_v4 = vld [vmem:[%s9505_s5 + $0x140] sm:$0xff] }
 0x3ae   : > { %3186 = vmatpush.msrb.mxu1 %v4705_v38  ;;  %3209 = vmatpush.msrb.mxu2 %v4706_v46  ;;  %v4761_v38 = vld [vmem:[%s9505_s5 + $0x148] sm:$0xff]  ;;  %v4762_v46 = vld [vmem:[%s9505_s5 + $0x150] sm:$0xff] }
 0x3af   : > { %3232 = vmatpush.msrb.mxu3 %v4707_v61  ;;  %3164 = vmatpush.msrb.mxu0 %v4708_v60  ;;  %v4763_v61 = vld [vmem:[%s9505_s5 + $0x158] sm:$0xff]  ;;  %v4764_v60 = vld [vmem:[%s9505_s5 + $0x120] sm:$0xff] }
 0x3b0   : > { %3187 = vmatpush.msrb.mxu1 %v4709_v24  ;;  %3210 = vmatpush.msrb.mxu2 %v4710_v59  ;;  %v4765_v24 = vld [vmem:[%s9505_s5 + $0x128] sm:$0xff]  ;;  %v4766_v59 = vld [vmem:[%s9505_s5 + $0x130] sm:$0xff] }
 0x3b1   : > { %3233 = vmatpush.msrb.mxu3 %v4711_v11  ;;  %3165 = vmatpush.msrb.mxu0 %v4712_v52  ;;  %v4767_v11 = vld [vmem:[%s9505_s5 + $0x138] sm:$0xff]  ;;  %v4768_v52 = vld [vmem:[%s9505_s5 + $0x100] sm:$0xff] }
 0x3b2   : > { %3188 = vmatpush.msrb.mxu1 %v4713_v18  ;;  %3211 = vmatpush.msrb.mxu2 %v4714_v57  ;;  %v4769_v18 = vld [vmem:[%s9505_s5 + $0x108] sm:$0xff]  ;;  %v4770_v57 = vld [vmem:[%s9505_s5 + $0x110] sm:$0xff] }
 0x3b3   : > { %3234 = vmatpush.msrb.mxu3 %v4715_v25  ;;  %3166 = vmatpush.msrb.mxu0 %v4716_v50  ;;  %v4771_v25 = vld [vmem:[%s9505_s5 + $0x118] sm:$0xff]  ;;  %v4772_v50 = vld [vmem:[%s9505_s5 + $0xe0] sm:$0xff] }
 0x3b4   : > { %3189 = vmatpush.msrb.mxu1 %v4717_v48  ;;  %3212 = vmatpush.msrb.mxu2 %v4718_v63  ;;  %v4773_v48 = vld [vmem:[%s9505_s5 + $0xe8] sm:$0xff]  ;;  %v4774_v63 = vld [vmem:[%s9505_s5 + $0xf0] sm:$0xff] }
 0x3b5   : > { %3235 = vmatpush.msrb.mxu3 %v4719_v47  ;;  %3167 = vmatpush.msrb.mxu0 %v4720_v0  ;;  %v4775_v47 = vld [vmem:[%s9505_s5 + $0xf8] sm:$0xff]  ;;  %v4776_v0 = vld [vmem:[%s9505_s5 + $0xc0] sm:$0xff] }
 0x3b6   : > { %3190 = vmatpush.msrb.mxu1 %v4721_v23  ;;  %3213 = vmatpush.msrb.mxu2 %v4722_v42  ;;  %v4777_v23 = vld [vmem:[%s9505_s5 + $0xc8] sm:$0xff]  ;;  %v4778_v42 = vld [vmem:[%s9505_s5 + $0xd0] sm:$0xff] }
 0x3b7   : > { %3236 = vmatpush.msrb.mxu3 %v4723_v35  ;;  %3168 = vmatpush.msrb.mxu0 %v4724_v6  ;;  %v4779_v35 = vld [vmem:[%s9505_s5 + $0xd8] sm:$0xff]  ;;  %v4780_v6 = vld [vmem:[%s9505_s5 + $0xa0] sm:$0xff] }
 0x3b8   : > { %3191 = vmatpush.msrb.mxu1 %v4725_v36  ;;  %3214 = vmatpush.msrb.mxu2 %v4726_v58  ;;  %v4781_v36 = vld [vmem:[%s9505_s5 + $0xa8] sm:$0xff]  ;;  %v4782_v58 = vld [vmem:[%s9505_s5 + $0xb0] sm:$0xff] }
 0x3b9   : > { %3237 = vmatpush.msrb.mxu3 %v4727_v5  ;;  %3169 = vmatpush.msrb.mxu0 %v4728_v39  ;;  %v4783_v5 = vld [vmem:[%s9505_s5 + $0xb8] sm:$0xff]  ;;  %v4784_v39 = vld [vmem:[%s9505_s5 + $0x80] sm:$0xff] }
 0x3ba   : > { %3192 = vmatpush.msrb.mxu1 %v4729_v16  ;;  %3215 = vmatpush.msrb.mxu2 %v4730_v14  ;;  %v4785_v16 = vld [vmem:[%s9505_s5 + $0x88] sm:$0xff]  ;;  %v4786_v14 = vld [vmem:[%s9505_s5 + $0x90] sm:$0xff] }
 0x3bb   : > { %3238 = vmatpush.msrb.mxu3 %v4731_v13  ;;  %3170 = vmatpush.msrb.mxu0 %v4732_v62  ;;  %v4787_v13 = vld [vmem:[%s9505_s5 + $0x98] sm:$0xff]  ;;  %v4788_v62 = vld [vmem:[%s9505_s5 + $0x60] sm:$0xff] }
 0x3bc   : > { %3193 = vmatpush.msrb.mxu1 %v4733_v45  ;;  %3216 = vmatpush.msrb.mxu2 %v4734_v32  ;;  %v4789_v45 = vld [vmem:[%s9505_s5 + $0x68] sm:$0xff]  ;;  %v4790_v32 = vld [vmem:[%s9505_s5 + $0x70] sm:$0xff] }
 0x3bd   : > { %3239 = vmatpush.msrb.mxu3 %v4735_v53  ;;  %3171 = vmatpush.msrb.mxu0 %v4736_v37  ;;  %v4791_v53 = vld [vmem:[%s9505_s5 + $0x78] sm:$0xff]  ;;  %v4792_v37 = vld [vmem:[%s9505_s5 + $0x40] sm:$0xff] }
 0x3be   : > { %3194 = vmatpush.msrb.mxu1 %v4737_v10  ;;  %3217 = vmatpush.msrb.mxu2 %v4738_v1  ;;  %v4793_v10 = vld [vmem:[%s9505_s5 + $0x48] sm:$0xff]  ;;  %v4794_v1 = vld [vmem:[%s9505_s5 + $0x50] sm:$0xff] }
 0x3bf   : > { %3240 = vmatpush.msrb.mxu3 %v4739_v54  ;;  %3248 = vmatpush.msra.mxu0 %v4740_v19  ;;  %v4795_v54 = vld [vmem:[%s9505_s5 + $0x58] sm:$0xff]  ;;  %v4796_v19 = vld [vmem:[%s9505_s5 + $0x20] sm:$0xff] }
 0x3c0   : > { %3271 = vmatpush.msra.mxu1 %v4741_v27  ;;  %3294 = vmatpush.msra.mxu2 %v4742_v3  ;;  %v4797_v27 = vld [vmem:[%s9505_s5 + $0x28] sm:$0xff]  ;;  %v4798_v3 = vld [vmem:[%s9505_s5 + $0x30] sm:$0xff] }
 0x3c1   : > { %3317 = vmatpush.msra.mxu3 %v4743_v12  ;;  %3249 = vmatpush.msra.mxu0 %v4744_v9  ;;  %v4799_v12 = vld [vmem:[%s9505_s5 + $0x38] sm:$0xff]  ;;  %v4800_v9 = vld [vmem:[%s9505_s5] sm:$0xff] }
 0x3c2   : > { %3272 = vmatpush.msra.mxu1 %v4745_v29  ;;  %3295 = vmatpush.msra.mxu2 %v4746_v41  ;;  %v4801_v29 = vld [vmem:[%s9505_s5 + $0x8] sm:$0xff]  ;;  %v4802_v41 = vld [vmem:[%s9505_s5 + $0x10] sm:$0xff] }
 0x3c3   : > { %3318 = vmatpush.msra.mxu3 %v4747_v40  ;;  %3250 = vmatpush.msra.mxu0 %v4748_v30  ;;  %v4803_v40 = vld [vmem:[%s9505_s5 + $0x18] sm:$0xff] }
 0x3c4   : > { %3273 = vmatpush.msra.mxu1 %v4749_v28  ;;  %3296 = vmatpush.msra.mxu2 %v4750_v15 }
 0x3c5   : > { %3319 = vmatpush.msra.mxu3 %v4751_v55  ;;  %3251 = vmatpush.msra.mxu0 %v4752_v44 }
 0x3c6   : > { %3274 = vmatpush.msra.mxu1 %v4753_v7  ;;  %3297 = vmatpush.msra.mxu2 %v4754_v21 }
 0x3c7   : > { %3320 = vmatpush.msra.mxu3 %v4755_v34  ;;  %3252 = vmatpush.msra.mxu0 %v4756_v2 }
 0x3c8   : > { %3275 = vmatpush.msra.mxu1 %v4757_v49  ;;  %3298 = vmatpush.msra.mxu2 %v4758_v56 }
 0x3c9   : > { %3321 = vmatpush.msra.mxu3 %v4759_v20  ;;  %3253 = vmatpush.msra.mxu0 %v4760_v4 }
 0x3ca   : > { %3276 = vmatpush.msra.mxu1 %v4761_v38  ;;  %3299 = vmatpush.msra.mxu2 %v4762_v46 }
 0x3cb   : > { %3322 = vmatpush.msra.mxu3 %v4763_v61  ;;  %3254 = vmatpush.msra.mxu0 %v4764_v60 }
 0x3cc   : > { %3277 = vmatpush.msra.mxu1 %v4765_v24  ;;  %3300 = vmatpush.msra.mxu2 %v4766_v59 }
 0x3cd   : > { %3323 = vmatpush.msra.mxu3 %v4767_v11  ;;  %3255 = vmatpush.msra.mxu0 %v4768_v52 }
 0x3ce   : > { %3278 = vmatpush.msra.mxu1 %v4769_v18  ;;  %3301 = vmatpush.msra.mxu2 %v4770_v57 }
 0x3cf   : > { %3324 = vmatpush.msra.mxu3 %v4771_v25  ;;  %3256 = vmatpush.msra.mxu0 %v4772_v50  ;;  %v3801_v25 = vld [vmem:[%s4993_s27 + $0x100] sm:$0xff] }
 0x3d0   : > { %3279 = vmatpush.msra.mxu1 %v4773_v48  ;;  %3302 = vmatpush.msra.mxu2 %v4774_v63  ;;  %v3802_v63 = vld [vmem:[%s4993_s27 + $0x108] sm:$0xff] }
 0x3d1   : > { %3325 = vmatpush.msra.mxu3 %v4775_v47  ;;  %3257 = vmatpush.msra.mxu0 %v4776_v0 }
 0x3d2   : > { %3280 = vmatpush.msra.mxu1 %v4777_v23  ;;  %3303 = vmatpush.msra.mxu2 %v4778_v42 }
 0x3d3   : > { %3326 = vmatpush.msra.mxu3 %v4779_v35  ;;  %3258 = vmatpush.msra.mxu0 %v4780_v6 }
 0x3d4   : > { %3281 = vmatpush.msra.mxu1 %v4781_v36  ;;  %3304 = vmatpush.msra.mxu2 %v4782_v58 }
 0x3d5   : > { %3327 = vmatpush.msra.mxu3 %v4783_v5  ;;  %3259 = vmatpush.msra.mxu0 %v4784_v39 }
 0x3d6   : > { %3282 = vmatpush.msra.mxu1 %v4785_v16  ;;  %3305 = vmatpush.msra.mxu2 %v4786_v14 }
 0x3d7   : > { %3328 = vmatpush.msra.mxu3 %v4787_v13  ;;  %3260 = vmatpush.msra.mxu0 %v4788_v62  ;;  %v3803_v13 = vld [vmem:[%s4993_s27 + $0x110] sm:$0xff] }
 0x3d8   : > { %3283 = vmatpush.msra.mxu1 %v4789_v45  ;;  %3306 = vmatpush.msra.mxu2 %v4790_v32 }
 0x3d9   : > { %3329 = vmatpush.msra.mxu3 %v4791_v53  ;;  %3261 = vmatpush.msra.mxu0 %v4792_v37 }
 0x3da   : > { %3284 = vmatpush.msra.mxu1 %v4793_v10  ;;  %3307 = vmatpush.msra.mxu2 %v4794_v1 }
 0x3db   : > { %3330 = vmatpush.msra.mxu3 %v4795_v54  ;;  %3262 = vmatpush.msra.mxu0 %v4796_v19 }
 0x3dc   : > { %3285 = vmatpush.msra.mxu1 %v4797_v27  ;;  %3308 = vmatpush.msra.mxu2 %v4798_v3 }
 0x3dd   : > { %3331 = vmatpush.msra.mxu3 %v4799_v12  ;;  %3263 = vmatpush.msra.mxu0 %v4800_v9  ;;  %v3805_v12 = vld [vmem:[%s4993_s27 + $0x120] sm:$0xff] }
 0x3de   : > { %3286 = vmatpush.msra.mxu1 %v4801_v29  ;;  %3309 = vmatpush.msra.mxu2 %v4802_v41 }
 0x3df   : > { %3332 = vmatpush.msra.mxu3 %v4803_v40 }
 0x3f0   : > { %v2620_v30 = vpop.f32.mrf.mxu0  ;;  %v2643_v28 = vpop.f32.mrf.mxu1 }
 0x3f7   : > { %v2666_v15 = vpop.f32.mrf.mxu2  ;;  %v2689_v2 = vpop.f32.mrf.mxu3 }
 0x401   : > { %v2623_v55 = vpop.f32.mrf.mxu0  ;;  %v2646_v44 = vpop.f32.mrf.mxu1 }
 0x408   : > { %v2669_v7 = vpop.f32.mrf.mxu2  ;;  %v9112_v59 = vpop.f32.mrf.mxu3 }
 0x409   : > { %v2712_v21 = vpop.f32.mrf.mxu0  ;;  %v2735_v34 = vpop.f32.mrf.mxu1 }
 0x40a   : > { %v2713_v49 = vadd.f32 %v2712_v21, %v2620_v30  ;;  %v2736_v56 = vadd.f32 %v2735_v34, %v2643_v28 }
 0x40c   : > { %v2787_v20 = vadd.f32 %v2713_v49, %v6509_v51  ;;  %v2788_v4 = vadd.f32 %v2736_v56, %v6511_v17 }
 0x40e   : > { %v3795_v46 = vmul.f32 -1.442695, %v2787_v20  ;;  %v3796_v60 = vmul.f32 -1.442695, %v2788_v4 }
 0x410   : > { %v2758_v38 = vpop.f32.mrf.mxu2  ;;  %4097 = vpow2.f32 %v3795_v46  ;;  %v2781_v35 = vpop.f32.mrf.mxu3 }
 0x411   : > { %v2715_v61 = vpop.f32.mrf.mxu0  ;;  %v2738_v24 = vpop.f32.mrf.mxu1  ;;  %4099 = vpow2.f32 %v3796_v60  ;;  %v2759_v39 = vadd.f32 %v2758_v38, %v2666_v15  ;;  %v2782_v3 = vadd.f32 %v2781_v35, %v2689_v2  ;;  %v3806_v2 = vld [vmem:[%s4993_s27 + $0x128] sm:$0xff] }
 0x412   : > { %v2716_v11 = vadd.f32 %v2715_v61, %v2623_v55  ;;  %v2739_v23 = vadd.f32 %v2738_v24, %v2646_v44 }
 0x413   : > { %v2789_v32 = vadd.f32 %v2759_v39, %v9860_v22  ;;  %v2790_v21 = vadd.f32 %v2782_v3, %v9861_v31 }
 0x414   : > { %v2791_v52 = vadd.f32 %v2716_v11, %v6509_v51  ;;  %v2792_v5 = vadd.f32 %v2739_v23, %v6511_v17 }
 0x415   : > { %v3797_v27 = vmul.f32 -1.442695, %v2789_v32 }
 0x416   : > { %v4098_v57 = vpop.eup %4097  ;;  %v3798_v0 = vmul.f32 -1.442695, %v2791_v52  ;;  %v3799_v45 = vmul.f32 -1.442695, %v2792_v5  ;;  %v3804_v52 = vld [vmem:[%s4993_s27 + $0x118] sm:$0xff] }
 0x417   : > { %v4100_v48 = vpop.eup %4099  ;;  %v9117_v42 = vadd.f32 1.0, %v4098_v57  ;;  %v3807_v57 = vld [vmem:[%s4993_s27 + $0x130] sm:$0xff] }
 0x418   : > { %v2761_v18 = vpop.f32.mrf.mxu2  ;;  %v9119_v36 = vadd.f32 1.0, %v4100_v48  ;;  %4101 = vpow2.f32 %v3798_v0  ;;  %v2784_v1 = vpop.f32.mrf.mxu3 }
 0x419   : > { %v2947_v50 = vpop.f32.mrf.mxu0  ;;  %4103 = vrcp.f32 %v9117_v42  ;;  %v2762_v28 = vadd.f32 %v2761_v18, %v2669_v7  ;;  %v2830_v24 = vand.u32 2147483648, %v9117_v42  ;;  %vm2824_vm10 = vweird.f32 %v9117_v42 }
 0x41a   : > { %v2970_v47 = vpop.f32.mrf.mxu1  ;;  %v3022_v6 = vadd.f32 %v3801_v25, %v2947_v50  ;;  %4105 = vrcp.f32 %v9119_v36  ;;  %v2845_v48 = vand.u32 2147483648, %v9119_v36  ;;  %vm2839_vm11 = vweird.f32 %v9119_v36 }
 0x41b   : > { %v3023_v58 = vadd.f32 %v3802_v63, %v2970_v47  ;;  %v2793_v7 = vadd.f32 %v2762_v28, %v9860_v22  ;;  %v2828_v47 = vand.u32 2147483647, %v9117_v42  ;;  %v9161_v39 = vor.u32 1.1754944e-38, %v2830_v24 }
 0x41c   : > { %v3809_v16 = vmul.f32 -1.442695, %v3022_v6 }
 0x41d   : > { %v3810_v14 = vmul.f32 -1.442695, %v3023_v58  ;;  %v3800_v0 = vmul.f32 -1.442695, %v2793_v7  ;;  %vm9251_vm6 = vcmp.eq.f32.partialorder %v2828_v47, 8.507059e+37 }
 0x41e   : > { %4107 = vpow2.f32 %v3809_v16  ;;  %v4102_v37 = vpop.eup %4101  ;;  %v2843_v16 = vand.u32 2147483647, %v9119_v36 }
 0x41f   : > { %4109 = vpow2.f32 %v3810_v14  ;;  %v9126_v10 = vpop.eup %4103  ;;  %v9131_v29 = vadd.f32 1.0, %v4102_v37 }
 0x420   : > { %v2993_v62 = vpop.f32.mrf.mxu2  ;;  %v9128_v19 = vpop.eup %4105  ;;  %4111 = vpow2.f32 %v3799_v45  ;;  %v2820_v40 = vmul.f32 %v9126_v10, %v9117_v42  ;;  %v9168_v45 = vadd.f32 %v2784_v1, %v9112_v59  ;;  %vm2825_vm8 = vweird.f32 %v9126_v10 }
 0x421   : > { %v3024_v53 = vadd.f32 %v3803_v13, %v2993_v62  ;;  %v2950_v9 = vpop.f32.mrf.mxu0  ;;  %v2835_v30 = vmul.f32 %v9128_v19, %v9119_v36  ;;  %v3016_v18 = vpop.f32.mrf.mxu3  ;;  %vm2840_vm9 = vweird.f32 %v9128_v19  ;;  %vm9224_vm4 = vmor %vm2824_vm10, %vm2825_vm8  ;;  %vm9270_vm8 = vcmp.eq.f32.partialorder %v2843_v16, 8.507059e+37 }
 0x422   : > { %v3026_v44 = vadd.f32 %v3805_v12, %v2950_v9  ;;  %v2973_v49 = vpop.f32.mrf.mxu1  ;;  %v2821_v4 = vsub.f32 1.0, %v2820_v40  ;;  %v3025_v6 = vadd.f32 %v3804_v52, %v3016_v18  ;;  %vm9238_vm5 = vmor %vm2839_vm11, %vm2840_vm9 }
 0x423   : > { %v3811_v54 = vmul.f32 -1.442695, %v3024_v53  ;;  %v2836_v38 = vsub.f32 1.0, %v2835_v30  ;;  %v3027_v60 = vadd.f32 %v3806_v2, %v2973_v49 }
 0x424   : > { %v4108_v41 = vpop.eup %4107  ;;  %v3812_v61 = vmul.f32 -1.442695, %v3026_v44  ;;  %v2822_v63 = vmul.f32 %v9126_v10, %v2821_v4 }
 0x425   : > { %4113 = vpow2.f32 %v3811_v54  ;;  %v4110_v15 = vpop.eup %4109  ;;  %v9137_v55 = vadd.f32 1.0, %v4108_v41  ;;  %v2837_v35 = vmul.f32 %v9128_v19, %v2836_v38  ;;  %v3813_v58 = vmul.f32 -1.442695, %v3027_v60 }
 0x426   : > { %4115 = vpow2.f32 %v3797_v27  ;;  %v9140_v34 = vadd.f32 1.0, %v4110_v15  ;;  %v4112_v56 = vpop.eup %4111  ;;  %v9174_v37 = vadd.f32 %v9126_v10, %v2822_v63 }
 0x427   : > { %4117 = vrcp.f32 %v9131_v29  ;;  %v9150_v11 = vadd.f32 1.0, %v4112_v56  ;;  %v9182_v59 = vadd.f32 %v9128_v19, %v2837_v35  ;;  %v3065_v40 = vand.u32 2147483648, %v9137_v55 }
 0x428   : > { %4119 = vrcp.f32 %v9137_v55  ;;  %v2996_v25 = vpop.f32.mrf.mxu2  ;;  %v3080_v28 = vand.u32 2147483648, %v9140_v34  ;;  %v3063_v44 = vand.u32 2147483647, %v9137_v55  ;;  %v3078_v49 = vand.u32 2147483647, %v9140_v34 }
 0x429   : > { %4121 = vrcp.f32 %v9140_v34  ;;  %v3028_v14 = vadd.f32 %v3807_v57, %v2996_v25  ;;  %vm3074_vm14 = vweird.f32 %v9140_v34  ;;  %vm3059_vm15 = vweird.f32 %v9137_v55 }
 0x42a   : > { %4123 = vtanh.f32 %v2790_v21  ;;  %vm3064_vm2 = vcmp.eq.f32.partialorder %v3063_v44, 8.507059e+37  ;;  %vm3079_vm3 = vcmp.eq.f32.partialorder %v3078_v49, 8.507059e+37 }
 0x42b   : > { %v4114_v20 = vpop.eup %4113  ;;  %v3814_v27 = vmul.f32 -1.442695, %v3028_v14  ;;  %v3019_v14 = vpop.f32.mrf.mxu3 }
 0x42c   : > { %v9147_v46 = vadd.f32 1.0, %v4114_v20  ;;  %v4116_v50 = vpop.eup %4115 }
 0x42d   : > { %v9158_v23 = vpop.eup %4117  ;;  %v9165_v62 = vadd.f32 1.0, %v4116_v50 }
 0x42e   : > { %4125 = vrcp.f32 %v9147_v46  ;;  %v4120_v5 = vpop.eup %4119  ;;  %v9186_v1 = vmul.f32 %v9158_v23, %v9131_v29  ;;  %v3093_v47 = vand.u32 2147483647, %v9147_v46  ;;  %vm3089_vm9 = vweird.f32 %v9147_v46 }
 0x42f   : > { %4127 = vpow2.f32 %v3812_v61  ;;  %v4122_v13 = vpop.eup %4121  ;;  %v3055_v32 = vmul.f32 %v4120_v5, %v9137_v55  ;;  %vm3060_vm12 = vweird.f32 %v4120_v5  ;;  %v3066_v61 = vor.u32 1.1754944e-38, %v3065_v40 }
 0x430   : > { %4129 = vrcp.f32 %v9150_v11  ;;  %v9171_v53 = vpop.eup %4123  ;;  %v3070_v54 = vmul.f32 %v4122_v13, %v9140_v34  ;;  %vm3075_vm13 = vweird.f32 %v4122_v13  ;;  %vm3061_vm0 = vmor %vm3059_vm15, %vm3060_vm12  ;;  %v3081_v34 = vor.u32 1.1754944e-38, %v3080_v28 }
 0x431   : > { %4131 = vpow2.f32 %v3813_v58  ;;  %v3056_v12 = vsub.f32 1.0, %v3055_v32  ;;  %vm3076_vm1 = vmor %vm3074_vm14, %vm3075_vm13  ;;  %v3808_v58 = vld [vmem:[%s4993_s27 + $0x138] sm:$0xff]  ;;  %v9215_v32 = vor.u32 1.1754944e-38, %v2845_v48  ;;  %v2873_v48 = vand.u32 2147483647, %v9131_v29 }
 0x432   : > { %4133 = vpow2.f32 %v3800_v0  ;;  %v3071_v9 = vsub.f32 1.0, %v3070_v54  ;;  %v3029_v40 = vadd.f32 %v3808_v58, %v3019_v14  ;;  %v2842_v28 = vsel %vm9238_vm5, %v9128_v19, %v9182_v59 }
 0x433   : > { %4135 = vtanh.f32 %v3025_v6  ;;  %v3057_v15 = vmul.f32 %v4120_v5, %v3056_v12  ;;  %v9230_v12 = vadd.f32 %v9168_v45, %v9861_v31  ;;  %v3095_v45 = vand.u32 2147483648, %v9147_v46 }
 0x434   : > { %v9178_v3 = vpop.eup %4125  ;;  %4137 = vpow2.f32 %v3814_v27  ;;  %v3072_v2 = vmul.f32 %v4122_v13, %v3071_v9  ;;  %v2827_v9 = vsel %vm9224_vm4, %v9126_v10, %v9174_v37  ;;  %vm2869_vm12 = vweird.f32 %v9131_v29 }
 0x435   : > { %v3085_v41 = vmul.f32 %v9178_v3, %v9147_v46  ;;  %v4128_v30 = vpop.eup %4127  ;;  %v3058_v38 = vadd.f32 %v4120_v5, %v3057_v15  ;;  %vm3090_vm7 = vweird.f32 %v9178_v3  ;;  %v3096_v36 = vor.u32 1.1754944e-38, %v3095_v45 }
 0x436   : > { %v9195_v21 = vpop.eup %4129  ;;  %v9198_v56 = vadd.f32 1.0, %v4128_v30  ;;  %v3073_v60 = vadd.f32 %v4122_v13, %v3072_v2  ;;  %vm9281_vm10 = vmor %vm3089_vm9, %vm3090_vm7  ;;  %vm3094_vm14 = vcmp.eq.f32.partialorder %v3093_v47, 8.507059e+37  ;;  %vm2870_vm5 = vweird.f32 %v9158_v23 }
 0x437   : > { %v4132_v20 = vpop.eup %4131  ;;  %v3086_v4 = vsub.f32 1.0, %v3085_v41  ;;  %v2880_v18 = vmul.f32 %v9195_v21, %v9150_v11  ;;  %v3062_v57 = vsel %vm3061_vm0, %v4120_v5, %v3058_v38  ;;  %v2866_v5 = vsub.f32 1.0, %v9186_v1 }
 0x438   : > { %v4134_v7 = vpop.eup %4133  ;;  %4139 = vrcp.f32 %v9198_v56  ;;  %v9203_v24 = vadd.f32 1.0, %v4132_v20  ;;  %v3067_v55 = vsel %vm3064_vm2, %v3066_v61, %v3062_v57  ;;  %v3077_v50 = vsel %vm3076_vm1, %v4122_v13, %v3073_v60 }
 0x439   : > { %v4136_v52 = vpop.eup %4135  ;;  %v3087_v63 = vmul.f32 %v9178_v3, %v3086_v4  ;;  %v3082_v0 = vsel %vm3079_vm3, %v3081_v34, %v3077_v50  ;;  %v2881_v27 = vsub.f32 1.0, %v2880_v18  ;;  %v9262_v44 = vadd.f32 1.0, %v4134_v7 }
 0x43a   : > { %v4138_v25 = vpop.eup %4137  ;;  %4141 = vrcp.f32 %v9203_v24  ;;  %v3148_v35 = vmul.f32 %v4136_v52, %v3067_v55  ;;  %v3146_v13 = vmul.f32 %v3082_v0, %v8376_v43  ;;  %v2867_v42 = vmul.f32 %v9158_v23, %v2866_v5 }
 0x43b   : > { %v9210_v6 = vadd.f32 1.0, %v4138_v25  ;;  %4143 = vrcp.f32 %v9165_v62  ;;  %v3088_v37 = vadd.f32 %v9178_v3, %v3087_v63  ;;  %v2882_v59 = vmul.f32 %v9195_v21, %v2881_v27 }
 0x43c   : > { %v9247_v41 = vadd.f32 %v3148_v35, %v3146_v13  ;;  %v3108_v16 = vand.u32 2147483647, %v9198_v56  ;;  %v3110_v38 = vand.u32 2147483648, %v9198_v56  ;;  %v3125_v52 = vand.u32 2147483648, %v9203_v24 }
 0x43d   : > { %4145 = vrcp.f32 %v9210_v6  ;;  %v3092_v60 = vsel %vm9281_vm10, %v9178_v3, %v3088_v37  ;;  %vm3104_vm13 = vweird.f32 %v9198_v56  ;;  %v3123_v25 = vand.u32 2147483647, %v9203_v24 }
 0x43e   : > { %v4140_v1 = vpop.eup %4139  ;;  %4147 = vtanh.f32 %v9247_v41  ;;  %3476 = vst [vmem:[#allocation3 + $0x8] sm:$0xff] %v9247_v41  ;;  %vm3119_vm0 = vweird.f32 %v9203_v24  ;;  %v3111_v3 = vor.u32 1.1754944e-38, %v3110_v38  ;;  %v3097_v63 = vsel %vm3094_vm14, %v3096_v36, %v3092_v60 }
 0x43f   : > { %v3100_v10 = vmul.f32 %v4140_v1, %v9198_v56  ;;  %4149 = vtanh.f32 %v3029_v40  ;;  %vm3105_vm11 = vweird.f32 %v4140_v1  ;;  %vm3109_vm2 = vcmp.eq.f32.partialorder %v3108_v16, 8.507059e+37 }
 0x440   : > { %v4142_v15 = vpop.eup %4141  ;;  %vm3106_vm1 = vmor %vm3104_vm13, %vm3105_vm11  ;;  %v2832_v5 = vsel %vm9251_vm6, %v9161_v39, %v2827_v9  ;;  %4151 = vrcp.f32 %v9262_v44  ;;  %vm3124_vm4 = vcmp.eq.f32.partialorder %v3123_v25, 8.507059e+37  ;;  %vm2885_vm6 = vweird.f32 %v9195_v21 }
 0x441   : > { %v3101_v2 = vsub.f32 1.0, %v3100_v10  ;;  %v3115_v49 = vmul.f32 %v4142_v15, %v9203_v24  ;;  %v9277_v20 = vpop.eup %4143  ;;  %vm3120_vm15 = vweird.f32 %v4142_v15  ;;  %v3126_v24 = vor.u32 1.1754944e-38, %v3125_v52 }
 0x442   : > { %v2850_v56 = vmul.f32 %v9277_v20, %v9165_v62  ;;  %vm3121_vm3 = vmor %vm3119_vm0, %vm3120_vm15  ;;  %v2868_v9 = vadd.f32 %v9158_v23, %v2867_v42  ;;  %v2883_v45 = vadd.f32 %v9195_v21, %v2882_v59  ;;  %vm2884_vm7 = vweird.f32 %v9150_v11 }
 0x443   : > { %v9287_v7 = vpop.eup %4145  ;;  %v3116_v46 = vsub.f32 1.0, %v3115_v49  ;;  %v3102_v61 = vmul.f32 %v4140_v1, %v3101_v2  ;;  %v2875_v30 = vand.u32 2147483648, %v9131_v29  ;;  %vm9338_vm9 = vmor %vm2884_vm7, %vm2885_vm6  ;;  %4153 = vtanh.f32 %v9230_v12 }
 0x444   : > { %v3130_v18 = vmul.f32 %v9287_v7, %v9210_v6  ;;  %v4148_v55 = vpop.eup %4147  ;;  %v2851_v10 = vsub.f32 1.0, %v2850_v56  ;;  %vm3135_vm10 = vweird.f32 %v9287_v7  ;;  %v2887_v19 = vsel %vm9338_vm9, %v9195_v21, %v2883_v45 }
 0x445   : > { %v3117_v34 = vmul.f32 %v4142_v15, %v3116_v46  ;;  %v3103_v57 = vadd.f32 %v4140_v1, %v3102_v61  ;;  %v9299_v58 = vmul.f32 %v4148_v55, %v3097_v63  ;;  %v4150_v14 = vpop.eup %4149  ;;  %v3140_v59 = vand.u32 2147483648, %v9210_v6 }
 0x446   : > { %v3131_v50 = vsub.f32 1.0, %v3130_v18  ;;  %v2876_v2 = vor.u32 1.1754944e-38, %v2875_v30  ;;  %vm3134_vm11 = vweird.f32 %v9210_v6  ;;  %v3138_v49 = vand.u32 2147483647, %v9210_v6 }
 0x447   : > { %v3107_v0 = vsel %vm3106_vm1, %v4140_v1, %v3103_v57  ;;  %v3118_v35 = vadd.f32 %v4142_v15, %v3117_v34  ;;  %3172 = vmatmul.f32.vlgmr.msrb.gmra.mxu0 %v9299_v58  ;;  %3474 = vst [vmem:[#allocation2] sm:$0xff] %v9299_v58  ;;  %3195 = vmatmul.f32.vlgmr.msrb.gmra.mxu1 %v9299_v58  ;;  %vm3136_vm14 = vmor %vm3134_vm11, %vm3135_vm10  ;;  %v3141_v46 = vor.u32 1.1754944e-38, %v3140_v59  ;;  %vm2855_vm0 = vweird.f32 %v9277_v20 }
 0x448   : > { %v3112_v13 = vsel %vm3109_vm2, %v3111_v3, %v3107_v0  ;;  %v2847_v1 = vsel %vm9270_vm8, %v9215_v32, %v2842_v28  ;;  %v3132_v39 = vmul.f32 %v9287_v7, %v3131_v50  ;;  %3218 = vmatmul.f32.vlgmr.msrb.gmra.mxu2 %v9299_v58  ;;  %3241 = vmatmul.f32.vlgmr.msrb.gmra.mxu3 %v9299_v58  ;;  %v2890_v32 = vand.u32 2147483648, %v9150_v11  ;;  %vm9332_vm8 = vmor %vm2869_vm12, %vm2870_vm5 }
 0x449   : > { %v3122_v54 = vsel %vm3121_vm3, %v4142_v15, %v3118_v35  ;;  %v3149_v27 = vmul.f32 %v4150_v14, %v3112_v13  ;;  %v2888_v28 = vand.u32 2147483647, %v9150_v11  ;;  %v2911_v37 = vmul.f32 %v2847_v1, %v8512_v8  ;;  %v9345_v11 = vpop.eup %4151 }
 0x44a   : > { %v3127_v43 = vsel %vm3124_vm4, %v3126_v24, %v3122_v54  ;;  %v2913_v15 = vmul.f32 %v9171_v53, %v2832_v5  ;;  %v3133_v8 = vadd.f32 %v9287_v7, %v3132_v39  ;;  %v2872_v53 = vsel %vm9332_vm8, %v9158_v23, %v2868_v9  ;;  %v4154_v6 = vpop.eup %4153 }
 0x44b   : > { %v3147_v40 = vmul.f32 %v3127_v43, %v8462_v33  ;;  %v2891_v12 = vor.u32 1.1754944e-38, %v2890_v32  ;;  %v2852_v4 = vmul.f32 %v9277_v20, %v2851_v10  ;;  %vm2874_vm12 = vcmp.eq.f32.partialorder %v2873_v48, 8.507059e+37 }
 0x44c   : > { %v9359_v36 = vadd.f32 %v2913_v15, %v2911_v37  ;;  %vm2889_vm13 = vcmp.eq.f32.partialorder %v2888_v28, 8.507059e+37  ;;  %v2895_v23 = vmul.f32 %v9345_v11, %v9262_v44  ;;  %v2877_v21 = vsel %vm2874_vm12, %v2876_v2, %v2872_v53 }
 0x44d   : > { %v9336_v33 = vadd.f32 %v3149_v27, %v3147_v40  ;;  %v2892_v16 = vsel %vm2889_vm13, %v2891_v12, %v2887_v19  ;;  %v3137_v38 = vsel %vm3136_vm14, %v9287_v7, %v3133_v8  ;;  %vm3139_vm15 = vcmp.eq.f32.partialorder %v3138_v49, 8.507059e+37 }
 0x44e   : > { %v2912_v29 = vmul.f32 %v2892_v16, %v8579_v26  ;;  %v2914_v48 = vmul.f32 %v4154_v6, %v2877_v21  ;;  %v3142_v60 = vsel %vm3139_vm15, %v3141_v46, %v3137_v38  ;;  %v2896_v52 = vsub.f32 1.0, %v2895_v23 }
 0x44f   : > { %4155 = vtanh.f32 %v9336_v33  ;;  %3477 = vst [vmem:[#allocation3] sm:$0xff] %v9336_v33  ;;  %v2853_v34 = vadd.f32 %v9277_v20, %v2852_v4  ;;  %v2860_v57 = vand.u32 2147483648, %v9165_v62  ;;  %vm2854_vm1 = vweird.f32 %v9165_v62 }
 0x450   : > { %4157 = vtanh.f32 %v9359_v36  ;;  %v2858_v26 = vand.u32 2147483647, %v9165_v62  ;;  %v9380_v7 = vadd.f32 %v2914_v48, %v2912_v29  ;;  %vm2856_vm2 = vmor %vm2854_vm1, %vm2855_vm0  ;;  %v2897_v55 = vmul.f32 %v9345_v11, %v2896_v52 }
 0x451   : > { %v2857_v25 = vsel %vm2856_vm2, %v9277_v20, %v2853_v34  ;;  %v2861_v3 = vor.u32 1.1754944e-38, %v2860_v57  ;;  %vm2900_vm4 = vweird.f32 %v9345_v11  ;;  %v2905_v35 = vand.u32 2147483648, %v9262_v44 }
 0x452   : > { %vm2859_vm3 = vcmp.eq.f32.partialorder %v2858_v26, 8.507059e+37  ;;  %4159 = vtanh.f32 %v9380_v7  ;;  %v2898_v62 = vadd.f32 %v9345_v11, %v2897_v55  ;;  %vm2899_vm5 = vweird.f32 %v9262_v44 }
 0x453   : > { %v2862_v63 = vsel %vm2859_vm3, %v2861_v3, %v2857_v25  ;;  %v2903_v20 = vand.u32 2147483647, %v9262_v44  ;;  %vm2901_vm6 = vmor %vm2899_vm5, %vm2900_vm4  ;;  %v2906_v5 = vor.u32 1.1754944e-38, %v2905_v35 }
 0x454   : > { %v2902_v14 = vsel %vm2901_vm6, %v9345_v11, %v2898_v62 }
 0x455   : > { %v4156_v61 = vpop.eup %4155  ;;  %vm2904_vm7 = vcmp.eq.f32.partialorder %v2903_v20, 8.507059e+37 }
 0x456   : > { %v9370_v18 = vmul.f32 %v4156_v61, %v3142_v60  ;;  %v4158_v50 = vpop.eup %4157  ;;  %v2907_v24 = vsel %vm2904_vm7, %v2906_v5, %v2902_v14 }
 0x457   : > { %v2919_v0 = vmul.f32 %v4158_v50, %v2862_v63 }
 0x458   : > { %3175 = vmatmul.f32.gmra.mxu0 %v9370_v18  ;;  %3475 = vst [vmem:[#allocation2 + $0x8] sm:$0xff] %v9370_v18  ;;  %3198 = vmatmul.f32.gmra.mxu1 %v9370_v18  ;;  %v4160_v56 = vpop.eup %4159 }
 0x459   : > { %3221 = vmatmul.f32.gmra.mxu2 %v9370_v18  ;;  %3244 = vmatmul.f32.gmra.mxu3 %v9370_v18  ;;  %v2920_v13 = vmul.f32 %v4160_v56, %v2907_v24 }
 0x460   : > { %3264 = vmatmul.f32.vlgmr.msra.gmra.mxu0 %v2919_v0  ;;  %3287 = vmatmul.f32.vlgmr.msra.gmra.mxu1 %v2919_v0 }
 0x461   : > { %3310 = vmatmul.f32.vlgmr.msra.gmra.mxu2 %v2919_v0  ;;  %3333 = vmatmul.f32.vlgmr.msra.gmra.mxu3 %v2919_v0 }
 0x468   : > { %3267 = vmatmul.f32.gmra.mxu0 %v2920_v13  ;;  %3290 = vmatmul.f32.gmra.mxu1 %v2920_v13 }
 0x469   : > { %3313 = vmatmul.f32.gmra.mxu2 %v2920_v13  ;;  %3336 = vmatmul.f32.gmra.mxu3 %v2920_v13 }
 0x4c4   : > { %v3173_v54 = vpop.f32.mrf.mxu0  ;;  %v3196_v27 = vpop.f32.mrf.mxu1 }
 0x4cb   : > { %v3219_v1 = vpop.f32.mrf.mxu2  ;;  %v3242_v44 = vpop.f32.mrf.mxu3 }
 0x4d5   : > { %v3176_v39 = vpop.f32.mrf.mxu0  ;;  %v3199_v43 = vpop.f32.mrf.mxu1 }
 0x4dc   : > { %v3222_v9 = vpop.f32.mrf.mxu2  ;;  %v3245_v28 = vpop.f32.mrf.mxu3 }
 0x4dd   : > { %v3265_v45 = vpop.f32.mrf.mxu0  ;;  %v3288_v40 = vpop.f32.mrf.mxu1 }
 0x4de   : > { %v3266_v32 = vadd.f32 %v3265_v45, %v3173_v54  ;;  %v3289_v30 = vadd.f32 %v3288_v40, %v3196_v27 }
 0x4e0   : > { %v3340_v10 = vadd.f32 %v3266_v32, %v6509_v51  ;;  %v3341_v37 = vadd.f32 %v3289_v30, %v6511_v17 }
 0x4e2   : > { %v3815_v15 = vmul.f32 -1.442695, %v3340_v10  ;;  %v3816_v42 = vmul.f32 -1.442695, %v3341_v37 }
 0x4e4   : > { %4161 = vpow2.f32 %v3815_v15  ;;  %v3311_v47 = vpop.f32.mrf.mxu2  ;;  %v3334_v21 = vpop.f32.mrf.mxu3 }
 0x4e5   : > { %4163 = vpow2.f32 %v3816_v42  ;;  %v3312_v8 = vadd.f32 %v3311_v47, %v3219_v1  ;;  %v3268_v11 = vpop.f32.mrf.mxu0  ;;  %v3291_v53 = vpop.f32.mrf.mxu1  ;;  %v3335_v48 = vadd.f32 %v3334_v21, %v3242_v44 }
 0x4e6   : > { %v3269_v19 = vadd.f32 %v3268_v11, %v3176_v39  ;;  %v3292_v59 = vadd.f32 %v3291_v53, %v3199_v43 }
 0x4e7   : > { %v3342_v12 = vadd.f32 %v3312_v8, %v9860_v22 }
 0x4e8   : > { %v3344_v2 = vadd.f32 %v3269_v19, %v6509_v51  ;;  %v3345_v49 = vadd.f32 %v3292_v59, %v6511_v17  ;;  %v3343_v51 = vadd.f32 %v3335_v48, %v9861_v31 }
 0x4e9   : > { %v3817_v4 = vmul.f32 -1.442695, %v3342_v12 }
 0x4ea   : > { %v4162_v23 = vpop.eup %4161  ;;  %v3818_v16 = vmul.f32 -1.442695, %v3344_v2  ;;  %v3819_v6 = vmul.f32 -1.442695, %v3345_v49 }
 0x4eb   : > { %v4164_v38 = vpop.eup %4163  ;;  %v3366_v46 = vadd.f32 1.0, %v4162_v23  ;;  %4165 = vpow2.f32 %v3817_v4 }
 0x4ec   : > { %v3367_v61 = vadd.f32 1.0, %v4164_v38  ;;  %4167 = vpow2.f32 %v3818_v16  ;;  %v3314_v29 = vpop.f32.mrf.mxu2  ;;  %v3337_v35 = vpop.f32.mrf.mxu3 }
 0x4ed   : > { %4169 = vrcp.f32 %v3366_v46  ;;  %v3315_v60 = vadd.f32 %v3314_v29, %v3222_v9  ;;  %v3381_v62 = vand.u32 2147483647, %v3366_v46  ;;  %v3383_v14 = vand.u32 2147483648, %v3366_v46 }
 0x4ee   : > { %4171 = vrcp.f32 %v3367_v61  ;;  %v3398_v5 = vand.u32 2147483648, %v3367_v61  ;;  %v3396_v24 = vand.u32 2147483647, %v3367_v61  ;;  %v3338_v54 = vadd.f32 %v3337_v35, %v3245_v28 }
 0x4ef   : > { %4173 = vpow2.f32 %v3819_v6  ;;  %v3346_v17 = vadd.f32 %v3315_v60, %v9860_v22  ;;  %vm3392_vm10 = vweird.f32 %v3367_v61  ;;  %vm3377_vm11 = vweird.f32 %v3366_v46 }
 0x4f0   : > { %vm3382_vm13 = vcmp.eq.f32.partialorder %v3381_v62, 8.507059e+37  ;;  %v3384_v9 = vor.u32 1.1754944e-38, %v3383_v14  ;;  %v3399_v32 = vor.u32 1.1754944e-38, %v3398_v5  ;;  %vm3397_vm15 = vcmp.eq.f32.partialorder %v3396_v24, 8.507059e+37 }
 0x4f1   : > { %v4166_v52 = vpop.eup %4165  ;;  %v3820_v55 = vmul.f32 -1.442695, %v3346_v17  ;;  %v3347_v28 = vadd.f32 %v3338_v54, %v9861_v31 }
 0x4f2   : > { %v4168_v34 = vpop.eup %4167  ;;  %v9400_v57 = vadd.f32 1.0, %v4166_v52 }
 0x4f3   : > { %v4170_v26 = vpop.eup %4169  ;;  %v9402_v25 = vadd.f32 1.0, %v4168_v34 }
 0x4f4   : > { %v4172_v50 = vpop.eup %4171  ;;  %v3373_v3 = vmul.f32 %v4170_v26, %v3366_v46  ;;  %4175 = vrcp.f32 %v9400_v57  ;;  %vm3378_vm8 = vweird.f32 %v4170_v26  ;;  %vm3407_vm0 = vweird.f32 %v9400_v57 }
 0x4f5   : > { %v4174_v63 = vpop.eup %4173  ;;  %v3388_v0 = vmul.f32 %v4172_v50, %v3367_v61  ;;  %4177 = vtanh.f32 %v3343_v51  ;;  %vm3393_vm9 = vweird.f32 %v4172_v50  ;;  %vm3379_vm12 = vmor %vm3377_vm11, %vm3378_vm8  ;;  %v3413_v49 = vand.u32 2147483648, %v9400_v57 }
 0x4f6   : > { %v3374_v20 = vsub.f32 1.0, %v3373_v3  ;;  %4179 = vrcp.f32 %v9402_v25  ;;  %v9406_v22 = vadd.f32 1.0, %v4174_v63  ;;  %vm3394_vm14 = vmor %vm3392_vm10, %vm3393_vm9  ;;  %v3428_v23 = vand.u32 2147483648, %v9402_v25 }
 0x4f7   : > { %v3389_v56 = vsub.f32 1.0, %v3388_v0  ;;  %4181 = vpow2.f32 %v3820_v55  ;;  %v3426_v46 = vand.u32 2147483647, %v9402_v25  ;;  %v3411_v48 = vand.u32 2147483647, %v9400_v57 }
 0x4f8   : > { %v3375_v13 = vmul.f32 %v4170_v26, %v3374_v20  ;;  %4183 = vrcp.f32 %v9406_v22  ;;  %v3443_v4 = vand.u32 2147483648, %v9406_v22  ;;  %v3441_v61 = vand.u32 2147483647, %v9406_v22 }
 0x4f9   : > { %v3390_v27 = vmul.f32 %v4172_v50, %v3389_v56  ;;  %vm3422_vm5 = vweird.f32 %v9402_v25  ;;  %v3414_v52 = vor.u32 1.1754944e-38, %v3413_v49  ;;  %vm3437_vm6 = vweird.f32 %v9406_v22 }
 0x4fa   : > { %v9409_v1 = vpop.eup %4175  ;;  %v3376_v39 = vadd.f32 %v4170_v26, %v3375_v13  ;;  %v3429_v51 = vor.u32 1.1754944e-38, %v3428_v23  ;;  %v3444_v55 = vor.u32 1.1754944e-38, %v3443_v4  ;;  %vm3427_vm9 = vcmp.eq.f32.partialorder %v3426_v46, 8.507059e+37 }
 0x4fb   : > { %v4178_v43 = vpop.eup %4177  ;;  %v3403_v44 = vmul.f32 %v9409_v1, %v9400_v57  ;;  %v3391_v45 = vadd.f32 %v4172_v50, %v3390_v27  ;;  %vm3408_vm1 = vweird.f32 %v9409_v1  ;;  %vm3442_vm10 = vcmp.eq.f32.partialorder %v3441_v61, 8.507059e+37 }
 0x4fc   : > { %v4180_v40 = vpop.eup %4179  ;;  %v3380_v30 = vsel %vm3379_vm12, %v4170_v26, %v3376_v39  ;;  %vm9435_vm4 = vmor %vm3407_vm0, %vm3408_vm1  ;;  %vm3412_vm11 = vcmp.eq.f32.partialorder %v3411_v48, 8.507059e+37 }
 0x4fd   : > { %v4182_v10 = vpop.eup %4181  ;;  %v3404_v37 = vsub.f32 1.0, %v3403_v44  ;;  %v3385_v15 = vsel %vm3382_vm13, %v3384_v9, %v3380_v30  ;;  %v3395_v42 = vsel %vm3394_vm14, %v4172_v50, %v3391_v45  ;;  %v3418_v47 = vmul.f32 %v4180_v40, %v9402_v25 }
 0x4fe   : > { %v4184_v8 = vpop.eup %4183  ;;  %v3400_v11 = vsel %vm3397_vm15, %v3399_v32, %v3395_v42  ;;  %v3466_v53 = vmul.f32 %v4178_v43, %v3385_v15  ;;  %v9416_v19 = vadd.f32 1.0, %v4182_v10  ;;  %vm3423_vm2 = vweird.f32 %v4180_v40 }
 0x4ff   : > { %v3405_v59 = vmul.f32 %v9409_v1, %v3404_v37  ;;  %v3464_v12 = vmul.f32 %v3400_v11, %v9359_v36  ;;  %v3419_v2 = vsub.f32 1.0, %v3418_v47  ;;  %v3433_v31 = vmul.f32 %v4184_v8, %v9406_v22  ;;  %vm3424_vm7 = vmor %vm3422_vm5, %vm3423_vm2 }
 0x500   : > { %4185 = vrcp.f32 %v9416_v19  ;;  %vm3438_vm3 = vweird.f32 %v4184_v8  ;;  %v3458_v54 = vand.u32 2147483648, %v9416_v19  ;;  %vm3452_vm13 = vweird.f32 %v9416_v19 }
 0x501   : > { %v9426_v21 = vadd.f32 %v3466_v53, %v3464_v12  ;;  %v3434_v16 = vsub.f32 1.0, %v3433_v31  ;;  %4187 = vtanh.f32 %v3347_v28  ;;  %v3406_v38 = vadd.f32 %v9409_v1, %v3405_v59  ;;  %vm3439_vm8 = vmor %vm3437_vm6, %vm3438_vm3 }
 0x502   : > { %v3420_v36 = vmul.f32 %v4180_v40, %v3419_v2  ;;  %v3456_v27 = vand.u32 2147483647, %v9416_v19  ;;  %v3459_v39 = vor.u32 1.1754944e-38, %v3458_v54 }
 0x503   : > { %4189 = vtanh.f32 %v9426_v21  ;;  %3480 = vst [vmem:[#allocation5] sm:$0xff] %v9426_v21  ;;  %v3435_v6 = vmul.f32 %v4184_v8, %v3434_v16  ;;  %v3410_v26 = vsel %vm9435_vm4, %v9409_v1, %v3406_v38 }
 0x504   : > { %v3421_v60 = vadd.f32 %v4180_v40, %v3420_v36  ;;  %v3415_v20 = vsel %vm3412_vm11, %v3414_v52, %v3410_v26  ;;  %vm3457_vm15 = vcmp.eq.f32.partialorder %v3456_v27, 8.507059e+37 }
 0x505   : > { %v3436_v17 = vadd.f32 %v4184_v8, %v3435_v6 }
 0x506   : > { %v4186_v34 = vpop.eup %4185  ;;  %v3425_v50 = vsel %vm3424_vm7, %v4180_v40, %v3421_v60 }
 0x507   : > { %v4188_v3 = vpop.eup %4187  ;;  %v3448_v57 = vmul.f32 %v4186_v34, %v9416_v19  ;;  %v3430_v63 = vsel %vm3427_vm9, %v3429_v51, %v3425_v50  ;;  %v3440_v25 = vsel %vm3439_vm8, %v4184_v8, %v3436_v17  ;;  %vm3453_vm12 = vweird.f32 %v4186_v34 }
 0x508   : > { %v3445_v0 = vsel %vm3442_vm10, %v3444_v55, %v3440_v25  ;;  %v3467_v62 = vmul.f32 %v4188_v3, %v3430_v63  ;;  %vm3454_vm14 = vmor %vm3452_vm13, %vm3453_vm12 }
 0x509   : > { %v4190_v35 = vpop.eup %4189  ;;  %v3449_v14 = vsub.f32 1.0, %v3448_v57  ;;  %v3465_v22 = vmul.f32 %v3445_v0, %v9380_v7 }
 0x50a   : > { %v3472_v56 = vmul.f32 %v4190_v35, %v3415_v20 }
 0x50b   : > { %v3450_v5 = vmul.f32 %v4186_v34, %v3449_v14  ;;  %v3469_v24 = vadd.f32 %v3467_v62, %v3465_v22 }
 0x50c   : > { %3478 = vst [vmem:[#allocation4 + $0x8] sm:$0xff] %v3472_v56 }
 0x50d   : > { %v3451_v13 = vadd.f32 %v4186_v34, %v3450_v5  ;;  %4191 = vtanh.f32 %v3469_v24  ;;  %3481 = vst [vmem:[#allocation5 + $0x8] sm:$0xff] %v3469_v24 }
 0x50f   : > { %v3455_v1 = vsel %vm3454_vm14, %v4186_v34, %v3451_v13 }
 0x510   : > { %v3460_v7 = vsel %vm3457_vm15, %v3459_v39, %v3455_v1 }
 0x512   : > { %3485 = sbr.rel (%p3821_p6) target bundleno = 1461 (0x5b5), region = 64 }
 0x513   : > { %v4192_v43 = vpop.eup %4191 }
 0x514   : > { %v3473_v44 = vmul.f32 %v4192_v43, %v3460_v7 }
 0x516   : > { %3479 = vst [vmem:[#allocation4] sm:$0xff] %v3473_v44 }
 0x517   : > { %v4804_v9 = vld [vmem:[%s9507_s7] ss:$0 sm:$0xff]  ;;  %3541 = vst [vmem:[#allocation7] sm:$0xff] %v9299_v58  ;;  %v3497_v32 = vstv %s3496_s19  ;;  %vm3538_vm2 = vcmask 7168  }
 0x518   : > { %v3490_v45 = vmul.f32 %v4804_v9, %v3472_v56  ;;  %3542 = vst [vmem:[#allocation7 + $0x8] sm:$0xff] %v9370_v18  ;;  %v3491_v40 = vmul.f32 %v4804_v9, %v3473_v44 }
 0x519   : > { %3544 = vst [vmem:[#allocation7 + $0x10] sm:$0xff] %v3472_v56 }
 0x51a   : > { %3492 = vadd.xlane.f32.xlu0 %v3490_v45  ;;  %3545 = vst [vmem:[#allocation7 + $0x18] sm:$0xff] %v3473_v44 }
 0x51b   : > { %3546 = vst [vmem:[#allocation9] sm:$0xff] %v9247_v41 }
 0x51c   : > { %3547 = vst [vmem:[#allocation9 + $0x8] sm:$0xff] %v9336_v33 }
 0x51d   : > { %3549 = vst [vmem:[#allocation9 + $0x10] sm:$0xff] %v9426_v21 }
 0x51e   : > { %3550 = vst [vmem:[#allocation9 + $0x18] sm:$0xff] %v3469_v24 }
 0x522   : > { %3494 = vadd.xlane.f32.xlu0 %v3491_v40 }
 0x58d   : > { %v3493_v30 = vpop.xlane.xlu0 %3492 }
 0x58e   : > { %v3498_v28 = vadd.f32 %v3497_v32, %v3493_v30 }
 0x590   : > { %v3822_v58 = vmul.f32 -1.442695, %v3498_v28 }
 0x592   : > { %4805 = vpow2.f32 %v3822_v58 }
 0x595   : > { %v3495_v10 = vpop.xlane.xlu0 %3494 }
 0x596   : > { %v3499_v18 = vadd.f32 %v3497_v32, %v3495_v10 }
 0x598   : > { %v4806_v37 = vpop.eup %4805  ;;  %v3823_v15 = vmul.f32 -1.442695, %v3499_v18 }
 0x599   : > { %v3506_v42 = vadd.f32 1.0, %v4806_v37 }
 0x59a   : > { %4807 = vpow2.f32 %v3823_v15 }
 0x59b   : > { %4809 = vrcp.f32 %v3506_v42  ;;  %v3519_v53 = vand.u32 2147483648, %v3506_v42  ;;  %v3517_v59 = vand.u32 2147483647, %v3506_v42  ;;  %vm3513_vm1 = vweird.f32 %v3506_v42 }
 0x59d   : > { %v3520_v31 = vor.u32 1.1754944e-38, %v3519_v53  ;;  %vm3518_vm4 = vcmp.eq.f32.partialorder %v3517_v59, 8.507059e+37 }
 0x5a0   : > { %v4808_v41 = vpop.eup %4807 }
 0x5a1   : > { %v4810_v33 = vpop.eup %4809  ;;  %v3507_v47 = vadd.f32 1.0, %v4808_v41 }
 0x5a2   : > { %v3509_v8 = vmul.f32 %v4810_v33, %v3506_v42  ;;  %vm3514_vm0 = vweird.f32 %v4810_v33 }
 0x5a3   : > { %4811 = vrcp.f32 %v3507_v47  ;;  %vm3515_vm3 = vmor %vm3513_vm1, %vm3514_vm0  ;;  %v3534_v16 = vand.u32 2147483648, %v3507_v47  ;;  %v3532_v36 = vand.u32 2147483647, %v3507_v47  ;;  %vm3528_vm6 = vweird.f32 %v3507_v47 }
 0x5a4   : > { %v3510_v11 = vsub.f32 1.0, %v3509_v8 }
 0x5a5   : > { %v3535_v6 = vor.u32 1.1754944e-38, %v3534_v16  ;;  %vm3533_vm8 = vcmp.eq.f32.partialorder %v3532_v36, 8.507059e+37 }
 0x5a6   : > { %v3511_v19 = vmul.f32 %v4810_v33, %v3510_v11 }
 0x5a8   : > { %v3512_v12 = vadd.f32 %v4810_v33, %v3511_v19 }
 0x5a9   : > { %v4812_v2 = vpop.eup %4811 }
 0x5aa   : > { %v3516_v49 = vsel %vm3515_vm3, %v4810_v33, %v3512_v12  ;;  %v3524_v4 = vmul.f32 %v4812_v2, %v3507_v47  ;;  %vm3529_vm5 = vweird.f32 %v4812_v2 }
 0x5ab   : > { %v3521_v23 = vsel %vm3518_vm4, %v3520_v31, %v3516_v49  ;;  %vm3530_vm7 = vmor %vm3528_vm6, %vm3529_vm5 }
 0x5ac   : > { %3539 = vst.msk [vmem:[%s9509_s9] sm:$0xff] %vm3538_vm2, %v3521_v23  ;;  %v3525_v21 = vsub.f32 1.0, %v3524_v4 }
 0x5ae   : > { %v3526_v38 = vmul.f32 %v4812_v2, %v3525_v21 }
 0x5b0   : > { %v3527_v46 = vadd.f32 %v4812_v2, %v3526_v38 }
 0x5b2   : > { %v3531_v61 = vsel %vm3530_vm7, %v4812_v2, %v3527_v46 }
 0x5b3   : > { %v3536_v29 = vsel %vm3533_vm8, %v3535_v6, %v3531_v61 }
 0x5b4   : > { %3540 = vst.msk [vmem:[%s9509_s9 + $0x8] sm:$0xff] %vm3538_vm2, %v3536_v29 }
 0x5b5 PF: > { %p9469_p7 = scmp.eq.s32.totalorder %s3716_s8, 1  ;;  %s3570_s17 = sshll.u32 %s9510_s10, 4  ;;  %s3571_s17 = int_to_ptr.hbm [resolvable:$true] %s3570_s17 }
 0x5b6   : > { %s4901_s18 = smov [#allocation7]   ;;  %s4902_s24 = smov 128  }
 0x5b7   : > { %s3568_s23 = sshll.u32 %s4901_s18, 4  ;;  %s4903_s25 = smov 8   ;;  %s3569_s23 = int_to_ptr.vmem [resolvable:$true] %s3568_s23 }
 0x5b8   : > { %3834 = dma.vmem_to_hbm [thread:$0]  (%p9469_p7), %s3569_s23, 512, %s3571_s17, [#allocation8], %s4902_s24, %s4902_s24, %s4903_s25  }
 0x5b9   : > { %s4904_s26 = smov [#allocation9]   ;;  %s3587_s19 = sshll.u32 %s9511_s11, 4  ;;  %s3588_s19 = int_to_ptr.hbm [resolvable:$true] %s3587_s19 }
 0x5ba   : > { %s3585_s8 = sshll.u32 %s4904_s26, 4  ;;  %s3586_s8 = int_to_ptr.vmem [resolvable:$true] %s3585_s8 }
 0x5bb   : > { %3836 = dma.vmem_to_hbm [thread:$0]  (%p9469_p7), %s3586_s8, 512, %s3588_s19, [#allocation10], %s4902_s24, %s4902_s24, %s4903_s25  }
 0x5bc   : > { %4882 = dma.done.wait (%p9469_p7), [#allocation8], 512  }
 0x5bd   : > { %4884 = vsyncadd (%p9469_p7), [#allocation8], 4294966784 }
 0x5be   : > { %4886 = dma.done.wait (%p9469_p7), [#allocation10], 512  }
 0x5bf   : > { %4888 = vsyncadd (%p9469_p7), [#allocation10], 4294966784 }
 0x5c0 PF: > { %s25_s21 = sadd.s32 1, %s4899_s21   ;;  %s9916_s19 = smov %s4895_s20 }
 0x5c1   : > { %p22_p8 = scmp.ge.s32.totalorder %s25_s21, 4   ;;  %s9917_s20 = smov %s9919_s22 }
 0x5c3   :  { %24 = sbr.rel (!%p22_p8) target bundleno = 5 (0x5), region = 127 }
 0x5c8   :  { %3617 = vsyncpa [#allocation8], 1 }
 0x5c9   :  { %3619 = vsyncpa [#allocation8 + $0x1], 1 }
 0x5ca   :  { %3620 = vsyncpa [#allocation10], 1 }

</bundles_post_ra>
